<compile_context>
chip_gen: v5e
topology: v5e:2x2
jax: 0.10.0
libtpu: 0.0.40
codegen_flags: <defaults>
</compile_context>

<pallas_src>
import functools

import jax
import jax.numpy as jnp
import numpy as np
from jax.experimental import pallas as pl
from jax.experimental.pallas import tpu as pltpu


def _generator_kernel(*refs, normalize_flags, eps, negative_slope):
    """Fully fused generator MLP. refs = (z, per-layer params..., out)."""
    z_ref = refs[0]
    o_ref = refs[-1]
    p_refs = list(refs[1:-1])

    n_layers = len(normalize_flags)
    h = z_ref[...]                                          # (B, latent) f32
    idx = 0
    for li, norm in enumerate(normalize_flags):
        w_ref = p_refs[idx]; idx += 1                       # (K, N) bf16
        # bf16 x bf16 MXU matmul, f32 accumulation.
        y = jnp.dot(h.astype(jnp.bfloat16), w_ref[...],
                    preferred_element_type=jnp.float32)     # (B, N) f32

        if norm:
            gb_ref = p_refs[idx]; idx += 1                  # (2, N) f32: [gamma; beta]
            # Linear bias is omitted: it cancels exactly under mean subtraction.
            # BatchNorm1d training mode: batch mean / biased variance, one pass.
            mean = jnp.mean(y, axis=0, keepdims=True)
            var = jnp.mean(y * y, axis=0, keepdims=True) - mean * mean
            y = (y - mean) * jax.lax.rsqrt(var + eps)
            y = y * gb_ref[0:1, :] + gb_ref[1:2, :]
        else:
            b_ref = p_refs[idx]; idx += 1                   # (1, N) f32
            y = y + b_ref[...]

        if li == n_layers - 1:
            h = jnp.tanh(y)
        else:
            h = jnp.where(y > 0, y, negative_slope * y)

    o_ref[...] = h.astype(o_ref.dtype)


def generator_forward(params, z, img_shape, *, eps=0.8, negative_slope=0.2):
    """Single fused pallas_call for the whole generator MLP."""
    B = z.shape[0]
    n_out = int(np.prod(img_shape))

    flat_args = [z]
    normalize_flags = []
    for p in params:
        normalize_flags.append(bool(p["normalize"]))
        flat_args.append(p["w"])                                   # (K, N) bf16
        if p["normalize"]:
            flat_args.append(jnp.stack([p["gamma"], p["beta"]]))   # (2, N) f32
        else:
            flat_args.append(p["b"].reshape(1, -1))                # (1, N) f32

    def full_spec(a):
        return pl.BlockSpec(a.shape, lambda i: (0,) * a.ndim)

    kernel = functools.partial(
        _generator_kernel,
        normalize_flags=tuple(normalize_flags),
        eps=eps,
        negative_slope=negative_slope)

    out = pl.pallas_call(
        kernel,
        out_shape=jax.ShapeDtypeStruct((B, n_out), jnp.float32),
        grid=(1,),
        in_specs=[full_spec(a) for a in flat_args],
        out_specs=pl.BlockSpec((B, n_out), lambda i: (0, 0)),
        compiler_params=pltpu.CompilerParams(
            dimension_semantics=("arbitrary",)),
    )(*flat_args)
    return out.reshape(B, *img_shape)


def init_linear(key, in_feat, out_feat):
    """PyTorch-style uniform(-1/sqrt(fan_in), 1/sqrt(fan_in)) init."""
    kw, kb = jax.random.split(key)
    bound = 1.0 / np.sqrt(in_feat)
    w = jax.random.uniform(kw, (in_feat, out_feat), jnp.float32, -bound, bound)
    b = jax.random.uniform(kb, (out_feat,), jnp.float32, -bound, bound)
    return w, b


def init_generator_params(key, latent_dim, img_shape):
    dims = [latent_dim, 128, 256, 512, 1024, int(np.prod(img_shape))]
    normalize_flags = [False, True, True, True, False]  # last = output layer
    params = []
    keys = jax.random.split(key, len(dims) - 1)
    for i, (din, dout) in enumerate(zip(dims[:-1], dims[1:])):
        w, b = init_linear(keys[i], din, dout)
        params.append(dict(
            w=w.astype(jnp.bfloat16),             # bf16 storage halves weight DMA
            b=b,                                  # f32 (cancels for BN layers)
            gamma=jnp.ones((dout,), jnp.float32), # BatchNorm weight init = 1
            beta=jnp.zeros((dout,), jnp.float32), # BatchNorm bias init = 0
            normalize=normalize_flags[i]))
    return params


def generator_ref(params, z, img_shape):
    """Pure-JAX f32 reference (keeps the bias on BN layers; it must cancel)."""
    h = z
    n_layers = len(params)
    for i, p in enumerate(params):
        is_last = i == n_layers - 1
        y = h @ p["w"].astype(jnp.float32) + p["b"][None, :]
        if p["normalize"]:
            mean = jnp.mean(y, axis=0, keepdims=True)
            var = jnp.mean((y - mean) ** 2, axis=0, keepdims=True)
            y = (y - mean) / jnp.sqrt(var + 0.8)
            y = y * p["gamma"][None, :] + p["beta"][None, :]
        h = jnp.tanh(y) if is_last else jnp.where(y > 0, y, 0.2 * y)
    return h.reshape(z.shape[0], *img_shape)


if __name__ == "__main__":
    latent_dim = 64
    img_shape = (1, 16, 16)   # -> final linear: 1024 -> 256
    B = 8

    key = jax.random.PRNGKey(0)
    k_param, k_z = jax.random.split(key)
    params = init_generator_params(k_param, latent_dim, img_shape)
    z = jax.random.normal(k_z, (B, latent_dim), jnp.float32)

    img = jax.block_until_ready(generator_forward(params, z, img_shape))
    assert img.shape == (B, *img_shape), img.shape

    ref = jax.block_until_ready(generator_ref(params, z, img_shape))
    np.testing.assert_allclose(np.asarray(img), np.asarray(ref),
                               rtol=2e-2, atol=2e-2)

    print("KERNEL_OK")
</pallas_src>

<mosaic_0001>
module attributes {stable_mosaic.version = 11 : i64} {
  func.func @_generator_kernel(%arg0: i32, %arg1: memref<8x64xf32, #tpu.memory_space<vmem>>, %arg2: memref<64x128xbf16, #tpu.memory_space<vmem>>, %arg3: memref<1x128xf32, #tpu.memory_space<vmem>>, %arg4: memref<128x256xbf16, #tpu.memory_space<vmem>>, %arg5: memref<2x256xf32, #tpu.memory_space<vmem>>, %arg6: memref<256x512xbf16, #tpu.memory_space<vmem>>, %arg7: memref<2x512xf32, #tpu.memory_space<vmem>>, %arg8: memref<512x1024xbf16, #tpu.memory_space<vmem>>, %arg9: memref<2x1024xf32, #tpu.memory_space<vmem>>, %arg10: memref<1024x256xbf16, #tpu.memory_space<vmem>>, %arg11: memref<1x256xf32, #tpu.memory_space<vmem>>, %arg12: memref<8x256xf32, #tpu.memory_space<vmem>>) attributes {dimension_semantics = [#tpu.dimension_semantics<arbitrary>], iteration_bounds = array<i64: 1>, scalar_prefetch = 0 : i64, scratch_operands = 0 : i64, tpu.core_type = #tpu.core_type<tc>, window_params = [{pipeline_mode = #tpu.pipeline_mode<synchronous>, transform_indices = @transform_0, window_bounds = array<i64: 8, 64>}, {pipeline_mode = #tpu.pipeline_mode<synchronous>, transform_indices = @transform_1, window_bounds = array<i64: 64, 128>}, {pipeline_mode = #tpu.pipeline_mode<synchronous>, transform_indices = @transform_2, window_bounds = array<i64: 1, 128>}, {pipeline_mode = #tpu.pipeline_mode<synchronous>, transform_indices = @transform_3, window_bounds = array<i64: 128, 256>}, {pipeline_mode = #tpu.pipeline_mode<synchronous>, transform_indices = @transform_4, window_bounds = array<i64: 2, 256>}, {pipeline_mode = #tpu.pipeline_mode<synchronous>, transform_indices = @transform_5, window_bounds = array<i64: 256, 512>}, {pipeline_mode = #tpu.pipeline_mode<synchronous>, transform_indices = @transform_6, window_bounds = array<i64: 2, 512>}, {pipeline_mode = #tpu.pipeline_mode<synchronous>, transform_indices = @transform_7, window_bounds = array<i64: 512, 1024>}, {pipeline_mode = #tpu.pipeline_mode<synchronous>, transform_indices = @transform_8, window_bounds = array<i64: 2, 1024>}, {pipeline_mode = #tpu.pipeline_mode<synchronous>, transform_indices = @transform_9, window_bounds = array<i64: 1024, 256>}, {pipeline_mode = #tpu.pipeline_mode<synchronous>, transform_indices = @transform_10, window_bounds = array<i64: 1, 256>}, {pipeline_mode = #tpu.pipeline_mode<synchronous>, transform_indices = @transform_11, window_bounds = array<i64: 8, 256>}]} {
    %c0 = arith.constant 0 : index
    %c0_0 = arith.constant 0 : index
    %0 = vector.load %arg1[%c0, %c0_0] : memref<8x64xf32, #tpu.memory_space<vmem>>, vector<8x64xf32>
    %1 = arith.truncf %0 : vector<8x64xf32> to vector<8x64xbf16>
    %c0_1 = arith.constant 0 : index
    %c0_2 = arith.constant 0 : index
    %2 = vector.load %arg2[%c0_1, %c0_2] : memref<64x128xbf16, #tpu.memory_space<vmem>>, vector<64x128xbf16>
    %cst = arith.constant dense<0.000000e+00> : vector<8x128xf32>
    %3 = tpu.matmul %1, %2, %cst {dimension_numbers = #tpu.dot_dimension_numbers<[1], [0], [0], [1], [0, 0, 1, 1], [], []>} : vector<8x64xbf16>, vector<64x128xbf16>, vector<8x128xf32> -> vector<8x128xf32>
    %c0_3 = arith.constant 0 : index
    %c0_4 = arith.constant 0 : index
    %4 = vector.load %arg3[%c0_3, %c0_4] : memref<1x128xf32, #tpu.memory_space<vmem>>, vector<1x128xf32>
    %5 = vector.broadcast %4 : vector<1x128xf32> to vector<8x128xf32>
    %6 = arith.addf %3, %5 : vector<8x128xf32>
    %cst_5 = arith.constant 0.000000e+00 : f32
    %7 = vector.broadcast %cst_5 : f32 to vector<8x128xf32>
    %8 = arith.cmpf ogt, %6, %7 : vector<8x128xf32>
    %cst_6 = arith.constant 2.000000e-01 : f32
    %9 = vector.broadcast %cst_6 : f32 to vector<8x128xf32>
    %10 = arith.mulf %9, %6 : vector<8x128xf32>
    %11 = arith.select %8, %6, %10 : vector<8x128xi1>, vector<8x128xf32>
    %12 = arith.truncf %11 : vector<8x128xf32> to vector<8x128xbf16>
    %c0_7 = arith.constant 0 : index
    %c0_8 = arith.constant 0 : index
    %13 = vector.load %arg4[%c0_7, %c0_8] : memref<128x256xbf16, #tpu.memory_space<vmem>>, vector<128x256xbf16>
    %cst_9 = arith.constant dense<0.000000e+00> : vector<8x256xf32>
    %14 = tpu.matmul %12, %13, %cst_9 {dimension_numbers = #tpu.dot_dimension_numbers<[1], [0], [0], [1], [0, 0, 1, 1], [], []>} : vector<8x128xbf16>, vector<128x256xbf16>, vector<8x256xf32> -> vector<8x256xf32>
    %cst_10 = arith.constant dense<0.000000e+00> : vector<256xf32>
    %15 = vector.multi_reduction <add>, %14, %cst_10 [0] : vector<8x256xf32> to vector<256xf32>
    %16 = vector.shape_cast %15 : vector<256xf32> to vector<1x256xf32>
    %cst_11 = arith.constant 8.000000e+00 : f32
    %17 = vector.broadcast %cst_11 : f32 to vector<1x256xf32>
    %18 = arith.divf %16, %17 : vector<1x256xf32>
    %19 = arith.mulf %14, %14 : vector<8x256xf32>
    %cst_12 = arith.constant dense<0.000000e+00> : vector<256xf32>
    %20 = vector.multi_reduction <add>, %19, %cst_12 [0] : vector<8x256xf32> to vector<256xf32>
    %21 = vector.shape_cast %20 : vector<256xf32> to vector<1x256xf32>
    %cst_13 = arith.constant 8.000000e+00 : f32
    %22 = vector.broadcast %cst_13 : f32 to vector<1x256xf32>
    %23 = arith.divf %21, %22 : vector<1x256xf32>
    %24 = arith.mulf %18, %18 : vector<1x256xf32>
    %25 = arith.subf %23, %24 : vector<1x256xf32>
    %26 = vector.broadcast %18 : vector<1x256xf32> to vector<8x256xf32>
    %27 = arith.subf %14, %26 : vector<8x256xf32>
    %cst_14 = arith.constant 8.000000e-01 : f32
    %28 = vector.broadcast %cst_14 : f32 to vector<1x256xf32>
    %29 = arith.addf %25, %28 : vector<1x256xf32>
    %30 = math.rsqrt %29 : vector<1x256xf32>
    %31 = vector.broadcast %30 : vector<1x256xf32> to vector<8x256xf32>
    %32 = arith.mulf %27, %31 : vector<8x256xf32>
    %c0_15 = arith.constant 0 : index
    %c0_16 = arith.constant 0 : index
    %33 = vector.load %arg5[%c0_15, %c0_16] : memref<2x256xf32, #tpu.memory_space<vmem>>, vector<1x256xf32>
    %34 = vector.broadcast %33 : vector<1x256xf32> to vector<8x256xf32>
    %35 = arith.mulf %32, %34 : vector<8x256xf32>
    %c1 = arith.constant 1 : index
    %c0_17 = arith.constant 0 : index
    %36 = vector.load %arg5[%c1, %c0_17] : memref<2x256xf32, #tpu.memory_space<vmem>>, vector<1x256xf32>
    %37 = vector.broadcast %36 : vector<1x256xf32> to vector<8x256xf32>
    %38 = arith.addf %35, %37 : vector<8x256xf32>
    %cst_18 = arith.constant 0.000000e+00 : f32
    %39 = vector.broadcast %cst_18 : f32 to vector<8x256xf32>
    %40 = arith.cmpf ogt, %38, %39 : vector<8x256xf32>
    %cst_19 = arith.constant 2.000000e-01 : f32
    %41 = vector.broadcast %cst_19 : f32 to vector<8x256xf32>
    %42 = arith.mulf %41, %38 : vector<8x256xf32>
    %43 = arith.select %40, %38, %42 : vector<8x256xi1>, vector<8x256xf32>
    %44 = arith.truncf %43 : vector<8x256xf32> to vector<8x256xbf16>
    %c0_20 = arith.constant 0 : index
    %c0_21 = arith.constant 0 : index
    %45 = vector.load %arg6[%c0_20, %c0_21] : memref<256x512xbf16, #tpu.memory_space<vmem>>, vector<256x512xbf16>
    %cst_22 = arith.constant dense<0.000000e+00> : vector<8x512xf32>
    %46 = tpu.matmul %44, %45, %cst_22 {dimension_numbers = #tpu.dot_dimension_numbers<[1], [0], [0], [1], [0, 0, 1, 1], [], []>} : vector<8x256xbf16>, vector<256x512xbf16>, vector<8x512xf32> -> vector<8x512xf32>
    %cst_23 = arith.constant dense<0.000000e+00> : vector<512xf32>
    %47 = vector.multi_reduction <add>, %46, %cst_23 [0] : vector<8x512xf32> to vector<512xf32>
    %48 = vector.shape_cast %47 : vector<512xf32> to vector<1x512xf32>
    %cst_24 = arith.constant 8.000000e+00 : f32
    %49 = vector.broadcast %cst_24 : f32 to vector<1x512xf32>
    %50 = arith.divf %48, %49 : vector<1x512xf32>
    %51 = arith.mulf %46, %46 : vector<8x512xf32>
    %cst_25 = arith.constant dense<0.000000e+00> : vector<512xf32>
    %52 = vector.multi_reduction <add>, %51, %cst_25 [0] : vector<8x512xf32> to vector<512xf32>
    %53 = vector.shape_cast %52 : vector<512xf32> to vector<1x512xf32>
    %cst_26 = arith.constant 8.000000e+00 : f32
    %54 = vector.broadcast %cst_26 : f32 to vector<1x512xf32>
    %55 = arith.divf %53, %54 : vector<1x512xf32>
    %56 = arith.mulf %50, %50 : vector<1x512xf32>
    %57 = arith.subf %55, %56 : vector<1x512xf32>
    %58 = vector.broadcast %50 : vector<1x512xf32> to vector<8x512xf32>
    %59 = arith.subf %46, %58 : vector<8x512xf32>
    %cst_27 = arith.constant 8.000000e-01 : f32
    %60 = vector.broadcast %cst_27 : f32 to vector<1x512xf32>
    %61 = arith.addf %57, %60 : vector<1x512xf32>
    %62 = math.rsqrt %61 : vector<1x512xf32>
    %63 = vector.broadcast %62 : vector<1x512xf32> to vector<8x512xf32>
    %64 = arith.mulf %59, %63 : vector<8x512xf32>
    %c0_28 = arith.constant 0 : index
    %c0_29 = arith.constant 0 : index
    %65 = vector.load %arg7[%c0_28, %c0_29] : memref<2x512xf32, #tpu.memory_space<vmem>>, vector<1x512xf32>
    %66 = vector.broadcast %65 : vector<1x512xf32> to vector<8x512xf32>
    %67 = arith.mulf %64, %66 : vector<8x512xf32>
    %c1_30 = arith.constant 1 : index
    %c0_31 = arith.constant 0 : index
    %68 = vector.load %arg7[%c1_30, %c0_31] : memref<2x512xf32, #tpu.memory_space<vmem>>, vector<1x512xf32>
    %69 = vector.broadcast %68 : vector<1x512xf32> to vector<8x512xf32>
    %70 = arith.addf %67, %69 : vector<8x512xf32>
    %cst_32 = arith.constant 0.000000e+00 : f32
    %71 = vector.broadcast %cst_32 : f32 to vector<8x512xf32>
    %72 = arith.cmpf ogt, %70, %71 : vector<8x512xf32>
    %cst_33 = arith.constant 2.000000e-01 : f32
    %73 = vector.broadcast %cst_33 : f32 to vector<8x512xf32>
    %74 = arith.mulf %73, %70 : vector<8x512xf32>
    %75 = arith.select %72, %70, %74 : vector<8x512xi1>, vector<8x512xf32>
    %76 = arith.truncf %75 : vector<8x512xf32> to vector<8x512xbf16>
    %c0_34 = arith.constant 0 : index
    %c0_35 = arith.constant 0 : index
    %77 = vector.load %arg8[%c0_34, %c0_35] : memref<512x1024xbf16, #tpu.memory_space<vmem>>, vector<512x1024xbf16>
    %cst_36 = arith.constant dense<0.000000e+00> : vector<8x1024xf32>
    %78 = tpu.matmul %76, %77, %cst_36 {dimension_numbers = #tpu.dot_dimension_numbers<[1], [0], [0], [1], [0, 0, 1, 1], [], []>} : vector<8x512xbf16>, vector<512x1024xbf16>, vector<8x1024xf32> -> vector<8x1024xf32>
    %cst_37 = arith.constant dense<0.000000e+00> : vector<1024xf32>
    %79 = vector.multi_reduction <add>, %78, %cst_37 [0] : vector<8x1024xf32> to vector<1024xf32>
    %80 = vector.shape_cast %79 : vector<1024xf32> to vector<1x1024xf32>
    %cst_38 = arith.constant 8.000000e+00 : f32
    %81 = vector.broadcast %cst_38 : f32 to vector<1x1024xf32>
    %82 = arith.divf %80, %81 : vector<1x1024xf32>
    %83 = arith.mulf %78, %78 : vector<8x1024xf32>
    %cst_39 = arith.constant dense<0.000000e+00> : vector<1024xf32>
    %84 = vector.multi_reduction <add>, %83, %cst_39 [0] : vector<8x1024xf32> to vector<1024xf32>
    %85 = vector.shape_cast %84 : vector<1024xf32> to vector<1x1024xf32>
    %cst_40 = arith.constant 8.000000e+00 : f32
    %86 = vector.broadcast %cst_40 : f32 to vector<1x1024xf32>
    %87 = arith.divf %85, %86 : vector<1x1024xf32>
    %88 = arith.mulf %82, %82 : vector<1x1024xf32>
    %89 = arith.subf %87, %88 : vector<1x1024xf32>
    %90 = vector.broadcast %82 : vector<1x1024xf32> to vector<8x1024xf32>
    %91 = arith.subf %78, %90 : vector<8x1024xf32>
    %cst_41 = arith.constant 8.000000e-01 : f32
    %92 = vector.broadcast %cst_41 : f32 to vector<1x1024xf32>
    %93 = arith.addf %89, %92 : vector<1x1024xf32>
    %94 = math.rsqrt %93 : vector<1x1024xf32>
    %95 = vector.broadcast %94 : vector<1x1024xf32> to vector<8x1024xf32>
    %96 = arith.mulf %91, %95 : vector<8x1024xf32>
    %c0_42 = arith.constant 0 : index
    %c0_43 = arith.constant 0 : index
    %97 = vector.load %arg9[%c0_42, %c0_43] : memref<2x1024xf32, #tpu.memory_space<vmem>>, vector<1x1024xf32>
    %98 = vector.broadcast %97 : vector<1x1024xf32> to vector<8x1024xf32>
    %99 = arith.mulf %96, %98 : vector<8x1024xf32>
    %c1_44 = arith.constant 1 : index
    %c0_45 = arith.constant 0 : index
    %100 = vector.load %arg9[%c1_44, %c0_45] : memref<2x1024xf32, #tpu.memory_space<vmem>>, vector<1x1024xf32>
    %101 = vector.broadcast %100 : vector<1x1024xf32> to vector<8x1024xf32>
    %102 = arith.addf %99, %101 : vector<8x1024xf32>
    %cst_46 = arith.constant 0.000000e+00 : f32
    %103 = vector.broadcast %cst_46 : f32 to vector<8x1024xf32>
    %104 = arith.cmpf ogt, %102, %103 : vector<8x1024xf32>
    %cst_47 = arith.constant 2.000000e-01 : f32
    %105 = vector.broadcast %cst_47 : f32 to vector<8x1024xf32>
    %106 = arith.mulf %105, %102 : vector<8x1024xf32>
    %107 = arith.select %104, %102, %106 : vector<8x1024xi1>, vector<8x1024xf32>
    %108 = arith.truncf %107 : vector<8x1024xf32> to vector<8x1024xbf16>
    %c0_48 = arith.constant 0 : index
    %c0_49 = arith.constant 0 : index
    %109 = vector.load %arg10[%c0_48, %c0_49] : memref<1024x256xbf16, #tpu.memory_space<vmem>>, vector<1024x256xbf16>
    %cst_50 = arith.constant dense<0.000000e+00> : vector<8x256xf32>
    %110 = tpu.matmul %108, %109, %cst_50 {dimension_numbers = #tpu.dot_dimension_numbers<[1], [0], [0], [1], [0, 0, 1, 1], [], []>} : vector<8x1024xbf16>, vector<1024x256xbf16>, vector<8x256xf32> -> vector<8x256xf32>
    %c0_51 = arith.constant 0 : index
    %c0_52 = arith.constant 0 : index
    %111 = vector.load %arg11[%c0_51, %c0_52] : memref<1x256xf32, #tpu.memory_space<vmem>>, vector<1x256xf32>
    %112 = vector.broadcast %111 : vector<1x256xf32> to vector<8x256xf32>
    %113 = arith.addf %110, %112 : vector<8x256xf32>
    %114 = math.tanh %113 : vector<8x256xf32>
    %c0_53 = arith.constant 0 : index
    %c0_54 = arith.constant 0 : index
    %115 = vector.load %arg12[%c0_53, %c0_54] : memref<8x256xf32, #tpu.memory_space<vmem>>, vector<8x256xf32>
    tpu.vector_store %arg12[%c0_53, %c0_54], %114 {strides = array<i32>} : memref<8x256xf32, #tpu.memory_space<vmem>>, vector<8x256xf32>,
    return
  }
  func.func @transform_0(%arg0: i32) -> (i32, i32) {
    %c0_i32 = arith.constant 0 : i32
    %c0_i32_0 = arith.constant 0 : i32
    %c0_i32_1 = arith.constant 0 : i32
    return %c0_i32, %c0_i32_0 : i32, i32
  }
  func.func @transform_1(%arg0: i32) -> (i32, i32) {
    %c0_i32 = arith.constant 0 : i32
    %c0_i32_0 = arith.constant 0 : i32
    %c0_i32_1 = arith.constant 0 : i32
    return %c0_i32, %c0_i32_0 : i32, i32
  }
  func.func @transform_2(%arg0: i32) -> (i32, i32) {
    %c0_i32 = arith.constant 0 : i32
    %c0_i32_0 = arith.constant 0 : i32
    %c0_i32_1 = arith.constant 0 : i32
    return %c0_i32, %c0_i32_0 : i32, i32
  }
  func.func @transform_3(%arg0: i32) -> (i32, i32) {
    %c0_i32 = arith.constant 0 : i32
    %c0_i32_0 = arith.constant 0 : i32
    %c0_i32_1 = arith.constant 0 : i32
    return %c0_i32, %c0_i32_0 : i32, i32
  }
  func.func @transform_4(%arg0: i32) -> (i32, i32) {
    %c0_i32 = arith.constant 0 : i32
    %c0_i32_0 = arith.constant 0 : i32
    %c0_i32_1 = arith.constant 0 : i32
    return %c0_i32, %c0_i32_0 : i32, i32
  }
  func.func @transform_5(%arg0: i32) -> (i32, i32) {
    %c0_i32 = arith.constant 0 : i32
    %c0_i32_0 = arith.constant 0 : i32
    %c0_i32_1 = arith.constant 0 : i32
    return %c0_i32, %c0_i32_0 : i32, i32
  }
  func.func @transform_6(%arg0: i32) -> (i32, i32) {
    %c0_i32 = arith.constant 0 : i32
    %c0_i32_0 = arith.constant 0 : i32
    %c0_i32_1 = arith.constant 0 : i32
    return %c0_i32, %c0_i32_0 : i32, i32
  }
  func.func @transform_7(%arg0: i32) -> (i32, i32) {
    %c0_i32 = arith.constant 0 : i32
    %c0_i32_0 = arith.constant 0 : i32
    %c0_i32_1 = arith.constant 0 : i32
    return %c0_i32, %c0_i32_0 : i32, i32
  }
  func.func @transform_8(%arg0: i32) -> (i32, i32) {
    %c0_i32 = arith.constant 0 : i32
    %c0_i32_0 = arith.constant 0 : i32
    %c0_i32_1 = arith.constant 0 : i32
    return %c0_i32, %c0_i32_0 : i32, i32
  }
  func.func @transform_9(%arg0: i32) -> (i32, i32) {
    %c0_i32 = arith.constant 0 : i32
    %c0_i32_0 = arith.constant 0 : i32
    %c0_i32_1 = arith.constant 0 : i32
    return %c0_i32, %c0_i32_0 : i32, i32
  }
  func.func @transform_10(%arg0: i32) -> (i32, i32) {
    %c0_i32 = arith.constant 0 : i32
    %c0_i32_0 = arith.constant 0 : i32
    %c0_i32_1 = arith.constant 0 : i32
    return %c0_i32, %c0_i32_0 : i32, i32
  }
  func.func @transform_11(%arg0: i32) -> (i32, i32) {
    %c0_i32 = arith.constant 0 : i32
    %c0_i32_0 = arith.constant 0 : i32
    %c0_i32_1 = arith.constant 0 : i32
    return %c0_i32, %c0_i32_0 : i32, i32
  }
}

</mosaic_0001>

<bundles_post_ra>
// kernel: tpu_custom_call.1
= control target key start
LH: loop header
LB: loop body
LE: loop exit
PB: predicated region body
PF: predicated region fallthrough
CT: control target
= control target key end

     0   :  { %16 = vsyncpa [#allocation3], 0  ;;  %s7639_s0 = inlined_call_operand.hbm [shape: f32[8,64], index: 0, kind: input, shape index: {}]   ;;  %s7640_s1 = inlined_call_operand.hbm [shape: bf16[64,128], index: 1, kind: input, shape index: {}]   ;;  %s7641_s2 = inlined_call_operand.vmem [shape: f32[1,128], index: 2, kind: input, shape index: {}]   ;;  %s7642_s3 = inlined_call_operand.hbm [shape: bf16[128,256], index: 3, kind: input, shape index: {}]   ;;  %s7643_s4 = inlined_call_operand.hbm [shape: f32[2,256], index: 4, kind: input, shape index: {}]   ;;  %s7644_s5 = inlined_call_operand.hbm [shape: bf16[256,512], index: 5, kind: input, shape index: {}]   ;;  %s7645_s6 = inlined_call_operand.hbm [shape: f32[2,512], index: 6, kind: input, shape index: {}]   ;;  %s7646_s7 = inlined_call_operand.hbm [shape: bf16[512,1024], index: 7, kind: input, shape index: {}]   ;;  %s7647_s8 = inlined_call_operand.hbm [shape: f32[2,1024], index: 8, kind: input, shape index: {}]   ;;  %s7648_s9 = inlined_call_operand.hbm [shape: bf16[1024,256], index: 9, kind: input, shape index: {}]   ;;  %s7649_s10 = inlined_call_operand.vmem [shape: f32[1,256], index: 10, kind: input, shape index: {}]   ;;  %s7650_s11 = inlined_call_operand.hbm [shape: f32[8,256], index: 11, kind: output, shape index: {}]  }
   0x1   :  { %17 = vsyncpa [#allocation6], 0 }
   0x2   :  { %18 = vsyncpa [#allocation9], 0 }
   0x3   :  { %19 = vsyncpa [#allocation12], 0 }
   0x4   :  { %20 = vsyncpa [#allocation15], 0  ;;  %s37_s19 = sshll.u32 %s7640_s1, 4  ;;  %s38_s19 = int_to_ptr.hbm [resolvable:$true] %s37_s19 }
   0x5   :  { %21 = vsyncpa [#allocation4], 0  ;;  %s7031_s20 = smov [#allocation5]   ;;  %s66_s24 = sshll.u32 %s7643_s4, 4  ;;  %s67_s24 = int_to_ptr.hbm [resolvable:$true] %s66_s24 }
   0x6   :  { %s39_s21 = sshll.u32 %s7031_s20, 4  ;;  %s7032_s25 = smov 64   ;;  %s40_s21 = int_to_ptr.vmem [resolvable:$true] %s39_s21 }
   0x7   :  { %s7033_s26 = smov 4   ;;  %s7034_s27 = smov [#allocation8]  }
   0x8   :  { %45 = dma.hbm_to_vmem [thread:$0]  %s38_s19, 512, %s40_s21, [#allocation6], %s7032_s25, %s7032_s25, %s7033_s26  }
   0x9   :  { %s68_s28 = sshll.u32 %s7034_s27, 4  ;;  %s90_s12 = sshll.u32 %s7645_s6, 4  ;;  %s69_s28 = int_to_ptr.vmem [resolvable:$true] %s68_s28  ;;  %s91_s12 = int_to_ptr.hbm [resolvable:$true] %s90_s12 }
   0xa   :  { %71 = dma.hbm_to_vmem [thread:$0]  %s67_s24, 64, %s69_s28, [#allocation9]  }
   0xb   :  { %s114_s14 = sshll.u32 %s7647_s8, 4  ;;  %s7035_s15 = smov [#allocation11]   ;;  %s115_s14 = int_to_ptr.hbm [resolvable:$true] %s114_s14 }
   0xc   :  { %s92_s16 = sshll.u32 %s7035_s15, 4  ;;  %s7036_s4 = smov [#allocation14]   ;;  %s93_s16 = int_to_ptr.vmem [resolvable:$true] %s92_s16 }
   0xd   :  { %95 = dma.hbm_to_vmem [thread:$0]  %s91_s12, 128, %s93_s16, [#allocation12]  }
   0xe   :  { %s116_s17 = sshll.u32 %s7036_s4, 4  ;;  %s27_s20 = sshll.u32 %s7639_s0, 4  ;;  %s117_s17 = int_to_ptr.vmem [resolvable:$true] %s116_s17  ;;  %s28_s20 = int_to_ptr.hbm [resolvable:$true] %s27_s20 }
   0xf   :  { %119 = dma.hbm_to_vmem [thread:$0]  %s115_s14, 256, %s117_s17, [#allocation15]  }
  0x10   :  { %s52_s22 = sshll.u32 %s7642_s3, 4  ;;  %s7037_s23 = smov [#allocation2]   ;;  %s53_s22 = int_to_ptr.hbm [resolvable:$true] %s52_s22 }
  0x11   :  { %s29_s8 = sshll.u32 %s7037_s23, 4  ;;  %s7038_s24 = smov [#allocation7]   ;;  %s30_s8 = int_to_ptr.vmem [resolvable:$true] %s29_s8 }
  0x12   :  { %32 = dma.hbm_to_vmem [thread:$0]  %s28_s20, 128, %s30_s8, [#allocation3]  }
  0x13   :  { %s54_s25 = sshll.u32 %s7038_s24, 4  ;;  %s7039_s26 = smov 128   ;;  %s55_s25 = int_to_ptr.vmem [resolvable:$true] %s54_s25 }
  0x14   :  { %s7040_s27 = smov 8   ;;  %s76_s29 = sshll.u32 %s7644_s5, 4  ;;  %s77_s29 = int_to_ptr.hbm [resolvable:$true] %s76_s29 }
  0x15   :  { %60 = dma.hbm_to_vmem [thread:$0]  %s53_s22, 2048, %s55_s25, [#allocation6], %s7039_s26, %s7039_s26, %s7040_s27  }
  0x16   :  { %s7041_s30 = smov [#allocation10]   ;;  %s100_s13 = sshll.u32 %s7646_s7, 4  ;;  %s101_s13 = int_to_ptr.hbm [resolvable:$true] %s100_s13 }
  0x17   :  { %s78_s12 = sshll.u32 %s7041_s30, 4  ;;  %s7042_s14 = smov 256   ;;  %s79_s12 = int_to_ptr.vmem [resolvable:$true] %s78_s12 }
  0x18   :  { %s7043_s15 = smov 16   ;;  %s7044_s16 = smov [#allocation13]  }
  0x19   :  { %84 = dma.hbm_to_vmem [thread:$0]  %s77_s29, 8192, %s79_s12, [#allocation9], %s7042_s14, %s7042_s14, %s7043_s15  }
  0x1a   :  { %s102_s4 = sshll.u32 %s7044_s16, 4  ;;  %s7045_s17 = smov 512   ;;  %s103_s4 = int_to_ptr.vmem [resolvable:$true] %s102_s4 }
  0x1b   :  { %s7046_s18 = smov 32   ;;  %s124_s20 = sshll.u32 %s7648_s9, 4  ;;  %s125_s20 = int_to_ptr.hbm [resolvable:$true] %s124_s20 }
  0x1c   :  { %108 = dma.hbm_to_vmem [thread:$0]  %s101_s13, 32768, %s103_s4, [#allocation12], %s7045_s17, %s7045_s17, %s7046_s18  }
  0x1d   :  { %s7047_s6 = smov [#allocation16]  }
  0x1e   :  { %s126_s21 = sshll.u32 %s7047_s6, 4  ;;  %s127_s21 = int_to_ptr.vmem [resolvable:$true] %s126_s21 }
  0x1f   :  { %132 = dma.hbm_to_vmem [thread:$0]  %s125_s20, 16384, %s127_s21, [#allocation15], %s7039_s26, %s7039_s26, %s7040_s27  }
  0x20   :  { %7019 = dma.done.wait [#allocation3], 128  }
  0x21   :  { %7020 = vsyncadd [#allocation3], 4294967168 }
  0x22   :  { %7021 = dma.done.wait [#allocation6], 2560  }
  0x23   :  { %7022 = vsyncadd [#allocation6], 4294964736 }
  0x24   :  { %7023 = dma.done.wait [#allocation9], 8256  }
  0x25   :  { %7024 = vsyncadd [#allocation9], 4294959040 }
  0x26   :  { %7025 = dma.done.wait [#allocation12], 32896  }
  0x27   :  { %7026 = vsyncadd [#allocation12], 4294934400 }
  0x28   :  { %7027 = dma.done.wait [#allocation15], 16640  }
  0x29   :  { %7028 = vsyncadd [#allocation15], 4294950656  ;;  %v6258_v0 = vld [vmem:[#allocation5 + $0x18] sm:$0xff]  ;;  %v6257_v1 = vld [vmem:[#allocation5 + $0x10] sm:$0xff]  ;;  %vm210_vm0 = vcmask 523264   ;;  %s4368_s25 = sshll.u32 %s7650_s11, 4  ;;  %s4369_s25 = int_to_ptr.hbm [resolvable:$true] %s4368_s25 }
  0x2a   :  { %v4457_v2 = vld [vmem:[#allocation7 + $0x70] sm:$0xf]  ;;  %218 = vmatpush.bf16.msra.mxu0 %v6258_v0  ;;  %v6274_v3 = vld [vmem:[#allocation7 + $0x74] sm:$0xf0]  ;;  %v6273_v4 = vld [vmem:[#allocation7 + $0x74] sm:$0xf] }
  0x2b   :  { %v4459_v5 = vld [vmem:[#allocation7 + $0x78] sm:$0xf0]  ;;  %v4458_v6 = vor.u32 %v6274_v3, %v4457_v2  ;;  %v4449_v8 = vld [vmem:[#allocation7 + $0x60] sm:$0xf]  ;;  %v6272_v9 = vld [vmem:[#allocation7 + $0x64] sm:$0xf0] }
  0x2c   :  { %v4462_v7 = vor.u32 %v6273_v4, %v4459_v5  ;;  %v6271_v10 = vld [vmem:[#allocation7 + $0x64] sm:$0xf]  ;;  %v4451_v11 = vld [vmem:[#allocation7 + $0x68] sm:$0xf0]  ;;  %v4450_v13 = vor.u32 %v6272_v9, %v4449_v8  ;;  %v4441_v15 = vld [vmem:[#allocation7 + $0x50] sm:$0xf] }
  0x2d   :  { %v6256_v12 = vld [vmem:[#allocation5 + $0x8] sm:$0xff]  ;;  %327 = vmatpush.bf16.msra.mxu1 %v4458_v6  ;;  %v4454_v14 = vor.u32 %v6271_v10, %v4451_v11  ;;  %v6270_v16 = vld [vmem:[#allocation7 + $0x54] sm:$0xf0]  ;;  %v6269_v17 = vld [vmem:[#allocation7 + $0x54] sm:$0xf] }
  0x2e   :  { %340 = vmatpush.bf16.msra.mxu2 %v4462_v7  ;;  %219 = vmatpush.bf16.msra.mxu0 %v6257_v1  ;;  %v4443_v18 = vld [vmem:[#allocation7 + $0x58] sm:$0xf0]  ;;  %v6255_v19 = vld [vmem:[#allocation5] sm:$0xff]  ;;  %v4442_v20 = vor.u32 %v6270_v16, %v4441_v15  ;;  %v6268_v24 = vld [vmem:[#allocation7 + $0x44] sm:$0xf0] }
  0x2f   :  { %v4446_v21 = vor.u32 %v6269_v17, %v4443_v18  ;;  %v172_v22 = vld [vmem:[#allocation2] sm:$0xff]  ;;  %v4433_v23 = vld [vmem:[#allocation7 + $0x40] sm:$0xf]  ;;  %v6267_v25 = vld [vmem:[#allocation7 + $0x44] sm:$0xf] }
  0x30   :  { %v4435_v26 = vld [vmem:[#allocation7 + $0x48] sm:$0xf0]  ;;  %v173_v27 = vpack.c.bf16 %v172_v22, %v172_v22  ;;  %v4434_v28 = vor.u32 %v6268_v24, %v4433_v23  ;;  %v4425_v30 = vld [vmem:[#allocation7 + $0x30] sm:$0xf]  ;;  %v6266_v31 = vld [vmem:[#allocation7 + $0x34] sm:$0xf0] }
  0x31   :  { %328 = vmatpush.bf16.msra.mxu1 %v4450_v13  ;;  %v4438_v29 = vor.u32 %v6267_v25, %v4435_v26  ;;  %v6265_v32 = vld [vmem:[#allocation7 + $0x34] sm:$0xf]  ;;  %v4427_v33 = vld [vmem:[#allocation7 + $0x38] sm:$0xf0]  ;;  %v4426_v34 = vor.u32 %v6266_v31, %v4425_v30  ;;  %v4417_v36 = vld [vmem:[#allocation7 + $0x20] sm:$0xf] }
  0x32   :  { %341 = vmatpush.bf16.msra.mxu2 %v4454_v14  ;;  %220 = vmatpush.bf16.msra.mxu0 %v6256_v12  ;;  %v4430_v35 = vor.u32 %v6265_v32, %v4427_v33  ;;  %v6264_v37 = vld [vmem:[#allocation7 + $0x24] sm:$0xf0]  ;;  %v6263_v38 = vld [vmem:[#allocation7 + $0x24] sm:$0xf]  ;;  %v4419_v39 = vld [vmem:[#allocation7 + $0x28] sm:$0xf0] }
  0x33   :  { %v4418_v40 = vor.u32 %v6264_v37, %v4417_v36  ;;  %v4422_v41 = vor.u32 %v6263_v38, %v4419_v39  ;;  %v4409_v42 = vld [vmem:[#allocation7 + $0x10] sm:$0xf]  ;;  %v6262_v43 = vld [vmem:[#allocation7 + $0x14] sm:$0xf0]  ;;  %v6261_v44 = vld [vmem:[#allocation7 + $0x14] sm:$0xf] }
  0x34   :  { %v4410_v45 = vor.u32 %v6262_v43, %v4409_v42  ;;  %v4411_v46 = vld [vmem:[#allocation7 + $0x18] sm:$0xf0]  ;;  %v4401_v48 = vld [vmem:[#allocation7] sm:$0xf]  ;;  %v6260_v49 = vld [vmem:[#allocation7 + $0x4] sm:$0xf0] }
  0x35   :  { %329 = vmatpush.bf16.msra.mxu1 %v4442_v20  ;;  %v4414_v47 = vor.u32 %v6261_v44, %v4411_v46  ;;  %v6259_v50 = vld [vmem:[#allocation7 + $0x4] sm:$0xf]  ;;  %v4402_v51 = vor.u32 %v6260_v49, %v4401_v48  ;;  %v4403_v52 = vld [vmem:[#allocation7 + $0x8] sm:$0xf0]  ;;  %v6742_v54 = vld [vmem:[%s7641_s2] ss:$0 sm:$0xff] }
  0x36   :  { %342 = vmatpush.bf16.msra.mxu2 %v4446_v21  ;;  %221 = vmatpush.bf16.msra.mxu0 %v6255_v19  ;;  %v4406_v53 = vor.u32 %v6259_v50, %v4403_v52  ;;  %v4577_v61 = vld [vmem:[#allocation10 + $0xe0] sm:$0xf]  ;;  %v6305_v62 = vld [vmem:[#allocation10 + $0xec] sm:$0xf0]  ;;  %v6303_v0 = vld [vmem:[#allocation10 + $0xe4] sm:$0xf] }
  0x37   :  { %v4578_v63 = vor.u32 %v6305_v62, %v4577_v61  ;;  %v4579_v1 = vld [vmem:[#allocation10 + $0xf0] sm:$0xf0]  ;;  %v4561_v3 = vld [vmem:[#allocation10 + $0xc0] sm:$0xf]  ;;  %v6301_v4 = vld [vmem:[#allocation10 + $0xcc] sm:$0xf0] }
  0x38   :  { %v4582_v2 = vor.u32 %v6303_v0, %v4579_v1  ;;  %v6299_v5 = vld [vmem:[#allocation10 + $0xc4] sm:$0xf]  ;;  %v4562_v6 = vor.u32 %v6301_v4, %v4561_v3  ;;  %v4563_v7 = vld [vmem:[#allocation10 + $0xd0] sm:$0xf0]  ;;  %v4705_v9 = vld [vmem:[#allocation10 + $0x1e0] sm:$0xf] }
  0x39   :  { %4398 = vmatmul.msk.bf16.vlgmr.msra.gmra.mxu0 %vm210_vm0, %v173_v27  ;;  %330 = vmatpush.bf16.msra.mxu1 %v4434_v28  ;;  %v4566_v8 = vor.u32 %v6299_v5, %v4563_v7  ;;  %v6337_v10 = vld [vmem:[#allocation10 + $0x1ec] sm:$0xf0]  ;;  %v6335_v11 = vld [vmem:[#allocation10 + $0x1e4] sm:$0xf]  ;;  %v4707_v13 = vld [vmem:[#allocation10 + $0x1f0] sm:$0xf0] }
  0x3a   :  { %343 = vmatpush.bf16.msra.mxu2 %v4438_v29  ;;  %829 = vmatpush.bf16.msra.mxu3 %v4578_v63  ;;  %v4706_v12 = vor.u32 %v6337_v10, %v4705_v9  ;;  %v4710_v14 = vor.u32 %v6335_v11, %v4707_v13  ;;  %v4545_v15 = vld [vmem:[#allocation10 + $0xa0] sm:$0xf]  ;;  %v6297_v16 = vld [vmem:[#allocation10 + $0xac] sm:$0xf0]  ;;  %v6295_v17 = vld [vmem:[#allocation10 + $0xa4] sm:$0xf] }
  0x3b   :  { %v4546_v18 = vor.u32 %v6297_v16, %v4545_v15  ;;  %v4547_v19 = vld [vmem:[#allocation10 + $0xb0] sm:$0xf0]  ;;  %v4689_v21 = vld [vmem:[#allocation10 + $0x1c0] sm:$0xf]  ;;  %v6333_v22 = vld [vmem:[#allocation10 + $0x1cc] sm:$0xf0] }
  0x3c   :  { %842 = vmatpush.bf16.msrb.mxu0 %v4706_v12  ;;  %v4550_v20 = vor.u32 %v6295_v17, %v4547_v19  ;;  %v6331_v23 = vld [vmem:[#allocation10 + $0x1c4] sm:$0xf]  ;;  %v4690_v24 = vor.u32 %v6333_v22, %v4689_v21  ;;  %v4691_v25 = vld [vmem:[#allocation10 + $0x1d0] sm:$0xf0]  ;;  %v7048_v26 = vmov 8.0  }
  0x3d   :  { %331 = vmatpush.bf16.msra.mxu1 %v4426_v34  ;;  %6743 = vrcp.f32 %v7048_v26  ;;  %v4694_v27 = vor.u32 %v6331_v23, %v4691_v25  ;;  %v4529_v28 = vld [vmem:[#allocation10 + $0x80] sm:$0xf]  ;;  %v6293_v29 = vld [vmem:[#allocation10 + $0x8c] sm:$0xf0]  ;;  %v6291_v30 = vld [vmem:[#allocation10 + $0x84] sm:$0xf] }
  0x3e   :  { %344 = vmatpush.bf16.msra.mxu2 %v4430_v35  ;;  %830 = vmatpush.bf16.msra.mxu3 %v4562_v6  ;;  %v4530_v31 = vor.u32 %v6293_v29, %v4529_v28  ;;  %v4531_v32 = vld [vmem:[#allocation10 + $0x90] sm:$0xf0]  ;;  %v4673_v34 = vld [vmem:[#allocation10 + $0x1a0] sm:$0xf]  ;;  %v6329_v35 = vld [vmem:[#allocation10 + $0x1ac] sm:$0xf0] }
  0x3f   :  { %v4534_v33 = vor.u32 %v6291_v30, %v4531_v32  ;;  %v6327_v36 = vld [vmem:[#allocation10 + $0x1a4] sm:$0xf]  ;;  %v4674_v37 = vor.u32 %v6329_v35, %v4673_v34  ;;  %v4675_v38 = vld [vmem:[#allocation10 + $0x1b0] sm:$0xf0]  ;;  %v6325_v48 = vld [vmem:[#allocation10 + $0x18c] sm:$0xf0] }
  0x40   :  { %843 = vmatpush.bf16.msrb.mxu0 %v4690_v24  ;;  %v4678_v39 = vor.u32 %v6327_v36, %v4675_v38  ;;  %v6287_v42 = vld [vmem:[#allocation10 + $0x64] sm:$0xf]  ;;  %v4515_v44 = vld [vmem:[#allocation10 + $0x70] sm:$0xf0]  ;;  %v6321_v61 = vld [vmem:[#allocation10 + $0x16c] sm:$0xf0] }
  0x41   :  { %332 = vmatpush.bf16.msra.mxu1 %v4418_v40  ;;  %v4513_v40 = vld [vmem:[#allocation10 + $0x60] sm:$0xf]  ;;  %v4518_v46 = vor.u32 %v6287_v42, %v4515_v44  ;;  %v6323_v49 = vld [vmem:[#allocation10 + $0x184] sm:$0xf]  ;;  %v4643_v0 = vld [vmem:[#allocation10 + $0x170] sm:$0xf0] }
  0x42   :  { %345 = vmatpush.bf16.msra.mxu2 %v4422_v41  ;;  %831 = vmatpush.bf16.msra.mxu3 %v4546_v18  ;;  %v6289_v41 = vld [vmem:[#allocation10 + $0x6c] sm:$0xf0]  ;;  %v6319_v62 = vld [vmem:[#allocation10 + $0x164] sm:$0xf]  ;;  %v4483_v7 = vld [vmem:[#allocation10 + $0x30] sm:$0xf0] }
  0x43   :  { %v4514_v43 = vor.u32 %v6289_v41, %v4513_v40  ;;  %v4646_v1 = vor.u32 %v6319_v62, %v4643_v0  ;;  %v6281_v3 = vld [vmem:[#allocation10 + $0x2c] sm:$0xf0]  ;;  %v6279_v4 = vld [vmem:[#allocation10 + $0x24] sm:$0xf]  ;;  %v4625_v9 = vld [vmem:[#allocation10 + $0x140] sm:$0xf] }
  0x44   :  { %844 = vmatpush.bf16.msrb.mxu0 %v4674_v37  ;;  %v6317_v10 = vld [vmem:[#allocation10 + $0x14c] sm:$0xf0]  ;;  %v6315_v11 = vld [vmem:[#allocation10 + $0x144] sm:$0xf]  ;;  %v4627_v13 = vld [vmem:[#allocation10 + $0x150] sm:$0xf0] }
  0x45   :  { %333 = vmatpush.bf16.msra.mxu1 %v4410_v45  ;;  %v7140_v45 = vpop.eup %6743  ;;  %v4626_v12 = vor.u32 %v6317_v10, %v4625_v9  ;;  %v4630_v15 = vor.u32 %v6315_v11, %v4627_v13  ;;  %v4465_v16 = vld [vmem:[#allocation10] sm:$0xf]  ;;  %v6277_v17 = vld [vmem:[#allocation10 + $0xc] sm:$0xf0]  ;;  %v6275_v18 = vld [vmem:[#allocation10 + $0x4] sm:$0xf] }
  0x46   :  { %346 = vmatpush.bf16.msra.mxu2 %v4414_v47  ;;  %832 = vmatpush.bf16.msra.mxu3 %v4530_v31  ;;  %v4657_v47 = vld [vmem:[#allocation10 + $0x180] sm:$0xf]  ;;  %v4466_v21 = vor.u32 %v6277_v17, %v4465_v16  ;;  %v4467_v22 = vld [vmem:[#allocation10 + $0x10] sm:$0xf0]  ;;  %v4585_v23 = vld [vmem:[#allocation10 + $0xe8] sm:$0xf]  ;;  %vm370_vm2 = vweird.f32 %v7140_v45 }
  0x47   :  { %v4658_v50 = vor.u32 %v6325_v48, %v4657_v47  ;;  %v4470_v25 = vor.u32 %v6275_v18, %v4467_v22  ;;  %v6306_v26 = vld [vmem:[#allocation10 + $0xf4] sm:$0xf0]  ;;  %v4587_v28 = vld [vmem:[#allocation10 + $0xf8] sm:$0xf0]  ;;  %v6313_v34 = vld [vmem:[#allocation10 + $0x12c] sm:$0xf0] }
  0x48   :  { %v4586_v31 = vor.u32 %v6306_v26, %v4585_v23  ;;  %v6311_v36 = vld [vmem:[#allocation10 + $0x124] sm:$0xf]  ;;  %v4611_v37 = vld [vmem:[#allocation10 + $0x130] sm:$0xf0]  ;;  %v4569_v41 = vld [vmem:[#allocation10 + $0xc8] sm:$0xf] }
  0x49   :  { %334 = vmatpush.bf16.msra.mxu1 %v4402_v51  ;;  %v4659_v51 = vld [vmem:[#allocation10 + $0x190] sm:$0xf0]  ;;  %845 = vmatpush.bf16.msrb.mxu0 %v4658_v50  ;;  %v4614_v40 = vor.u32 %v6311_v36, %v4611_v37  ;;  %v6302_v42 = vld [vmem:[#allocation10 + $0xd4] sm:$0xf0]  ;;  %v6300_v47 = vld [vmem:[#allocation10 + $0xcc] sm:$0xf] }
  0x4a   :  { %347 = vmatpush.bf16.msra.mxu2 %v4406_v53  ;;  %833 = vmatpush.bf16.msra.mxu3 %v4514_v43  ;;  %v4662_v52 = vor.u32 %v6323_v49, %v4659_v51  ;;  %v4497_v53 = vld [vmem:[#allocation10 + $0x40] sm:$0xf]  ;;  %v4571_v51 = vld [vmem:[#allocation10 + $0xd8] sm:$0xf0]  ;;  %v4595_v0 = vld [vmem:[#allocation10 + $0x110] sm:$0xf0] }
  0x4b   :  { %v4715_v10 = vld [vmem:[#allocation10 + $0x1f8] sm:$0xf0]  ;;  %v4553_v11 = vld [vmem:[#allocation10 + $0xa8] sm:$0xf]  ;;  %v6296_v17 = vld [vmem:[#allocation10 + $0xac] sm:$0xf] }
  0x4c   :  { %v4555_v18 = vld [vmem:[#allocation10 + $0xb8] sm:$0xf0] }
  0x4d   :  { %855 = vmatpush.bf16.msrb.mxu1 %v4582_v2  ;;  %v4481_v2 = vld [vmem:[#allocation10 + $0x20] sm:$0xf]  ;;  %v4558_v23 = vor.u32 %v6296_v17, %v4555_v18  ;;  %v6282_v17 = vld [vmem:[#allocation10 + $0x34] sm:$0xf0]  ;;  %v6280_v18 = vld [vmem:[#allocation10 + $0x2c] sm:$0xf] }
  0x4e   :  { %868 = vmatpush.bf16.msrb.mxu2 %v4710_v14  ;;  %v4482_v6 = vor.u32 %v6281_v3, %v4481_v2 }
  0x51   :  { %856 = vmatpush.bf16.msrb.mxu1 %v4566_v8  ;;  %v4486_v8 = vor.u32 %v6279_v4, %v4483_v7  ;;  %v6336_v7 = vld [vmem:[#allocation10 + $0x1ec] sm:$0xf] }
  0x52   :  { %869 = vmatpush.bf16.msrb.mxu2 %v4694_v27  ;;  %v6304_v27 = vld [vmem:[#allocation10 + $0xec] sm:$0xf]  ;;  %v4718_v16 = vor.u32 %v6336_v7, %v4715_v10  ;;  %v4507_v7 = vld [vmem:[#allocation10 + $0x58] sm:$0xf0] }
  0x53   :  { %v4590_v32 = vor.u32 %v6304_v27, %v4587_v28 }
  0x55   :  { %857 = vmatpush.bf16.msrb.mxu1 %v4550_v20 }
  0x56   :  { %870 = vmatpush.bf16.msrb.mxu2 %v4678_v39 }
  0x59   :  { %858 = vmatpush.bf16.msrb.mxu1 %v4534_v33  ;;  %v4609_v33 = vld [vmem:[#allocation10 + $0x120] sm:$0xf] }
  0x5a   :  { %871 = vmatpush.bf16.msrb.mxu2 %v4662_v52  ;;  %v4610_v35 = vor.u32 %v6313_v34, %v4609_v33  ;;  %v6294_v34 = vld [vmem:[#allocation10 + $0x94] sm:$0xf0] }
  0x5d   :  { %859 = vmatpush.bf16.msrb.mxu1 %v4518_v46  ;;  %v4570_v46 = vor.u32 %v6302_v42, %v4569_v41  ;;  %v6330_v41 = vld [vmem:[#allocation10 + $0x1b4] sm:$0xf0] }
  0x5e   :  { %872 = vmatpush.bf16.msrb.mxu2 %v4646_v1  ;;  %v4713_v1 = vld [vmem:[#allocation10 + $0x1e8] sm:$0xf] }
  0x62   :  { %873 = vmatpush.bf16.msrb.mxu2 %v4630_v15 }
  0x66   :  { %874 = vmatpush.bf16.msrb.mxu2 %v4614_v40  ;;  %v4681_v40 = vld [vmem:[#allocation10 + $0x1a8] sm:$0xf] }
  0xb6   :  { %v223_v55 = vpop.f32.mrf.mxu0 }
  0xb7   :  { %v224_v56 = vadd.f32 %v6742_v54, %v223_v55  ;;  %v6285_v54 = vld [vmem:[#allocation10 + $0x4c] sm:$0xf0]  ;;  %v6283_v55 = vld [vmem:[#allocation10 + $0x44] sm:$0xf] }
  0xb9   :  { %v228_v57 = vmul.f32 0.2, %v224_v56  ;;  %vm227_vm1 = vcmp.gt.f32.partialorder %v224_v56, 0.0 }
  0xbb   :  { %v229_v58 = vsel %vm227_vm1, %v224_v56, %v228_v57  ;;  %v366_v56 = vmul.f32 8.0, %v7140_v45  ;;  %v4498_v57 = vor.u32 %v6285_v54, %v4497_v53  ;;  %v4574_v54 = vor.u32 %v6300_v47, %v4571_v51  ;;  %v6328_v47 = vld [vmem:[#allocation10 + $0x1ac] sm:$0xf] }
  0xbc   :  { %v230_v59 = vpack.c.bf16 %v229_v58, %v229_v58  ;;  %v4499_v58 = vld [vmem:[#allocation10 + $0x50] sm:$0xf0] }
  0xbd   :  { %834 = vmatpush.bf16.msra.mxu3 %v4498_v57  ;;  %v367_v5 = vsub.f32 1.0, %v366_v56 }
  0xbe   :  { %v225_v60 = vpop.f32.mrf.mxu0  ;;  %335 = vmatmul.bf16.vlgmr.msra.gmra.mxu1 %v230_v59  ;;  %348 = vmatmul.bf16.vlgmr.msra.gmra.mxu2 %v230_v59  ;;  %v4502_v59 = vor.u32 %v6283_v55, %v4499_v58  ;;  %v4593_v55 = vld [vmem:[#allocation10 + $0x100] sm:$0xf] }
  0xbf   :  { %v4641_v60 = vld [vmem:[#allocation10 + $0x160] sm:$0xf]  ;;  %v368_v24 = vmul.f32 %v7140_v45, %v367_v5 }
  0xc0   :  { %v4642_v63 = vor.u32 %v6321_v61, %v4641_v60  ;;  %860 = vmatpush.bf16.msrb.mxu1 %v4502_v59  ;;  %v6309_v59 = vld [vmem:[#allocation10 + $0x10c] sm:$0xf0]  ;;  %v6307_v60 = vld [vmem:[#allocation10 + $0x104] sm:$0xf] }
  0xc1   :  { %835 = vmatpush.bf16.msra.mxu3 %v4482_v6  ;;  %v369_v43 = vadd.f32 %v7140_v45, %v368_v24  ;;  %v4598_v5 = vor.u32 %v6307_v60, %v4595_v0  ;;  %v6338_v6 = vld [vmem:[#allocation10 + $0x1f4] sm:$0xf0] }
  0xc2   :  { %846 = vmatpush.bf16.msrb.mxu0 %v4642_v63  ;;  %v4594_v63 = vor.u32 %v6309_v59, %v4593_v55  ;;  %v4714_v9 = vor.u32 %v6338_v6, %v4713_v1  ;;  %v6334_v24 = vld [vmem:[#allocation10 + $0x1d4] sm:$0xf0] }
  0xc3   :  { %v7159_v61 = vsel %vm370_vm2, %v7140_v45, %v369_v43  ;;  %875 = vmatpush.bf16.msrb.mxu2 %v4598_v5  ;;  %v6326_v60 = vld [vmem:[#allocation10 + $0x194] sm:$0xf0]  ;;  %v6284_v5 = vld [vmem:[#allocation10 + $0x4c] sm:$0xf] }
  0xc4   :  { %861 = vmatpush.bf16.msrb.mxu1 %v4486_v8 }
  0xc5   :  { %836 = vmatpush.bf16.msra.mxu3 %v4466_v21 }
  0xc6   :  { %847 = vmatpush.bf16.msrb.mxu0 %v4626_v12  ;;  %v6298_v12 = vld [vmem:[#allocation10 + $0xb4] sm:$0xf0] }
  0xc7   :  { %v4554_v22 = vor.u32 %v6298_v12, %v4553_v11  ;;  %920 = vmatpush.bf16.msra.mxu2 %v4718_v16  ;;  %v4510_v12 = vor.u32 %v6284_v5, %v4507_v7  ;;  %v4489_v16 = vld [vmem:[#allocation10 + $0x28] sm:$0xf] }
  0xc8   :  { %862 = vmatpush.bf16.msrb.mxu1 %v4470_v25  ;;  %v6332_v25 = vld [vmem:[#allocation10 + $0x1cc] sm:$0xf] }
  0xc9   :  { %881 = vmatpush.bf16.msrb.mxu3 %v4586_v31 }
  0xca   :  { %848 = vmatpush.bf16.msrb.mxu0 %v4610_v35  ;;  %v6292_v35 = vld [vmem:[#allocation10 + $0x8c] sm:$0xf] }
  0xcc   :  { %907 = vmatpush.bf16.msra.mxu1 %v4590_v32 }
  0xcd   :  { %882 = vmatpush.bf16.msrb.mxu3 %v4570_v46  ;;  %v4682_v46 = vor.u32 %v6330_v41, %v4681_v40 }
  0xce   :  { %849 = vmatpush.bf16.msrb.mxu0 %v4594_v63  ;;  %v4667_v63 = vld [vmem:[#allocation10 + $0x198] sm:$0xf0] }
  0xd0   :  { %908 = vmatpush.bf16.msra.mxu1 %v4574_v54 }
  0xd1   :  { %883 = vmatpush.bf16.msrb.mxu3 %v4554_v22 }
  0xd2   :  { %894 = vmatpush.bf16.msra.mxu0 %v4714_v9  ;;  %v6322_v9 = vld [vmem:[#allocation10 + $0x174] sm:$0xf0] }
  0xd4   :  { %909 = vmatpush.bf16.msra.mxu1 %v4558_v23 }
 0x13b   :  { %v7143_v14 = vpop.f32.mrf.mxu1 }
 0x13c   :  { %v353_v19 = vrot.slane %v7143_v14, 4  ;;  %v374_v20 = vmul.f32 %v7143_v14, %v7143_v14 }
 0x13e   :  { %v354_v29 = vadd.f32 %v353_v19, %v7143_v14  ;;  %v376_v30 = vrot.slane %v374_v20, 4  ;;  %v4697_v19 = vld [vmem:[#allocation10 + $0x1c8] sm:$0xf] }
 0x13f   :  { %v4698_v32 = vor.u32 %v6334_v24, %v4697_v19  ;;  %v4633_v24 = vld [vmem:[#allocation10 + $0x148] sm:$0xf] }
 0x140   :  { %v355_v38 = vrot.slane %v354_v29, 2  ;;  %v377_v39 = vadd.f32 %v376_v30, %v374_v20  ;;  %v4537_v30 = vld [vmem:[#allocation10 + $0x88] sm:$0xf] }
 0x141   :  { %v7151_v44 = vpop.f32.mrf.mxu2  ;;  %895 = vmatpush.bf16.msra.mxu0 %v4698_v32  ;;  %v6278_v32 = vld [vmem:[#allocation10 + $0x14] sm:$0xf0] }
 0x142   :  { %v356_v48 = vadd.f32 %v355_v38, %v354_v29  ;;  %v378_v49 = vrot.slane %v377_v39, 2  ;;  %v359_v50 = vrot.slane %v7151_v44, 4  ;;  %v375_v52 = vmul.f32 %v7151_v44, %v7151_v44  ;;  %v4699_v29 = vld [vmem:[#allocation10 + $0x1d8] sm:$0xf0] }
 0x143   :  { %v338_v53 = vpop.f32.mrf.mxu1  ;;  %v4702_v33 = vor.u32 %v6332_v25, %v4699_v29  ;;  %v4538_v38 = vor.u32 %v6294_v34, %v4537_v30  ;;  %v6318_v25 = vld [vmem:[#allocation10 + $0x154] sm:$0xf0]  ;;  %v6316_v29 = vld [vmem:[#allocation10 + $0x14c] sm:$0xf]  ;;  %v4635_v30 = vld [vmem:[#allocation10 + $0x158] sm:$0xf0] }
 0x144   :  { %v357_v56 = vrot.slane %v356_v48, 1  ;;  %v379_v57 = vadd.f32 %v378_v49, %v377_v39  ;;  %v360_v58 = vadd.f32 %v359_v50, %v7151_v44  ;;  %v382_v62 = vrot.slane %v375_v52, 4  ;;  %v4539_v39 = vld [vmem:[#allocation10 + $0x98] sm:$0xf0]  ;;  %v6290_v53 = vld [vmem:[#allocation10 + $0x74] sm:$0xf0] }
 0x145   :  { %v4542_v43 = vor.u32 %v6292_v35, %v4539_v39  ;;  %921 = vmatpush.bf16.msra.mxu2 %v4702_v33  ;;  %884 = vmatpush.bf16.msrb.mxu3 %v4538_v38  ;;  %v6276_v33 = vld [vmem:[#allocation10 + $0xc] sm:$0xf]  ;;  %v4475_v34 = vld [vmem:[#allocation10 + $0x18] sm:$0xf0]  ;;  %v4617_v38 = vld [vmem:[#allocation10 + $0x128] sm:$0xf] }
 0x146   :  { %v358_v2 = vadd.f32 %v357_v56, %v356_v48  ;;  %v380_v3 = vrot.slane %v379_v57, 1  ;;  %v361_v4 = vrot.slane %v360_v58, 2  ;;  %v383_v8 = vadd.f32 %v382_v62, %v375_v52  ;;  %v4683_v48 = vld [vmem:[#allocation10 + $0x1b8] sm:$0xf0]  ;;  %v4521_v52 = vld [vmem:[#allocation10 + $0x68] sm:$0xf]  ;;  %896 = vmatpush.bf16.msra.mxu0 %v4682_v46 }
 0x147   :  { %v4686_v51 = vor.u32 %v6328_v47, %v4683_v48  ;;  %910 = vmatpush.bf16.msra.mxu1 %v4542_v43  ;;  %v4522_v55 = vor.u32 %v6290_v53, %v4521_v52  ;;  %v6288_v56 = vld [vmem:[#allocation10 + $0x6c] sm:$0xf]  ;;  %v6314_v39 = vld [vmem:[#allocation10 + $0x134] sm:$0xf0]  ;;  %v4619_v46 = vld [vmem:[#allocation10 + $0x138] sm:$0xf0] }
 0x148   :  { %v7162_v45 = vmul.f32 %v7159_v61, %v358_v2  ;;  %v381_v13 = vadd.f32 %v380_v3, %v379_v57  ;;  %v362_v15 = vadd.f32 %v361_v4, %v360_v58  ;;  %v384_v20 = vrot.slane %v383_v8, 2  ;;  %v4523_v57 = vld [vmem:[#allocation10 + $0x78] sm:$0xf0]  ;;  %v4665_v58 = vld [vmem:[#allocation10 + $0x188] sm:$0xf] }
 0x149   :  { %v351_v21 = vpop.f32.mrf.mxu2  ;;  %v6324_v62 = vld [vmem:[#allocation10 + $0x18c] sm:$0xf]  ;;  %v4526_v1 = vor.u32 %v6288_v56, %v4523_v57  ;;  %v4666_v2 = vor.u32 %v6326_v60, %v4665_v58  ;;  %v4505_v3 = vld [vmem:[#allocation10 + $0x48] sm:$0xf]  ;;  %v6286_v4 = vld [vmem:[#allocation10 + $0x54] sm:$0xf0]  ;;  %922 = vmatpush.bf16.msra.mxu2 %v4686_v51  ;;  %885 = vmatpush.bf16.msrb.mxu3 %v4522_v55  ;;  %v4618_v53 = vor.u32 %v6314_v39, %v4617_v38 }
 0x14a   :  { %v388_v26 = vmul.f32 %v381_v13, %v7159_v61  ;;  %v390_v27 = vmul.f32 %v7162_v45, %v7162_v45  ;;  %v363_v28 = vrot.slane %v362_v15, 1  ;;  %v385_v31 = vadd.f32 %v384_v20, %v383_v8  ;;  %v4649_v8 = vld [vmem:[#allocation10 + $0x168] sm:$0xf]  ;;  %v6320_v13 = vld [vmem:[#allocation10 + $0x16c] sm:$0xf] }
 0x14b   :  { %v4670_v6 = vor.u32 %v6324_v62, %v4667_v63  ;;  %911 = vmatpush.bf16.msra.mxu1 %v4526_v1  ;;  %v4506_v11 = vor.u32 %v6286_v4, %v4505_v3  ;;  %897 = vmatpush.bf16.msra.mxu0 %v4666_v2  ;;  %v4650_v20 = vor.u32 %v6322_v9, %v4649_v8  ;;  %v4491_v21 = vld [vmem:[#allocation10 + $0x38] sm:$0xf0]  ;;  %v6312_v43 = vld [vmem:[#allocation10 + $0x12c] sm:$0xf]  ;;  %v4601_v56 = vld [vmem:[#allocation10 + $0x108] sm:$0xf] }
 0x14c   :  { %v392_v36 = vsub.f32 %v388_v26, %v390_v27  ;;  %v364_v37 = vadd.f32 %v363_v28, %v362_v15  ;;  %v386_v42 = vrot.slane %v385_v31, 1  ;;  %v4651_v15 = vld [vmem:[#allocation10 + $0x178] sm:$0xf0]  ;;  %v4490_v27 = vor.u32 %v6282_v17, %v4489_v16  ;;  %v6310_v57 = vld [vmem:[#allocation10 + $0x114] sm:$0xf0] }
 0x14d   :  { %923 = vmatpush.bf16.msra.mxu2 %v4670_v6  ;;  %v4654_v23 = vor.u32 %v6320_v13, %v4651_v15  ;;  %886 = vmatpush.bf16.msrb.mxu3 %v4506_v11  ;;  %v4494_v28 = vor.u32 %v6280_v18, %v4491_v21  ;;  %v420_v47 = vld [vmem:[#allocation8] ss:$2 sm:$0x3]  ;;  %v429_v52 = vld [vmem:[#allocation8 + $0x1] ss:$2 sm:$0x3]  ;;  %v4622_v55 = vor.u32 %v6312_v43, %v4619_v46 }
 0x14e   :  { %v7167_v49 = vadd.f32 0.8, %v392_v36  ;;  %v7170_v50 = vmul.f32 %v7159_v61, %v364_v37  ;;  %v387_v54 = vadd.f32 %v386_v42, %v385_v31  ;;  %v4473_v31 = vld [vmem:[#allocation10 + $0x8] sm:$0xf]  ;;  %v4634_v36 = vor.u32 %v6318_v25, %v4633_v24  ;;  %v4603_v60 = vld [vmem:[#allocation10 + $0x118] sm:$0xf0] }
 0x14f   :  { %912 = vmatpush.bf16.msra.mxu1 %v4510_v12  ;;  %898 = vmatpush.bf16.msra.mxu0 %v4650_v20  ;;  %v4638_v37 = vor.u32 %v6316_v29, %v4635_v30  ;;  %v4474_v41 = vor.u32 %v6278_v32, %v4473_v31  ;;  %v4478_v42 = vor.u32 %v6276_v33, %v4475_v34  ;;  %v422_v63 = vperm.slane %v420_v47, 0  ;;  %v6391_v24 = vld [vmem:[#allocation13 + $0x19c] sm:$0xf0] }
 0x150   :  { %6745 = vrsqrt.f32 %v7167_v49  ;;  %v391_v59 = vmul.f32 %v7170_v50, %v7170_v50  ;;  %v389_v0 = vmul.f32 %v387_v54, %v7159_v61  ;;  %vm404_vm4 = vweird.f32 %v7167_v49  ;;  %v4881_v29 = vld [vmem:[#allocation13 + $0x140] sm:$0xf] }
 0x151   :  { %924 = vmatpush.bf16.msra.mxu2 %v4654_v23  ;;  %887 = vmatpush.bf16.msrb.mxu3 %v4490_v27  ;;  %v394_v62 = vsub.f32 %v7143_v14, %v7162_v45  ;;  %v4602_v2 = vor.u32 %v6310_v57, %v4601_v56  ;;  %v431_v4 = vperm.slane %v429_v52, 0  ;;  %v395_v14 = vsub.f32 %v7151_v44, %v7170_v50  ;;  %v4945_v44 = vld [vmem:[#allocation13 + $0x1c0] sm:$0xf] }
 0x152   :  { %v393_v10 = vsub.f32 %v389_v0, %v391_v59  ;;  %v6308_v59 = vld [vmem:[#allocation10 + $0x10c] sm:$0xf]  ;;  %v423_v45 = vperm.slane %v420_v47, 1  ;;  %v432_v13 = vperm.slane %v429_v52, 1  ;;  %v6399_v50 = vld [vmem:[#allocation13 + $0x1dc] sm:$0xf0] }
 0x153   :  { %913 = vmatpush.bf16.msra.mxu1 %v4494_v28  ;;  %899 = vmatpush.bf16.msra.mxu0 %v4634_v36  ;;  %v4606_v6 = vor.u32 %v6308_v59, %v4603_v60  ;;  %v4913_v23 = vld [vmem:[#allocation13 + $0x180] sm:$0xf] }
 0x154   :  { %v7176_v19 = vadd.f32 0.8, %v393_v10  ;;  %v4914_v25 = vor.u32 %v6391_v24, %v4913_v23  ;;  %v6463_v27 = vld [vmem:[#allocation13 + $0x3dc] sm:$0xf0] }
 0x155   :  { %925 = vmatpush.bf16.msra.mxu2 %v4638_v37  ;;  %888 = vmatpush.bf16.msrb.mxu3 %v4474_v41  ;;  %v6383_v30 = vld [vmem:[#allocation13 + $0x15c] sm:$0xf0] }
 0x156   :  { %v6746_v22 = vpop.eup %6745  ;;  %6747 = vrsqrt.f32 %v7176_v19  ;;  %vm414_vm7 = vweird.f32 %v7176_v19  ;;  %v4882_v31 = vor.u32 %v6383_v30, %v4881_v29  ;;  %v5169_v32 = vld [vmem:[#allocation13 + $0x380] sm:$0xf]  ;;  %v6387_v30 = vld [vmem:[#allocation13 + $0x184] sm:$0xf] }
 0x157   :  { %v399_v26 = vmul.f32 %v6746_v22, %v7167_v49  ;;  %vm405_vm3 = vweird.f32 %v6746_v22  ;;  %914 = vmatpush.bf16.msra.mxu1 %v4478_v42  ;;  %900 = vmatpush.bf16.msra.mxu0 %v4618_v53  ;;  %v6455_v33 = vld [vmem:[#allocation13 + $0x39c] sm:$0xf0] }
 0x158   :  { %vm406_vm5 = vmor %vm404_vm4, %vm405_vm3  ;;  %v5170_v34 = vor.u32 %v6455_v33, %v5169_v32  ;;  %v6375_v36 = vld [vmem:[#allocation13 + $0x11c] sm:$0xf0] }
 0x159   :  { %v400_v35 = vmul.f32 %v6746_v22, %v399_v26  ;;  %926 = vmatpush.bf16.msra.mxu2 %v4622_v55  ;;  %v5201_v26 = vld [vmem:[#allocation13 + $0x3c0] sm:$0xf] }
 0x15a   :  { %v5202_v28 = vor.u32 %v6463_v27, %v5201_v26  ;;  %v5137_v38 = vld [vmem:[#allocation13 + $0x340] sm:$0xf] }
 0x15b   :  { %v401_v40 = vmul.f32 0.5, %v400_v35  ;;  %901 = vmatpush.bf16.msra.mxu0 %v4602_v2  ;;  %v4849_v35 = vld [vmem:[#allocation13 + $0x100] sm:$0xf] }
 0x15c   :  { %v6748_v48 = vpop.eup %6747  ;;  %v4850_v37 = vor.u32 %v6375_v36, %v4849_v35  ;;  %v6447_v39 = vld [vmem:[#allocation13 + $0x35c] sm:$0xf0] }
 0x15d   :  { %v402_v51 = vsub.f32 1.5, %v401_v40  ;;  %v409_v54 = vmul.f32 %v6748_v48, %v7176_v19  ;;  %vm415_vm6 = vweird.f32 %v6748_v48  ;;  %927 = vmatpush.bf16.msra.mxu2 %v4606_v6  ;;  %v5138_v40 = vor.u32 %v6447_v39, %v5137_v38  ;;  %v4817_v41 = vld [vmem:[#allocation13 + $0xc0] sm:$0xf]  ;;  %v6459_v38 = vld [vmem:[#allocation13 + $0x3c4] sm:$0xf] }
 0x15e   :  { %vm416_vm8 = vmor %vm414_vm7, %vm415_vm6  ;;  %v6367_v42 = vld [vmem:[#allocation13 + $0xdc] sm:$0xf0]  ;;  %v5203_v39 = vld [vmem:[#allocation13 + $0x3e0] sm:$0xf0] }
 0x15f   :  { %v403_v58 = vmul.f32 %v6746_v22, %v402_v51  ;;  %v410_v0 = vmul.f32 %v6748_v48, %v409_v54  ;;  %v5457_v43 = vld [vmem:[#allocation13 + $0x5c0] sm:$0xf]  ;;  %v4818_v46 = vor.u32 %v6367_v42, %v4817_v41  ;;  %v5206_v42 = vor.u32 %v6459_v38, %v5203_v39 }
 0x160   :  { %v6527_v47 = vld [vmem:[#allocation13 + $0x5dc] sm:$0xf0] }
 0x161   :  { %v407_v1 = vsel %vm406_vm5, %v6746_v22, %v403_v58  ;;  %v411_v5 = vmul.f32 0.5, %v410_v0  ;;  %v4946_v22 = vor.u32 %v6399_v50, %v4945_v44  ;;  %v5105_v51 = vld [vmem:[#allocation13 + $0x300] sm:$0xf] }
 0x162   :  { %v418_v3 = vmul.f32 %v407_v1, %v394_v62  ;;  %v6439_v52 = vld [vmem:[#allocation13 + $0x31c] sm:$0xf0] }
 0x163   :  { %v412_v7 = vsub.f32 1.5, %v411_v5  ;;  %v5106_v53 = vor.u32 %v6439_v52, %v5105_v51  ;;  %v4785_v54 = vld [vmem:[#allocation13 + $0x80] sm:$0xf]  ;;  %v6379_v51 = vld [vmem:[#allocation13 + $0x144] sm:$0xf] }
 0x164   :  { %v426_v49 = vmul.f32 %v422_v63, %v418_v3  ;;  %v6359_v55 = vld [vmem:[#allocation13 + $0x9c] sm:$0xf0]  ;;  %v4883_v52 = vld [vmem:[#allocation13 + $0x160] sm:$0xf0] }
 0x165   :  { %v413_v9 = vmul.f32 %v6748_v48, %v412_v7  ;;  %v5425_v56 = vld [vmem:[#allocation13 + $0x580] sm:$0xf]  ;;  %v4786_v57 = vor.u32 %v6359_v55, %v4785_v54  ;;  %v4886_v55 = vor.u32 %v6379_v51, %v4883_v52  ;;  %v4787_v51 = vld [vmem:[#allocation13 + $0xa0] sm:$0xf0] }
 0x166   :  { %v435_v8 = vadd.f32 %v431_v4, %v426_v49  ;;  %v6519_v58 = vld [vmem:[#allocation13 + $0x59c] sm:$0xf0]  ;;  %v6515_v52 = vld [vmem:[#allocation13 + $0x584] sm:$0xf] }
 0x167   :  { %v417_v10 = vsel %vm416_vm8, %v6748_v48, %v413_v9  ;;  %v5458_v48 = vor.u32 %v6527_v47, %v5457_v43  ;;  %v5426_v59 = vor.u32 %v6519_v58, %v5425_v56  ;;  %v5073_v60 = vld [vmem:[#allocation13 + $0x2c0] sm:$0xf] }
 0x168   :  { %vm437_vm9 = vcmp.gt.f32.partialorder %v435_v8, 0.0  ;;  %v439_v11 = vmul.f32 0.2, %v435_v8  ;;  %v419_v12 = vmul.f32 %v417_v10, %v395_v14  ;;  %v6431_v62 = vld [vmem:[#allocation13 + $0x2dc] sm:$0xf0] }
 0x169   :  { %v5713_v63 = vld [vmem:[#allocation13 + $0x7c0] sm:$0xf]  ;;  %v5074_v0 = vor.u32 %v6431_v62, %v5073_v60  ;;  %v5171_v60 = vld [vmem:[#allocation13 + $0x3a0] sm:$0xf0] }
 0x16a   :  { %v441_v15 = vsel %vm437_vm9, %v435_v8, %v439_v11  ;;  %v427_v16 = vmul.f32 %v423_v45, %v419_v12  ;;  %v6591_v1 = vld [vmem:[#allocation13 + $0x7dc] sm:$0xf0] }
 0x16b   :  { %v443_v17 = vpack.c.bf16 %v441_v15, %v441_v15  ;;  %v5714_v2 = vor.u32 %v6591_v1, %v5713_v63  ;;  %v4753_v3 = vld [vmem:[#allocation13 + $0x40] sm:$0xf] }
 0x16c   :  { %v436_v18 = vadd.f32 %v432_v13, %v427_v16  ;;  %v6351_v4 = vld [vmem:[#allocation13 + $0x5c] sm:$0xf0] }
 0x16d   :  { %837 = vmatmul.bf16.vlgmr.msra.gmra.mxu3 %v443_v17  ;;  %863 = vmatmul.bf16.vlgmr.msrb.gmra.mxu1 %v443_v17  ;;  %v5393_v5 = vld [vmem:[#allocation13 + $0x540] sm:$0xf]  ;;  %v4754_v6 = vor.u32 %v6351_v4, %v4753_v3  ;;  %v6371_v4 = vld [vmem:[#allocation13 + $0x104] sm:$0xf] }
 0x16e   :  { %vm438_vm10 = vcmp.gt.f32.partialorder %v436_v18, 0.0  ;;  %v440_v20 = vmul.f32 0.2, %v436_v18  ;;  %2634 = vmatpush.bf16.msra.mxu3 %v4946_v22  ;;  %2660 = vmatpush.bf16.msrb.mxu1 %v5458_v48  ;;  %v6511_v49 = vld [vmem:[#allocation13 + $0x55c] sm:$0xf0] }
 0x16f   :  { %v5394_v7 = vor.u32 %v6511_v49, %v5393_v5  ;;  %v5041_v8 = vld [vmem:[#allocation13 + $0x280] sm:$0xf]  ;;  %v4851_v5 = vld [vmem:[#allocation13 + $0x120] sm:$0xf0] }
 0x170   :  { %v442_v19 = vsel %vm438_vm10, %v436_v18, %v440_v20  ;;  %v6423_v9 = vld [vmem:[#allocation13 + $0x29c] sm:$0xf0]  ;;  %v6395_v18 = vld [vmem:[#allocation13 + $0x1c4] sm:$0xf] }
 0x171   :  { %v444_v21 = vpack.c.bf16 %v442_v19, %v442_v19  ;;  %v5681_v14 = vld [vmem:[#allocation13 + $0x780] sm:$0xf]  ;;  %v5042_v45 = vor.u32 %v6423_v9, %v5041_v8  ;;  %v4947_v20 = vld [vmem:[#allocation13 + $0x1e0] sm:$0xf0] }
 0x172   :  { %2635 = vmatpush.bf16.msra.mxu3 %v4914_v25  ;;  %2661 = vmatpush.bf16.msrb.mxu1 %v5426_v59  ;;  %v6583_v10 = vld [vmem:[#allocation13 + $0x79c] sm:$0xf0]  ;;  %v4950_v44 = vor.u32 %v6395_v18, %v4947_v20  ;;  %v6451_v59 = vld [vmem:[#allocation13 + $0x384] sm:$0xf] }
 0x173   :  { %850 = vmatmul.bf16.vlgmr.msrb.gmra.mxu0 %v444_v21  ;;  %876 = vmatmul.bf16.vlgmr.msrb.gmra.mxu2 %v444_v21  ;;  %v5682_v11 = vor.u32 %v6583_v10, %v5681_v14  ;;  %v4721_v12 = vld [vmem:[#allocation13] sm:$0xf]  ;;  %v6443_v10 = vld [vmem:[#allocation13 + $0x344] sm:$0xf] }
 0x174   :  { %2647 = vmatpush.bf16.msrb.mxu0 %v5202_v28  ;;  %2673 = vmatpush.bf16.msrb.mxu2 %v5714_v2  ;;  %v6343_v13 = vld [vmem:[#allocation13 + $0x1c] sm:$0xf0] }
 0x175   :  { %v5361_v15 = vld [vmem:[#allocation13 + $0x500] sm:$0xf]  ;;  %v4722_v16 = vor.u32 %v6343_v13, %v4721_v12 }
 0x176   :  { %2636 = vmatpush.bf16.msra.mxu3 %v4882_v31  ;;  %2662 = vmatpush.bf16.msrb.mxu1 %v5394_v7  ;;  %v5009_v50 = vld [vmem:[#allocation13 + $0x240] sm:$0xf]  ;;  %v4915_v31 = vld [vmem:[#allocation13 + $0x1a0] sm:$0xf0]  ;;  %v4854_v7 = vor.u32 %v6371_v4, %v4851_v5 }
 0x177   :  { %v6415_v22 = vld [vmem:[#allocation13 + $0x25c] sm:$0xf0]  ;;  %v4918_v32 = vor.u32 %v6387_v30, %v4915_v31  ;;  %v5075_v4 = vld [vmem:[#allocation13 + $0x2e0] sm:$0xf0] }
 0x178   :  { %2648 = vmatpush.bf16.msrb.mxu0 %v5170_v34  ;;  %2674 = vmatpush.bf16.msrb.mxu2 %v5682_v11  ;;  %v5649_v23 = vld [vmem:[#allocation13 + $0x740] sm:$0xf]  ;;  %v5010_v24 = vor.u32 %v6415_v22, %v5009_v50  ;;  %v5139_v11 = vld [vmem:[#allocation13 + $0x360] sm:$0xf0] }
 0x179   :  { %v6575_v25 = vld [vmem:[#allocation13 + $0x75c] sm:$0xf0]  ;;  %v6363_v50 = vld [vmem:[#allocation13 + $0xc4] sm:$0xf] }
 0x17a   :  { %2637 = vmatpush.bf16.msra.mxu3 %v4850_v37  ;;  %v5650_v26 = vor.u32 %v6575_v25, %v5649_v23  ;;  %v5329_v27 = vld [vmem:[#allocation13 + $0x4c0] sm:$0xf]  ;;  %v6587_v5 = vld [vmem:[#allocation13 + $0x7c4] sm:$0xf] }
 0x17b   :  { %v6495_v28 = vld [vmem:[#allocation13 + $0x4dc] sm:$0xf0] }
 0x17c   :  { %2649 = vmatpush.bf16.msrb.mxu0 %v5138_v40  ;;  %v5330_v29 = vor.u32 %v6495_v28, %v5329_v27  ;;  %2675 = vmatpush.bf16.msrb.mxu2 %v5650_v26  ;;  %v4977_v33 = vld [vmem:[#allocation13 + $0x200] sm:$0xf]  ;;  %v4819_v26 = vld [vmem:[#allocation13 + $0xe0] sm:$0xf0] }
 0x17d   :  { %889 = vmatmul.bf16.vlgmr.msrb.gmra.mxu3 %v443_v17  ;;  %915 = vmatmul.bf16.vlgmr.msra.gmra.mxu1 %v443_v17  ;;  %v6503_v17 = vld [vmem:[#allocation13 + $0x51c] sm:$0xf0]  ;;  %v4822_v27 = vor.u32 %v6363_v50, %v4819_v26  ;;  %v6523_v28 = vld [vmem:[#allocation13 + $0x5c4] sm:$0xf] }
 0x17e   :  { %2638 = vmatpush.bf16.msra.mxu3 %v4818_v46  ;;  %v6407_v34 = vld [vmem:[#allocation13 + $0x21c] sm:$0xf0]  ;;  %v5043_v50 = vld [vmem:[#allocation13 + $0x2a0] sm:$0xf0] }
 0x17f   :  { %v5617_v35 = vld [vmem:[#allocation13 + $0x700] sm:$0xf]  ;;  %v4978_v36 = vor.u32 %v6407_v34, %v4977_v33 }
 0x180   :  { %2650 = vmatpush.bf16.msrb.mxu0 %v5106_v53  ;;  %v6567_v37 = vld [vmem:[#allocation13 + $0x71c] sm:$0xf0] }
 0x181   :  { %v5618_v41 = vor.u32 %v6567_v37, %v5617_v35  ;;  %v5297_v43 = vld [vmem:[#allocation13 + $0x480] sm:$0xf]  ;;  %v6435_v37 = vld [vmem:[#allocation13 + $0x304] sm:$0xf] }
 0x182   :  { %2639 = vmatpush.bf16.msra.mxu3 %v4786_v57  ;;  %v6487_v46 = vld [vmem:[#allocation13 + $0x49c] sm:$0xf0] }
 0x183   :  { %902 = vmatmul.bf16.vlgmr.msra.gmra.mxu0 %v444_v21  ;;  %928 = vmatmul.bf16.vlgmr.msra.gmra.mxu2 %v444_v21  ;;  %v5362_v21 = vor.u32 %v6503_v17, %v5361_v15  ;;  %v5298_v48 = vor.u32 %v6487_v46, %v5297_v43  ;;  %v5585_v56 = vld [vmem:[#allocation13 + $0x6c0] sm:$0xf]  ;;  %v5142_v17 = vor.u32 %v6443_v10, %v5139_v11  ;;  %v6355_v43 = vld [vmem:[#allocation13 + $0x84] sm:$0xf] }
 0x184   :  { %2651 = vmatpush.bf16.msrb.mxu0 %v5074_v0  ;;  %2676 = vmatpush.bf16.msrb.mxu2 %v5618_v41  ;;  %v6559_v57 = vld [vmem:[#allocation13 + $0x6dc] sm:$0xf0]  ;;  %v5174_v0 = vor.u32 %v6451_v59, %v5171_v60  ;;  %v4790_v59 = vor.u32 %v6355_v43, %v4787_v51  ;;  %v6411_v43 = vld [vmem:[#allocation13 + $0x244] sm:$0xf] }
 0x185   :  { %2663 = vmatpush.bf16.msrb.mxu1 %v5362_v21  ;;  %v5586_v58 = vor.u32 %v6559_v57, %v5585_v56  ;;  %v5265_v1 = vld [vmem:[#allocation13 + $0x440] sm:$0xf] }
 0x186   :  { %2640 = vmatpush.bf16.msra.mxu3 %v4754_v6  ;;  %v6479_v2 = vld [vmem:[#allocation13 + $0x45c] sm:$0xf0] }
 0x187   :  { %v5266_v3 = vor.u32 %v6479_v2, %v5265_v1  ;;  %v5553_v8 = vld [vmem:[#allocation13 + $0x680] sm:$0xf] }
 0x188   :  { %2652 = vmatpush.bf16.msrb.mxu0 %v5042_v45  ;;  %2677 = vmatpush.bf16.msrb.mxu2 %v5586_v58  ;;  %v6551_v9 = vld [vmem:[#allocation13 + $0x69c] sm:$0xf0] }
 0x189   :  { %2664 = vmatpush.bf16.msrb.mxu1 %v5330_v29  ;;  %v5554_v45 = vor.u32 %v6551_v9, %v5553_v8  ;;  %v5233_v18 = vld [vmem:[#allocation13 + $0x400] sm:$0xf]  ;;  %v5715_v9 = vld [vmem:[#allocation13 + $0x7e0] sm:$0xf0] }
 0x18a   :  { %2641 = vmatpush.bf16.msra.mxu3 %v4722_v16  ;;  %v6471_v20 = vld [vmem:[#allocation13 + $0x41c] sm:$0xf0] }
 0x18b   :  { %v5521_v33 = vld [vmem:[#allocation13 + $0x640] sm:$0xf] }
 0x18c   :  { %2653 = vmatpush.bf16.msrb.mxu0 %v5010_v24  ;;  %2678 = vmatpush.bf16.msrb.mxu2 %v5554_v45  ;;  %v5489_v60 = vld [vmem:[#allocation13 + $0x600] sm:$0xf] }
 0x18d   :  { %2665 = vmatpush.bf16.msrb.mxu1 %v5298_v48 }
 0x18e   :  { %2686 = vmatpush.bf16.msrb.mxu3 %v4950_v44  ;;  %v5234_v44 = vor.u32 %v6471_v20, %v5233_v18  ;;  %v5718_v18 = vor.u32 %v6587_v5, %v5715_v9  ;;  %v6403_v5 = vld [vmem:[#allocation13 + $0x204] sm:$0xf] }
 0x190   :  { %2654 = vmatpush.bf16.msrb.mxu0 %v4978_v36  ;;  %v6543_v36 = vld [vmem:[#allocation13 + $0x65c] sm:$0xf0] }
 0x191   :  { %2666 = vmatpush.bf16.msrb.mxu1 %v5266_v3  ;;  %v5522_v41 = vor.u32 %v6543_v36, %v5521_v33  ;;  %v4723_v33 = vld [vmem:[#allocation13 + $0x20] sm:$0xf0] }
 0x192   :  { %2687 = vmatpush.bf16.msrb.mxu3 %v4918_v32  ;;  %v5459_v32 = vld [vmem:[#allocation13 + $0x5e0] sm:$0xf0] }
 0x193   :  { %v5462_v35 = vor.u32 %v6523_v28, %v5459_v32  ;;  %2679 = vmatpush.bf16.msrb.mxu2 %v5522_v41  ;;  %v6339_v32 = vld [vmem:[#allocation13 + $0x4] sm:$0xf] }
 0x194   :  { %2699 = vmatpush.bf16.msra.mxu0 %v5206_v42  ;;  %v5107_v42 = vld [vmem:[#allocation13 + $0x320] sm:$0xf0] }
 0x195   :  { %2667 = vmatpush.bf16.msrb.mxu1 %v5234_v44  ;;  %v5110_v48 = vor.u32 %v6435_v37, %v5107_v42  ;;  %v6419_v44 = vld [vmem:[#allocation13 + $0x284] sm:$0xf] }
 0x196   :  { %2688 = vmatpush.bf16.msrb.mxu3 %v4886_v55 }
 0x198   :  { %2700 = vmatpush.bf16.msra.mxu0 %v5174_v0 }
 0x199   :  { %2712 = vmatpush.bf16.msra.mxu1 %v5462_v35 }
 0x19a   :  { %2689 = vmatpush.bf16.msrb.mxu3 %v4854_v7 }
 0x19c   :  { %2701 = vmatpush.bf16.msra.mxu0 %v5142_v17 }
 0x19e   :  { %2690 = vmatpush.bf16.msrb.mxu3 %v4822_v27  ;;  %v5683_v27 = vld [vmem:[#allocation13 + $0x7a0] sm:$0xf0] }
 0x1a0   :  { %2702 = vmatpush.bf16.msra.mxu0 %v5110_v48 }
 0x1a2   :  { %2691 = vmatpush.bf16.msrb.mxu3 %v4790_v59  ;;  %v5651_v59 = vld [vmem:[#allocation13 + $0x760] sm:$0xf0] }
 0x1ea   :  { %v7188_v19 = vpop.f32.mrf.mxu1 }
 0x1f0   :  { %v838_v40 = vpop.f32.mrf.mxu3  ;;  %v851_v47 = vpop.f32.mrf.mxu0 }
 0x1f1   :  { %v7190_v53 = vadd.f32 %v851_v47, %v838_v40 }
 0x1f2   :  { %v866_v54 = vpop.f32.mrf.mxu1 }
 0x1f3   :  { %v933_v62 = vrot.slane %v7190_v53, 4  ;;  %v961_v63 = vmul.f32 %v7190_v53, %v7190_v53  ;;  %v5427_v54 = vld [vmem:[#allocation13 + $0x5a0] sm:$0xf0] }
 0x1f4   :  { %v5430_v2 = vor.u32 %v6515_v52, %v5427_v54  ;;  %v5011_v54 = vld [vmem:[#allocation13 + $0x260] sm:$0xf0] }
 0x1f5   :  { %v934_v6 = vadd.f32 %v933_v62, %v7190_v53  ;;  %v965_v49 = vrot.slane %v961_v63, 4  ;;  %v6535_v62 = vld [vmem:[#allocation13 + $0x61c] sm:$0xf0] }
 0x1f6   :  { %v877_v14 = vpop.f32.mrf.mxu2  ;;  %v5490_v3 = vor.u32 %v6535_v62, %v5489_v60  ;;  %2713 = vmatpush.bf16.msra.mxu1 %v5430_v2  ;;  %v6491_v60 = vld [vmem:[#allocation13 + $0x4c4] sm:$0xf] }
 0x1f7   :  { %v935_v12 = vrot.slane %v934_v6, 2  ;;  %v966_v13 = vadd.f32 %v965_v49, %v961_v63  ;;  %v7197_v15 = vadd.f32 %v877_v14, %v7188_v19  ;;  %v6427_v63 = vld [vmem:[#allocation13 + $0x2c4] sm:$0xf] }
 0x1f8   :  { %v840_v16 = vpop.f32.mrf.mxu3  ;;  %v853_v21 = vpop.f32.mrf.mxu0  ;;  %v6347_v14 = vld [vmem:[#allocation13 + $0x44] sm:$0xf]  ;;  %v5078_v11 = vor.u32 %v6427_v63, %v5075_v4  ;;  %2680 = vmatpush.bf16.msrb.mxu2 %v5490_v3 }
 0x1f9   :  { %v936_v22 = vadd.f32 %v935_v12, %v934_v6  ;;  %v967_v23 = vrot.slane %v966_v13, 2  ;;  %v939_v24 = vrot.slane %v7197_v15, 4  ;;  %v962_v19 = vmul.f32 %v7197_v15, %v7197_v15  ;;  %v4755_v12 = vld [vmem:[#allocation13 + $0x60] sm:$0xf0] }
 0x1fa   :  { %v7200_v25 = vpop.f32.mrf.mxu1  ;;  %v4758_v20 = vor.u32 %v6347_v14, %v4755_v12  ;;  %v5395_v21 = vld [vmem:[#allocation13 + $0x560] sm:$0xf0]  ;;  %2703 = vmatpush.bf16.msra.mxu0 %v5078_v11 }
 0x1fb   :  { %v937_v29 = vrot.slane %v936_v22, 1  ;;  %v968_v30 = vadd.f32 %v967_v23, %v966_v13  ;;  %v940_v31 = vadd.f32 %v939_v24, %v7197_v15  ;;  %v971_v34 = vrot.slane %v962_v19, 4  ;;  %v6507_v13 = vld [vmem:[#allocation13 + $0x544] sm:$0xf] }
 0x1fc   :  { %v5398_v26 = vor.u32 %v6507_v13, %v5395_v21  ;;  %2725 = vmatpush.bf16.msra.mxu2 %v5718_v18  ;;  %2692 = vmatpush.bf16.msrb.mxu3 %v4758_v20  ;;  %v5331_v62 = vld [vmem:[#allocation13 + $0x4e0] sm:$0xf0] }
 0x1fd   :  { %v938_v38 = vadd.f32 %v937_v29, %v936_v22  ;;  %v969_v39 = vrot.slane %v968_v30, 1  ;;  %v941_v40 = vrot.slane %v940_v31, 2  ;;  %v972_v46 = vadd.f32 %v971_v34, %v962_v19  ;;  %v6579_v19 = vld [vmem:[#allocation13 + $0x784] sm:$0xf] }
 0x1fe   :  { %v879_v47 = vpop.f32.mrf.mxu2  ;;  %2714 = vmatpush.bf16.msra.mxu1 %v5398_v26  ;;  %v5334_v4 = vor.u32 %v6491_v60, %v5331_v62  ;;  %v6563_v12 = vld [vmem:[#allocation13 + $0x704] sm:$0xf]  ;;  %v7256_v62 = vld [vmem:[#allocation11 + $0x1] ss:$2 sm:$0xf] }
 0x1ff   :  { %v7206_v55 = vmul.f32 %v938_v38, %v7159_v61  ;;  %v970_v56 = vadd.f32 %v969_v39, %v968_v30  ;;  %v942_v57 = vadd.f32 %v941_v40, %v940_v31  ;;  %v973_v0 = vrot.slane %v972_v46, 2  ;;  %v6499_v39 = vld [vmem:[#allocation13 + $0x504] sm:$0xf] }
 0x200   :  { %v890_v58 = vpop.f32.mrf.mxu3  ;;  %v903_v1 = vpop.f32.mrf.mxu0  ;;  %v5046_v30 = vor.u32 %v6419_v44, %v5043_v50  ;;  %v5686_v31 = vor.u32 %v6579_v19, %v5683_v27  ;;  %v4726_v38 = vor.u32 %v6339_v32, %v4723_v33  ;;  %v5363_v40 = vld [vmem:[#allocation13 + $0x520] sm:$0xf0] }
 0x201   :  { %v989_v6 = vmul.f32 %v970_v56, %v7159_v61  ;;  %v993_v49 = vmul.f32 %v7206_v55, %v7206_v55  ;;  %v943_v7 = vrot.slane %v942_v57, 1  ;;  %v974_v45 = vadd.f32 %v973_v0, %v972_v46  ;;  %v6571_v56 = vld [vmem:[#allocation13 + $0x744] sm:$0xf] }
 0x202   :  { %v918_v8 = vpop.f32.mrf.mxu1  ;;  %v7211_v10 = vadd.f32 %v903_v1, %v890_v58  ;;  %2704 = vmatpush.bf16.msra.mxu0 %v5046_v30  ;;  %2726 = vmatpush.bf16.msra.mxu2 %v5686_v31  ;;  %v5014_v58 = vor.u32 %v6411_v43, %v5011_v54  ;;  %v5654_v3 = vor.u32 %v6571_v56, %v5651_v59  ;;  %v5619_v13 = vld [vmem:[#allocation13 + $0x720] sm:$0xf0]  ;;  %v7241_v30 = vld [vmem:[#allocation11] ss:$2 sm:$0xf] }
 0x203   :  { %v997_v16 = vsub.f32 %v989_v6, %v993_v49  ;;  %v944_v17 = vadd.f32 %v943_v7, %v942_v57  ;;  %v975_v22 = vrot.slane %v974_v45, 1  ;;  %2693 = vmatpush.bf16.msrb.mxu3 %v4726_v38  ;;  %v5366_v57 = vor.u32 %v6499_v39, %v5363_v40  ;;  %v4979_v6 = vld [vmem:[#allocation13 + $0x220] sm:$0xf0] }
 0x204   :  { %v945_v23 = vrot.slane %v7211_v10, 4  ;;  %v963_v24 = vmul.f32 %v7211_v10, %v7211_v10  ;;  %v4982_v11 = vor.u32 %v6403_v5, %v4979_v6  ;;  %v6483_v18 = vld [vmem:[#allocation13 + $0x484] sm:$0xf]  ;;  %v1001_v54 = vsub.f32 %v7190_v53, %v7206_v55 }
 0x205   :  { %v7216_v28 = vadd.f32 0.8, %v997_v16  ;;  %v7219_v29 = vmul.f32 %v944_v17, %v7159_v61  ;;  %v976_v34 = vadd.f32 %v975_v22, %v974_v45  ;;  %2715 = vmatpush.bf16.msra.mxu1 %v5366_v57  ;;  %v5299_v20 = vld [vmem:[#allocation13 + $0x4a0] sm:$0xf0] }
 0x206   :  { %v946_v35 = vadd.f32 %v945_v23, %v7211_v10  ;;  %v977_v36 = vrot.slane %v963_v24, 4  ;;  %v929_v37 = vpop.f32.mrf.mxu2  ;;  %2705 = vmatpush.bf16.msra.mxu0 %v5014_v58  ;;  %2727 = vmatpush.bf16.msra.mxu2 %v5654_v3  ;;  %v5302_v26 = vor.u32 %v6483_v18, %v5299_v20  ;;  %v6555_v19 = vld [vmem:[#allocation13 + $0x6c4] sm:$0xf] }
 0x207   :  { %6749 = vrsqrt.f32 %v7216_v28  ;;  %v994_v41 = vmul.f32 %v7219_v29, %v7219_v29  ;;  %v990_v46 = vmul.f32 %v976_v34, %v7159_v61  ;;  %v7227_v51 = vadd.f32 %v929_v37, %v7200_v25  ;;  %v5587_v27 = vld [vmem:[#allocation13 + $0x6e0] sm:$0xf0] }
 0x208   :  { %v892_v42 = vpop.f32.mrf.mxu3  ;;  %v947_v47 = vrot.slane %v946_v35, 2  ;;  %v978_v48 = vadd.f32 %v977_v36, %v963_v24  ;;  %v905_v52 = vpop.f32.mrf.mxu0  ;;  %v5622_v24 = vor.u32 %v6563_v12, %v5619_v13  ;;  %v5590_v36 = vor.u32 %v6555_v19, %v5587_v27  ;;  %v6475_v40 = vld [vmem:[#allocation13 + $0x444] sm:$0xf] }
 0x209   :  { %v998_v63 = vsub.f32 %v990_v46, %v994_v41  ;;  %v951_v2 = vrot.slane %v7227_v51, 4  ;;  %v964_v25 = vmul.f32 %v7227_v51, %v7227_v51  ;;  %2716 = vmatpush.bf16.msra.mxu1 %v5334_v4  ;;  %v5267_v41 = vld [vmem:[#allocation13 + $0x460] sm:$0xf0]  ;;  %v1055_v46 = vperm.slane %v7241_v30, 0 }
 0x20a   :  { %v948_v0 = vadd.f32 %v947_v47, %v946_v35  ;;  %v979_v1 = vrot.slane %v978_v48, 2  ;;  %2706 = vmatpush.bf16.msra.mxu0 %v4982_v11  ;;  %2728 = vmatpush.bf16.msra.mxu2 %v5622_v24  ;;  %v5555_v52 = vld [vmem:[#allocation13 + $0x6a0] sm:$0xf0]  ;;  %vm1015_vm12 = vweird.f32 %v7216_v28  ;;  %v6400_v24 = vld [vmem:[#allocation13 + $0x1e4] sm:$0xf0] }
 0x20b   :  { %v7232_v49 = vadd.f32 0.8, %v998_v63  ;;  %v952_v9 = vadd.f32 %v951_v2, %v7227_v51  ;;  %v983_v45 = vrot.slane %v964_v25, 4  ;;  %v6467_v59 = vld [vmem:[#allocation13 + $0x404] sm:$0xf] }
 0x20c   :  { %v949_v7 = vrot.slane %v948_v0, 1  ;;  %v980_v8 = vadd.f32 %v979_v1, %v978_v48  ;;  %v6547_v48 = vld [vmem:[#allocation13 + $0x684] sm:$0xf] }
 0x20d   :  { %v7235_v14 = vpop.eup %6749  ;;  %6751 = vrsqrt.f32 %v7232_v49  ;;  %v953_v50 = vrot.slane %v952_v9, 2  ;;  %v984_v22 = vadd.f32 %v983_v45, %v964_v25  ;;  %2717 = vmatpush.bf16.msra.mxu1 %v5302_v26  ;;  %v5235_v1 = vld [vmem:[#allocation13 + $0x420] sm:$0xf0]  ;;  %v5558_v25 = vor.u32 %v6547_v48, %v5555_v52 }
 0x20e   :  { %v1010_v16 = vmul.f32 %v7235_v14, %v7216_v28  ;;  %v931_v17 = vpop.f32.mrf.mxu2  ;;  %v950_v21 = vadd.f32 %v949_v7, %v948_v0  ;;  %v981_v44 = vrot.slane %v980_v8, 1  ;;  %vm1016_vm11 = vweird.f32 %v7235_v14  ;;  %2729 = vmatpush.bf16.msra.mxu2 %v5590_v36  ;;  %v6539_v5 = vld [vmem:[#allocation13 + $0x644] sm:$0xf] }
 0x20f   :  { %v954_v33 = vadd.f32 %v953_v50, %v952_v9  ;;  %v985_v34 = vrot.slane %v984_v22, 2  ;;  %v5270_v0 = vor.u32 %v6475_v40, %v5267_v41  ;;  %vm1017_vm13 = vmor %vm1015_vm12, %vm1016_vm11  ;;  %v5238_v28 = vor.u32 %v6467_v59, %v5235_v1  ;;  %v5523_v6 = vld [vmem:[#allocation13 + $0x660] sm:$0xf0] }
 0x210   :  { %v1011_v23 = vmul.f32 %v7235_v14, %v1010_v16  ;;  %v7244_v31 = vmul.f32 %v950_v21, %v7159_v61  ;;  %v982_v32 = vadd.f32 %v981_v44, %v980_v8  ;;  %v1070_v8 = vperm.slane %v7256_v62, 0  ;;  %v6531_v16 = vld [vmem:[#allocation13 + $0x604] sm:$0xf] }
 0x211   :  { %v955_v39 = vrot.slane %v954_v33, 1  ;;  %v986_v47 = vadd.f32 %v985_v34, %v984_v22  ;;  %2718 = vmatpush.bf16.msra.mxu1 %v5270_v0  ;;  %v5491_v18 = vld [vmem:[#allocation13 + $0x620] sm:$0xf0]  ;;  %vm1025_vm15 = vweird.f32 %v7232_v49  ;;  %v1056_v44 = vperm.slane %v7241_v30, 1 }
 0x212   :  { %v1012_v35 = vmul.f32 0.5, %v1011_v23  ;;  %v991_v37 = vmul.f32 %v982_v32, %v7159_v61  ;;  %v995_v38 = vmul.f32 %v7244_v31, %v7244_v31  ;;  %2730 = vmatpush.bf16.msra.mxu2 %v5558_v25  ;;  %v1002_v50 = vsub.f32 %v7197_v15, %v7219_v29  ;;  %v4953_v23 = vld [vmem:[#allocation13 + $0x1c8] sm:$0xf] }
 0x213   :  { %v6752_v42 = vpop.eup %6751  ;;  %v956_v58 = vadd.f32 %v955_v39, %v954_v33  ;;  %v987_v63 = vrot.slane %v986_v47, 1  ;;  %v5494_v26 = vor.u32 %v6531_v16, %v5491_v18  ;;  %v1071_v34 = vperm.slane %v7256_v62, 1  ;;  %v6392_v39 = vld [vmem:[#allocation13 + $0x1a4] sm:$0xf0] }
 0x214   :  { %v1013_v43 = vsub.f32 1.5, %v1012_v35  ;;  %v1020_v56 = vmul.f32 %v6752_v42, %v7232_v49  ;;  %v999_v57 = vsub.f32 %v991_v37, %v995_v38  ;;  %vm1026_vm14 = vweird.f32 %v6752_v42  ;;  %v4921_v38 = vld [vmem:[#allocation13 + $0x188] sm:$0xf] }
 0x215   :  { %v7263_v55 = vmul.f32 %v956_v58, %v7159_v61  ;;  %v988_v4 = vadd.f32 %v987_v63, %v986_v47  ;;  %2719 = vmatpush.bf16.msra.mxu1 %v5238_v28  ;;  %vm1027_vm0 = vmor %vm1025_vm15, %vm1026_vm14  ;;  %v4954_v15 = vor.u32 %v6400_v24, %v4953_v23  ;;  %v4889_v47 = vld [vmem:[#allocation13 + $0x148] sm:$0xf]  ;;  %v1003_v1 = vsub.f32 %v7211_v10, %v7244_v31 }
 0x216   :  { %v1014_v60 = vmul.f32 %v7235_v14, %v1013_v43  ;;  %v1021_v2 = vmul.f32 %v6752_v42, %v1020_v56  ;;  %v7260_v53 = vadd.f32 0.8, %v999_v57  ;;  %v5209_v43 = vld [vmem:[#allocation13 + $0x3c8] sm:$0xf]  ;;  %v1057_v57 = vperm.slane %v7241_v30, 2 }
 0x217   :  { %v992_v45 = vmul.f32 %v988_v4, %v7159_v61  ;;  %v996_v11 = vmul.f32 %v7263_v55, %v7263_v55  ;;  %v6384_v56 = vld [vmem:[#allocation13 + $0x164] sm:$0xf0] }
 0x218   :  { %v1018_v3 = vsel %vm1017_vm13, %v7235_v14, %v1014_v60  ;;  %v1022_v9 = vmul.f32 0.5, %v1021_v2  ;;  %6753 = vrsqrt.f32 %v7260_v53  ;;  %v5526_v14 = vor.u32 %v6539_v5, %v5523_v6  ;;  %v6456_v4 = vld [vmem:[#allocation13 + $0x3a4] sm:$0xf0] }
 0x219   :  { %v1049_v7 = vmul.f32 %v1018_v3, %v1001_v54  ;;  %v1000_v17 = vsub.f32 %v992_v45, %v996_v11  ;;  %vm1035_vm4 = vweird.f32 %v7260_v53  ;;  %v4890_v25 = vor.u32 %v6384_v56, %v4889_v47  ;;  %v5177_v3 = vld [vmem:[#allocation13 + $0x388] sm:$0xf] }
 0x21a   :  { %v1023_v13 = vsub.f32 1.5, %v1022_v9  ;;  %2731 = vmatpush.bf16.msra.mxu2 %v5526_v14  ;;  %v4857_v5 = vld [vmem:[#allocation13 + $0x108] sm:$0xf] }
 0x21b   :  { %v1063_v12 = vmul.f32 %v1055_v46, %v1049_v7  ;;  %v7275_v22 = vadd.f32 0.8, %v1000_v17  ;;  %v6464_v46 = vld [vmem:[#allocation13 + $0x3e4] sm:$0xf0] }
 0x21c   :  { %v1024_v21 = vmul.f32 %v6752_v42, %v1023_v13  ;;  %v5210_v63 = vor.u32 %v6464_v46, %v5209_v43  ;;  %v6376_v6 = vld [vmem:[#allocation13 + $0x124] sm:$0xf0] }
 0x21d   :  { %v1078_v20 = vadd.f32 %v1070_v8, %v1063_v12  ;;  %6755 = vrsqrt.f32 %v7275_v22  ;;  %v1072_v8 = vperm.slane %v7256_v62, 2  ;;  %v4858_v10 = vor.u32 %v6376_v6, %v4857_v5  ;;  %v5145_v31 = vld [vmem:[#allocation13 + $0x348] sm:$0xf]  ;;  %v4955_v5 = vld [vmem:[#allocation13 + $0x1e8] sm:$0xf0] }
 0x21e   :  { %v6754_v19 = vpop.eup %6753  ;;  %v1028_v32 = vsel %vm1027_vm0, %v6752_v42, %v1024_v21  ;;  %2732 = vmatpush.bf16.msra.mxu2 %v5494_v26  ;;  %v4922_v42 = vor.u32 %v6392_v39, %v4921_v38  ;;  %v6448_v12 = vld [vmem:[#allocation13 + $0x364] sm:$0xf0]  ;;  %vm1045_vm7 = vweird.f32 %v7275_v22  ;;  %v1058_v21 = vperm.slane %v7241_v30, 3 }
 0x21f   :  { %vm1082_vm1 = vcmp.gt.f32.partialorder %v1078_v20, 0.0  ;;  %v1086_v27 = vmul.f32 0.2, %v1078_v20  ;;  %v1050_v33 = vmul.f32 %v1028_v32, %v1002_v50  ;;  %v1030_v49 = vmul.f32 %v6754_v19, %v7260_v53  ;;  %v4825_v13 = vld [vmem:[#allocation13 + $0xc8] sm:$0xf] }
 0x220   :  { %vm1036_vm3 = vweird.f32 %v6754_v19  ;;  %v5178_v53 = vor.u32 %v6456_v4, %v5177_v3  ;;  %v6368_v14 = vld [vmem:[#allocation13 + $0xe4] sm:$0xf0] }
 0x221   :  { %v1090_v35 = vsel %vm1082_vm1, %v1078_v20, %v1086_v27  ;;  %v1064_v36 = vmul.f32 %v1056_v44, %v1050_v33  ;;  %v1031_v37 = vmul.f32 %v6754_v19, %v1030_v49  ;;  %vm1037_vm5 = vmor %vm1035_vm4, %vm1036_vm3  ;;  %v5465_v18 = vld [vmem:[#allocation13 + $0x5c8] sm:$0xf]  ;;  %v1004_v20 = vsub.f32 %v7227_v51, %v7263_v55 }
 0x222   :  { %v7280_v29 = vpack.c.bf16 %v1090_v35, %v1090_v35  ;;  %v5146_v44 = vor.u32 %v6448_v12, %v5145_v31  ;;  %v6528_v50 = vld [vmem:[#allocation13 + $0x5e4] sm:$0xf0] }
 0x223   :  { %v1079_v40 = vadd.f32 %v1071_v34, %v1064_v36  ;;  %v1032_v41 = vmul.f32 0.5, %v1031_v37  ;;  %v6756_v48 = vpop.eup %6755  ;;  %v5113_v23 = vld [vmem:[#allocation13 + $0x308] sm:$0xf]  ;;  %v5466_v51 = vor.u32 %v6528_v50, %v5465_v18  ;;  %v6388_v18 = vld [vmem:[#allocation13 + $0x18c] sm:$0xf] }
 0x224   :  { %2642 = vmatmul.bf16.vlgmr.msra.gmra.mxu3 %v7280_v29  ;;  %v1040_v58 = vmul.f32 %v6756_v48, %v7275_v22  ;;  %vm1046_vm6 = vweird.f32 %v6756_v48  ;;  %v6440_v27 = vld [vmem:[#allocation13 + $0x324] sm:$0xf0]  ;;  %v1073_v22 = vperm.slane %v7256_v62, 3 }
 0x225   :  { %2738 = vmatpush.bf16.msra.mxu3 %v4954_v15  ;;  %vm1083_vm2 = vcmp.gt.f32.partialorder %v1079_v40, 0.0  ;;  %v1087_v52 = vmul.f32 0.2, %v1079_v40  ;;  %v1033_v54 = vsub.f32 1.5, %v1032_v41  ;;  %vm1047_vm8 = vmor %vm1045_vm7, %vm1046_vm6  ;;  %v4793_v33 = vld [vmem:[#allocation13 + $0x88] sm:$0xf]  ;;  %v5114_v35 = vor.u32 %v6440_v27, %v5113_v23 }
 0x226   :  { %v1041_v2 = vmul.f32 %v6756_v48, %v1040_v58  ;;  %v6360_v34 = vld [vmem:[#allocation13 + $0xa4] sm:$0xf0]  ;;  %v6460_v23 = vld [vmem:[#allocation13 + $0x3cc] sm:$0xf] }
 0x227   :  { %v1091_v59 = vsel %vm1083_vm2, %v1079_v40, %v1087_v52  ;;  %v1034_v60 = vmul.f32 %v6754_v19, %v1033_v54  ;;  %v5433_v15 = vld [vmem:[#allocation13 + $0x588] sm:$0xf]  ;;  %v4794_v37 = vor.u32 %v6360_v34, %v4793_v33 }
 0x228   :  { %v7286_v0 = vpack.c.bf16 %v1091_v59, %v1091_v59  ;;  %v1042_v9 = vmul.f32 0.5, %v1041_v2  ;;  %v6520_v36 = vld [vmem:[#allocation13 + $0x5a4] sm:$0xf0] }
 0x229   :  { %2739 = vmatpush.bf16.msra.mxu3 %v4922_v42  ;;  %v1038_v28 = vsel %vm1037_vm5, %v6754_v19, %v1034_v60  ;;  %v4826_v19 = vor.u32 %v6368_v14, %v4825_v13  ;;  %v5081_v38 = vld [vmem:[#allocation13 + $0x2c8] sm:$0xf]  ;;  %v5434_v42 = vor.u32 %v6520_v36, %v5433_v15  ;;  %v6452_v15 = vld [vmem:[#allocation13 + $0x38c] sm:$0xf] }
 0x22a   :  { %v1051_v7 = vmul.f32 %v1038_v28, %v1003_v1  ;;  %2655 = vmatmul.bf16.vlgmr.msrb.gmra.mxu0 %v7286_v0  ;;  %v1043_v11 = vsub.f32 1.5, %v1042_v9  ;;  %v6432_v39 = vld [vmem:[#allocation13 + $0x2e4] sm:$0xf0]  ;;  %v6396_v28 = vld [vmem:[#allocation13 + $0x1cc] sm:$0xf] }
 0x22b   :  { %2751 = vmatpush.bf16.msrb.mxu0 %v5210_v63  ;;  %v4761_v62 = vld [vmem:[#allocation13 + $0x48] sm:$0xf]  ;;  %v5082_v52 = vor.u32 %v6432_v39, %v5081_v38  ;;  %v5179_v36 = vld [vmem:[#allocation13 + $0x3a8] sm:$0xf0] }
 0x22c   :  { %v1065_v45 = vmul.f32 %v1057_v57, %v1051_v7  ;;  %v1044_v17 = vmul.f32 %v6756_v48, %v1043_v11  ;;  %v6352_v41 = vld [vmem:[#allocation13 + $0x64] sm:$0xf0] }
 0x22d   :  { %2740 = vmatpush.bf16.msra.mxu3 %v4890_v25  ;;  %v5721_v43 = vld [vmem:[#allocation13 + $0x7c8] sm:$0xf]  ;;  %v4762_v56 = vor.u32 %v6352_v41, %v4761_v62 }
 0x22e   :  { %v1080_v16 = vadd.f32 %v1072_v8, %v1065_v45  ;;  %v1048_v26 = vsel %vm1047_vm8, %v6756_v48, %v1044_v17  ;;  %v6592_v46 = vld [vmem:[#allocation13 + $0x7e4] sm:$0xf0] }
 0x22f   :  { %2752 = vmatpush.bf16.msrb.mxu0 %v5178_v53  ;;  %v1052_v32 = vmul.f32 %v1048_v26, %v1004_v20  ;;  %v5401_v47 = vld [vmem:[#allocation13 + $0x548] sm:$0xf]  ;;  %v5722_v60 = vor.u32 %v6592_v46, %v5721_v43  ;;  %v4923_v20 = vld [vmem:[#allocation13 + $0x1a8] sm:$0xf0]  ;;  %v5182_v46 = vor.u32 %v6452_v15, %v5179_v36 }
 0x230   :  { %vm1084_vm9 = vcmp.gt.f32.partialorder %v1080_v16, 0.0  ;;  %v1088_v24 = vmul.f32 0.2, %v1080_v16  ;;  %v6512_v54 = vld [vmem:[#allocation13 + $0x564] sm:$0xf0] }
 0x231   :  { %2741 = vmatpush.bf16.msra.mxu3 %v4858_v10  ;;  %v1066_v30 = vmul.f32 %v1058_v21, %v1052_v32  ;;  %v5049_v57 = vld [vmem:[#allocation13 + $0x288] sm:$0xf]  ;;  %v5402_v3 = vor.u32 %v6512_v54, %v5401_v47  ;;  %v4958_v10 = vor.u32 %v6396_v28, %v4955_v5  ;;  %v4859_v43 = vld [vmem:[#allocation13 + $0x128] sm:$0xf0] }
 0x232   :  { %v1092_v49 = vsel %vm1084_vm9, %v1080_v16, %v1088_v24  ;;  %v6424_v58 = vld [vmem:[#allocation13 + $0x2a4] sm:$0xf0]  ;;  %v5211_v24 = vld [vmem:[#allocation13 + $0x3e8] sm:$0xf0] }
 0x233   :  { %v7297_v55 = vpack.c.bf16 %v1092_v49, %v1092_v49  ;;  %2753 = vmatpush.bf16.msrb.mxu0 %v5146_v44  ;;  %v1081_v40 = vadd.f32 %v1073_v22, %v1066_v30  ;;  %v5689_v63 = vld [vmem:[#allocation13 + $0x788] sm:$0xf]  ;;  %v5050_v6 = vor.u32 %v6424_v58, %v5049_v57  ;;  %v6380_v49 = vld [vmem:[#allocation13 + $0x14c] sm:$0xf]  ;;  %v5214_v30 = vor.u32 %v6460_v23, %v5211_v24 }
 0x234   :  { %2694 = vmatmul.bf16.vlgmr.msrb.gmra.mxu3 %v7280_v29  ;;  %v4729_v1 = vld [vmem:[#allocation13 + $0x8] sm:$0xf]  ;;  %v6436_v5 = vld [vmem:[#allocation13 + $0x30c] sm:$0xf] }
 0x235   :  { %2742 = vmatpush.bf16.msra.mxu3 %v4826_v19  ;;  %2668 = vmatmul.bf16.vlgmr.msrb.gmra.mxu1 %v7297_v55  ;;  %vm1085_vm10 = vcmp.gt.f32.partialorder %v1081_v40, 0.0  ;;  %v1089_v48 = vmul.f32 0.2, %v1081_v40  ;;  %v6344_v2 = vld [vmem:[#allocation13 + $0x24] sm:$0xf0]  ;;  %v4926_v19 = vor.u32 %v6388_v18, %v4923_v20 }
 0x236   :  { %2764 = vmatpush.bf16.msrb.mxu1 %v5466_v51  ;;  %v6584_v4 = vld [vmem:[#allocation13 + $0x7a4] sm:$0xf0]  ;;  %v4730_v9 = vor.u32 %v6344_v2, %v4729_v1  ;;  %v4891_v51 = vld [vmem:[#allocation13 + $0x168] sm:$0xf0] }
 0x237   :  { %2754 = vmatpush.bf16.msrb.mxu0 %v5114_v35  ;;  %v1093_v59 = vsel %vm1085_vm10, %v1081_v40, %v1089_v48  ;;  %v5369_v7 = vld [vmem:[#allocation13 + $0x508] sm:$0xf]  ;;  %v5690_v11 = vor.u32 %v6584_v4, %v5689_v63  ;;  %v4894_v38 = vor.u32 %v6380_v49, %v4891_v51  ;;  %v6444_v48 = vld [vmem:[#allocation13 + $0x34c] sm:$0xf] }
 0x238   :  { %v7301_v25 = vpack.c.bf16 %v1093_v59, %v1093_v59  ;;  %v6504_v8 = vld [vmem:[#allocation13 + $0x524] sm:$0xf0]  ;;  %v6364_v63 = vld [vmem:[#allocation13 + $0xcc] sm:$0xf] }
 0x239   :  { %2743 = vmatpush.bf16.msra.mxu3 %v4794_v37  ;;  %v5017_v53 = vld [vmem:[#allocation13 + $0x248] sm:$0xf]  ;;  %v5370_v31 = vor.u32 %v6504_v8, %v5369_v7  ;;  %v4827_v1 = vld [vmem:[#allocation13 + $0xe8] sm:$0xf0] }
 0x23a   :  { %2765 = vmatpush.bf16.msrb.mxu1 %v5434_v42  ;;  %2707 = vmatmul.bf16.vlgmr.msra.gmra.mxu0 %v7286_v0  ;;  %v6416_v45 = vld [vmem:[#allocation13 + $0x264] sm:$0xf0]  ;;  %v6372_v42 = vld [vmem:[#allocation13 + $0x10c] sm:$0xf]  ;;  %v4830_v8 = vor.u32 %v6364_v63, %v4827_v1  ;;  %v6393_v63 = vld [vmem:[#allocation13 + $0x1ac] sm:$0xf0] }
 0x23b   :  { %2755 = vmatpush.bf16.msrb.mxu0 %v5082_v52  ;;  %2681 = vmatmul.bf16.vlgmr.msrb.gmra.mxu2 %v7301_v25  ;;  %v5657_v12 = vld [vmem:[#allocation13 + $0x748] sm:$0xf]  ;;  %v5018_v16 = vor.u32 %v6416_v45, %v5017_v53  ;;  %v5147_v52 = vld [vmem:[#allocation13 + $0x368] sm:$0xf0] }
 0x23c   :  { %2777 = vmatpush.bf16.msrb.mxu2 %v5722_v60  ;;  %v6576_v13 = vld [vmem:[#allocation13 + $0x764] sm:$0xf0]  ;;  %v5150_v2 = vor.u32 %v6444_v48, %v5147_v52  ;;  %v5467_v4 = vld [vmem:[#allocation13 + $0x5e8] sm:$0xf0] }
 0x23d   :  { %2744 = vmatpush.bf16.msra.mxu3 %v4762_v56  ;;  %v5337_v14 = vld [vmem:[#allocation13 + $0x4c8] sm:$0xf]  ;;  %v5658_v50 = vor.u32 %v6576_v13, %v5657_v12  ;;  %v4862_v56 = vor.u32 %v6372_v42, %v4859_v43  ;;  %v6516_v12 = vld [vmem:[#allocation13 + $0x58c] sm:$0xf] }
 0x23e   :  { %2766 = vmatpush.bf16.msrb.mxu1 %v5402_v3  ;;  %v6496_v17 = vld [vmem:[#allocation13 + $0x4e4] sm:$0xf0]  ;;  %v6524_v3 = vld [vmem:[#allocation13 + $0x5cc] sm:$0xf] }
 0x23f   :  { %2756 = vmatpush.bf16.msrb.mxu0 %v5050_v6  ;;  %v4985_v21 = vld [vmem:[#allocation13 + $0x208] sm:$0xf]  ;;  %v5338_v26 = vor.u32 %v6496_v17, %v5337_v14  ;;  %v5115_v6 = vld [vmem:[#allocation13 + $0x328] sm:$0xf0]  ;;  %v5470_v45 = vor.u32 %v6524_v3, %v5467_v4  ;;  %v5217_v4 = vld [vmem:[#allocation13 + $0x3d0] sm:$0xf] }
 0x240   :  { %v6408_v44 = vld [vmem:[#allocation13 + $0x224] sm:$0xf0]  ;;  %2778 = vmatpush.bf16.msrb.mxu2 %v5690_v11  ;;  %v6356_v11 = vld [vmem:[#allocation13 + $0x8c] sm:$0xf] }
 0x241   :  { %2745 = vmatpush.bf16.msra.mxu3 %v4730_v9  ;;  %v5625_v27 = vld [vmem:[#allocation13 + $0x708] sm:$0xf]  ;;  %v4986_v33 = vor.u32 %v6408_v44, %v4985_v21  ;;  %v5435_v13 = vld [vmem:[#allocation13 + $0x5a8] sm:$0xf0] }
 0x242   :  { %2767 = vmatpush.bf16.msrb.mxu1 %v5370_v31  ;;  %v6568_v32 = vld [vmem:[#allocation13 + $0x724] sm:$0xf0]  ;;  %v5118_v31 = vor.u32 %v6436_v5, %v5115_v6  ;;  %v5083_v17 = vld [vmem:[#allocation13 + $0x2e8] sm:$0xf0] }
 0x243   :  { %v5305_v22 = vld [vmem:[#allocation13 + $0x488] sm:$0xf]  ;;  %2757 = vmatpush.bf16.msrb.mxu0 %v5018_v16  ;;  %v5626_v35 = vor.u32 %v6568_v32, %v5625_v27  ;;  %v6428_v16 = vld [vmem:[#allocation13 + $0x2cc] sm:$0xf] }
 0x244   :  { %2746 = vmatmul.bf16.vlgmr.msra.gmra.mxu3 %v7280_v29  ;;  %v6488_v34 = vld [vmem:[#allocation13 + $0x4a4] sm:$0xf0]  ;;  %2779 = vmatpush.bf16.msrb.mxu2 %v5658_v50  ;;  %v6588_v44 = vld [vmem:[#allocation13 + $0x7cc] sm:$0xf]  ;;  %v5438_v50 = vor.u32 %v6516_v12, %v5435_v13  ;;  %v5185_v13 = vld [vmem:[#allocation13 + $0x390] sm:$0xf] }
 0x245   :  { %2790 = vmatpush.bf16.msrb.mxu3 %v4958_v10  ;;  %2720 = vmatmul.bf16.vlgmr.msra.gmra.mxu1 %v7297_v55  ;;  %v5306_v37 = vor.u32 %v6488_v34, %v5305_v22  ;;  %v5593_v39 = vld [vmem:[#allocation13 + $0x6c8] sm:$0xf]  ;;  %v4795_v10 = vld [vmem:[#allocation13 + $0xa8] sm:$0xf0] }
 0x246   :  { %2768 = vmatpush.bf16.msrb.mxu1 %v5338_v26  ;;  %v6560_v40 = vld [vmem:[#allocation13 + $0x6e4] sm:$0xf0]  ;;  %v4798_v18 = vor.u32 %v6356_v11, %v4795_v10  ;;  %v5723_v23 = vld [vmem:[#allocation13 + $0x7e8] sm:$0xf0]  ;;  %v4897_v10 = vld [vmem:[#allocation13 + $0x150] sm:$0xf] }
 0x247   :  { %v5273_v62 = vld [vmem:[#allocation13 + $0x448] sm:$0xf]  ;;  %2758 = vmatpush.bf16.msrb.mxu0 %v4986_v33  ;;  %v5594_v47 = vor.u32 %v6560_v40, %v5593_v39  ;;  %v6348_v24 = vld [vmem:[#allocation13 + $0x4c] sm:$0xf]  ;;  %v5726_v49 = vor.u32 %v6588_v44, %v5723_v23  ;;  %v4865_v23 = vld [vmem:[#allocation13 + $0x110] sm:$0xf] }
 0x248   :  { %v6480_v41 = vld [vmem:[#allocation13 + $0x464] sm:$0xf0]  ;;  %2780 = vmatpush.bf16.msrb.mxu2 %v5626_v35  ;;  %v4763_v26 = vld [vmem:[#allocation13 + $0x68] sm:$0xf0] }
 0x249   :  { %2791 = vmatpush.bf16.msrb.mxu3 %v4926_v19  ;;  %v5274_v54 = vor.u32 %v6480_v41, %v5273_v62  ;;  %v5561_v57 = vld [vmem:[#allocation13 + $0x688] sm:$0xf]  ;;  %v5086_v19 = vor.u32 %v6428_v16, %v5083_v17  ;;  %v6508_v27 = vld [vmem:[#allocation13 + $0x54c] sm:$0xf]  ;;  %v4766_v51 = vor.u32 %v6348_v24, %v4763_v26  ;;  %v4961_v62 = vld [vmem:[#allocation13 + $0x1d0] sm:$0xf] }
 0x24a   :  { %2769 = vmatpush.bf16.msrb.mxu1 %v5306_v37  ;;  %v6552_v58 = vld [vmem:[#allocation13 + $0x6a4] sm:$0xf0]  ;;  %2759 = vmatmul.bf16.vlgmr.msrb.gmra.mxu0 %v7286_v0  ;;  %v5403_v32 = vld [vmem:[#allocation13 + $0x568] sm:$0xf0]  ;;  %v6401_v41 = vld [vmem:[#allocation13 + $0x1ec] sm:$0xf0] }
 0x24b   :  { %2803 = vmatpush.bf16.msra.mxu0 %v5214_v30  ;;  %v5241_v59 = vld [vmem:[#allocation13 + $0x408] sm:$0xf]  ;;  %2733 = vmatmul.bf16.vlgmr.msra.gmra.mxu2 %v7301_v25  ;;  %v5562_v28 = vor.u32 %v6552_v58, %v5561_v57  ;;  %v6420_v33 = vld [vmem:[#allocation13 + $0x28c] sm:$0xf]  ;;  %v5406_v15 = vor.u32 %v6508_v27, %v5403_v32  ;;  %v4962_v52 = vor.u32 %v6401_v41, %v4961_v62  ;;  %v6377_v24 = vld [vmem:[#allocation13 + $0x12c] sm:$0xf0] }
 0x24c   :  { %v6472_v60 = vld [vmem:[#allocation13 + $0x424] sm:$0xf0]  ;;  %2781 = vmatpush.bf16.msrb.mxu2 %v5594_v47  ;;  %v5051_v34 = vld [vmem:[#allocation13 + $0x2a8] sm:$0xf0]  ;;  %v6449_v27 = vld [vmem:[#allocation13 + $0x36c] sm:$0xf0] }
 0x24d   :  { %2792 = vmatpush.bf16.msrb.mxu3 %v4894_v38  ;;  %v5242_v7 = vor.u32 %v6472_v60, %v5241_v59  ;;  %v5529_v9 = vld [vmem:[#allocation13 + $0x648] sm:$0xf]  ;;  %v6580_v30 = vld [vmem:[#allocation13 + $0x78c] sm:$0xf]  ;;  %v5054_v39 = vor.u32 %v6420_v33, %v5051_v34  ;;  %v4929_v60 = vld [vmem:[#allocation13 + $0x190] sm:$0xf]  ;;  %v4866_v34 = vor.u32 %v6377_v24, %v4865_v23 }
 0x24e   :  { %2770 = vmatpush.bf16.msrb.mxu1 %v5274_v54  ;;  %v6544_v53 = vld [vmem:[#allocation13 + $0x664] sm:$0xf0]  ;;  %v5691_v35 = vld [vmem:[#allocation13 + $0x7a8] sm:$0xf0]  ;;  %v4930_v6 = vor.u32 %v6393_v63, %v4929_v60  ;;  %v6417_v23 = vld [vmem:[#allocation13 + $0x26c] sm:$0xf0] }
 0x24f   :  { %2804 = vmatpush.bf16.msra.mxu0 %v5182_v46  ;;  %v5530_v14 = vor.u32 %v6544_v53, %v5529_v9  ;;  %v5497_v20 = vld [vmem:[#allocation13 + $0x608] sm:$0xf]  ;;  %v6340_v36 = vld [vmem:[#allocation13 + $0xc] sm:$0xf]  ;;  %v5694_v46 = vor.u32 %v6580_v30, %v5691_v35  ;;  %v4833_v30 = vld [vmem:[#allocation13 + $0xd0] sm:$0xf] }
 0x250   :  { %2782 = vmatpush.bf16.msrb.mxu2 %v5562_v28  ;;  %v6536_v21 = vld [vmem:[#allocation13 + $0x624] sm:$0xf0]  ;;  %v4731_v37 = vld [vmem:[#allocation13 + $0x28] sm:$0xf0]  ;;  %v6465_v28 = vld [vmem:[#allocation13 + $0x3ec] sm:$0xf0] }
 0x251   :  { %2793 = vmatpush.bf16.msrb.mxu3 %v4862_v56  ;;  %v5498_v22 = vor.u32 %v6536_v21, %v5497_v20  ;;  %v6500_v38 = vld [vmem:[#allocation13 + $0x50c] sm:$0xf]  ;;  %v4734_v47 = vor.u32 %v6340_v36, %v4731_v37  ;;  %v5218_v11 = vor.u32 %v6465_v28, %v5217_v4  ;;  %v5473_v36 = vld [vmem:[#allocation13 + $0x5d0] sm:$0xf] }
 0x252   :  { %2771 = vmatpush.bf16.msrb.mxu1 %v5242_v7  ;;  %v5371_v40 = vld [vmem:[#allocation13 + $0x528] sm:$0xf0]  ;;  %v6529_v37 = vld [vmem:[#allocation13 + $0x5ec] sm:$0xf0] }
 0x253   :  { %2805 = vmatpush.bf16.msra.mxu0 %v5150_v2  ;;  %v6412_v42 = vld [vmem:[#allocation13 + $0x24c] sm:$0xf]  ;;  %v5374_v48 = vor.u32 %v6500_v38, %v5371_v40  ;;  %v6441_v40 = vld [vmem:[#allocation13 + $0x32c] sm:$0xf0] }
 0x254   :  { %2783 = vmatpush.bf16.msrb.mxu2 %v5530_v14  ;;  %v5019_v43 = vld [vmem:[#allocation13 + $0x268] sm:$0xf0]  ;;  %v6457_v14 = vld [vmem:[#allocation13 + $0x3ac] sm:$0xf0] }
 0x255   :  { %2794 = vmatpush.bf16.msrb.mxu3 %v4830_v8  ;;  %2772 = vmatmul.bf16.vlgmr.msrb.gmra.mxu1 %v7297_v55  ;;  %v6572_v54 = vld [vmem:[#allocation13 + $0x74c] sm:$0xf]  ;;  %v5022_v58 = vor.u32 %v6412_v42, %v5019_v43  ;;  %v6593_v4 = vld [vmem:[#allocation13 + $0x7ec] sm:$0xf0] }
 0x256   :  { %2816 = vmatpush.bf16.msra.mxu1 %v5470_v45  ;;  %v5659_v56 = vld [vmem:[#allocation13 + $0x768] sm:$0xf0]  ;;  %v4769_v28 = vld [vmem:[#allocation13 + $0x50] sm:$0xf] }
 0x257   :  { %2806 = vmatpush.bf16.msra.mxu0 %v5118_v31  ;;  %v6492_v57 = vld [vmem:[#allocation13 + $0x4cc] sm:$0xf]  ;;  %v5662_v3 = vor.u32 %v6572_v54, %v5659_v56  ;;  %v6385_v31 = vld [vmem:[#allocation13 + $0x16c] sm:$0xf0] }
 0x258   :  { %2784 = vmatpush.bf16.msrb.mxu2 %v5498_v22  ;;  %v5339_v59 = vld [vmem:[#allocation13 + $0x4e8] sm:$0xf0]  ;;  %v4898_v20 = vor.u32 %v6385_v31, %v4897_v10  ;;  %v5441_v54 = vld [vmem:[#allocation13 + $0x590] sm:$0xf] }
 0x259   :  { %2795 = vmatpush.bf16.msrb.mxu3 %v4798_v18  ;;  %v6404_v1 = vld [vmem:[#allocation13 + $0x20c] sm:$0xf]  ;;  %v5342_v5 = vor.u32 %v6492_v57, %v5339_v59  ;;  %v6521_v56 = vld [vmem:[#allocation13 + $0x5ac] sm:$0xf0] }
 0x25a   :  { %2817 = vmatpush.bf16.msra.mxu1 %v5438_v50  ;;  %v4987_v2 = vld [vmem:[#allocation13 + $0x228] sm:$0xf0]  ;;  %v5186_v50 = vor.u32 %v6457_v14, %v5185_v13  ;;  %v6433_v59 = vld [vmem:[#allocation13 + $0x2ec] sm:$0xf0] }
 0x25b   :  { %2807 = vmatpush.bf16.msra.mxu0 %v5086_v19  ;;  %2785 = vmatmul.bf16.vlgmr.msrb.gmra.mxu2 %v7301_v25  ;;  %v6564_v7 = vld [vmem:[#allocation13 + $0x70c] sm:$0xf]  ;;  %v4990_v9 = vor.u32 %v6404_v1, %v4987_v2  ;;  %v5153_v19 = vld [vmem:[#allocation13 + $0x350] sm:$0xf]  ;;  %v5442_v2 = vor.u32 %v6521_v56, %v5441_v54  ;;  %v6453_v56 = vld [vmem:[#allocation13 + $0x394] sm:$0xf] }
 0x25c   :  { %2829 = vmatpush.bf16.msra.mxu2 %v5726_v49  ;;  %v5627_v8 = vld [vmem:[#allocation13 + $0x728] sm:$0xf0]  ;;  %v5154_v35 = vor.u32 %v6449_v27, %v5153_v19  ;;  %v5697_v10 = vld [vmem:[#allocation13 + $0x790] sm:$0xf] }
 0x25d   :  { %2796 = vmatpush.bf16.msrb.mxu3 %v4766_v51  ;;  %v6484_v53 = vld [vmem:[#allocation13 + $0x48c] sm:$0xf]  ;;  %v5630_v12 = vor.u32 %v6564_v7, %v5627_v8  ;;  %v5409_v7 = vld [vmem:[#allocation13 + $0x550] sm:$0xf] }
 0x25e   :  { %2818 = vmatpush.bf16.msra.mxu1 %v5406_v15  ;;  %v5307_v45 = vld [vmem:[#allocation13 + $0x4a8] sm:$0xf0]  ;;  %v6369_v15 = vld [vmem:[#allocation13 + $0xec] sm:$0xf0] }
 0x25f   :  { %2808 = vmatpush.bf16.msra.mxu0 %v5054_v39  ;;  %v5310_v16 = vor.u32 %v6484_v53, %v5307_v45  ;;  %v6556_v17 = vld [vmem:[#allocation13 + $0x6cc] sm:$0xf]  ;;  %v5121_v39 = vld [vmem:[#allocation13 + $0x310] sm:$0xf]  ;;  %v4834_v43 = vor.u32 %v6369_v15, %v4833_v30  ;;  %v4931_v30 = vld [vmem:[#allocation13 + $0x1b0] sm:$0xf0] }
 0x260   :  { %2830 = vmatpush.bf16.msra.mxu2 %v5694_v46  ;;  %v5595_v18 = vld [vmem:[#allocation13 + $0x6e8] sm:$0xf0]  ;;  %v5474_v46 = vor.u32 %v6529_v37, %v5473_v36  ;;  %v6513_v8 = vld [vmem:[#allocation13 + $0x56c] sm:$0xf0]  ;;  %v6461_v37 = vld [vmem:[#allocation13 + $0x3d4] sm:$0xf] }
 0x261   :  { %2797 = vmatpush.bf16.msrb.mxu3 %v4734_v47  ;;  %v6476_v21 = vld [vmem:[#allocation13 + $0x44c] sm:$0xf]  ;;  %v5598_v26 = vor.u32 %v6556_v17, %v5595_v18  ;;  %v4801_v47 = vld [vmem:[#allocation13 + $0x90] sm:$0xf] }
 0x262   :  { %2819 = vmatpush.bf16.msra.mxu1 %v5374_v48  ;;  %v5275_v44 = vld [vmem:[#allocation13 + $0x468] sm:$0xf0]  ;;  %v5122_v48 = vor.u32 %v6441_v40, %v5121_v39  ;;  %v5057_v53 = vld [vmem:[#allocation13 + $0x290] sm:$0xf] }
 0x263   :  { %2809 = vmatpush.bf16.msra.mxu0 %v5022_v58  ;;  %v5278_v32 = vor.u32 %v6476_v21, %v5275_v44  ;;  %v6548_v22 = vld [vmem:[#allocation13 + $0x68c] sm:$0xf]  ;;  %v5089_v58 = vld [vmem:[#allocation13 + $0x2d0] sm:$0xf]  ;;  %v6397_v21 = vld [vmem:[#allocation13 + $0x1d4] sm:$0xf] }
 0x264   :  { %2798 = vmatmul.bf16.vlgmr.msrb.gmra.mxu3 %v7280_v29  ;;  %2831 = vmatpush.bf16.msra.mxu2 %v5662_v3  ;;  %v5563_v33 = vld [vmem:[#allocation13 + $0x6a8] sm:$0xf0]  ;;  %v5729_v3 = vld [vmem:[#allocation13 + $0x7d0] sm:$0xf]  ;;  %v4963_v44 = vld [vmem:[#allocation13 + $0x1f0] sm:$0xf0] }
 0x265   :  { %2842 = vmatpush.bf16.msra.mxu3 %v4962_v52  ;;  %v6468_v49 = vld [vmem:[#allocation13 + $0x40c] sm:$0xf]  ;;  %v5566_v38 = vor.u32 %v6548_v22, %v5563_v33  ;;  %v6361_v52 = vld [vmem:[#allocation13 + $0xac] sm:$0xf0]  ;;  %v4966_v22 = vor.u32 %v6397_v21, %v4963_v44 }
 0x266   :  { %2820 = vmatpush.bf16.msra.mxu1 %v5342_v5  ;;  %v5243_v51 = vld [vmem:[#allocation13 + $0x428] sm:$0xf0]  ;;  %v4802_v1 = vor.u32 %v6361_v52, %v4801_v47  ;;  %v5090_v5 = vor.u32 %v6433_v59, %v5089_v58  ;;  %v6425_v45 = vld [vmem:[#allocation13 + $0x2ac] sm:$0xf0]  ;;  %v4899_v52 = vld [vmem:[#allocation13 + $0x170] sm:$0xf0] }
 0x267   :  { %2810 = vmatpush.bf16.msra.mxu0 %v4990_v9  ;;  %v5246_v62 = vor.u32 %v6468_v49, %v5243_v51  ;;  %v6540_v41 = vld [vmem:[#allocation13 + $0x64c] sm:$0xf]  ;;  %v6585_v13 = vld [vmem:[#allocation13 + $0x7ac] sm:$0xf0]  ;;  %v5058_v17 = vor.u32 %v6425_v45, %v5057_v53  ;;  %v6389_v51 = vld [vmem:[#allocation13 + $0x194] sm:$0xf] }
 0x268   :  { %2832 = vmatpush.bf16.msra.mxu2 %v5630_v12  ;;  %v5531_v42 = vld [vmem:[#allocation13 + $0x668] sm:$0xf0]  ;;  %v5410_v12 = vor.u32 %v6513_v8, %v5409_v7  ;;  %v4737_v14 = vld [vmem:[#allocation13 + $0x10] sm:$0xf]  ;;  %v5698_v24 = vor.u32 %v6585_v13, %v5697_v10  ;;  %v5155_v7 = vld [vmem:[#allocation13 + $0x370] sm:$0xf0] }
 0x269   :  { %2843 = vmatpush.bf16.msra.mxu3 %v4930_v6  ;;  %v5534_v57 = vor.u32 %v6540_v41, %v5531_v42  ;;  %v6532_v60 = vld [vmem:[#allocation13 + $0x60c] sm:$0xf]  ;;  %v6353_v6 = vld [vmem:[#allocation13 + $0x6c] sm:$0xf0]  ;;  %v4934_v41 = vor.u32 %v6389_v51, %v4931_v30  ;;  %v4835_v13 = vld [vmem:[#allocation13 + $0xf0] sm:$0xf0] }
 0x26a   :  { %2821 = vmatpush.bf16.msra.mxu1 %v5310_v16  ;;  %2811 = vmatmul.bf16.vlgmr.msra.gmra.mxu0 %v7286_v0  ;;  %v5499_v63 = vld [vmem:[#allocation13 + $0x628] sm:$0xf0]  ;;  %v4770_v31 = vor.u32 %v6353_v6, %v4769_v28  ;;  %v6345_v16 = vld [vmem:[#allocation13 + $0x2c] sm:$0xf0]  ;;  %v4867_v28 = vld [vmem:[#allocation13 + $0x130] sm:$0xf0] }
 0x26b   :  { %2855 = vmatpush.bf16.msrb.mxu0 %v5218_v11  ;;  %v5502_v9 = vor.u32 %v6532_v60, %v5499_v63  ;;  %v5730_v11 = vor.u32 %v6593_v4, %v5729_v3  ;;  %v5377_v18 = vld [vmem:[#allocation13 + $0x510] sm:$0xf]  ;;  %v6373_v4 = vld [vmem:[#allocation13 + $0x114] sm:$0xf] }
 0x26c   :  { %2833 = vmatpush.bf16.msra.mxu2 %v5598_v26  ;;  %v4738_v26 = vor.u32 %v6345_v16, %v4737_v14  ;;  %v5665_v27 = vld [vmem:[#allocation13 + $0x750] sm:$0xf]  ;;  %v6445_v6 = vld [vmem:[#allocation13 + $0x354] sm:$0xf]  ;;  %v4870_v45 = vor.u32 %v6373_v4, %v4867_v28 }
 0x26d   :  { %2844 = vmatpush.bf16.msra.mxu3 %v4898_v20  ;;  %v6505_v20 = vld [vmem:[#allocation13 + $0x52c] sm:$0xf0]  ;;  %v6525_v14 = vld [vmem:[#allocation13 + $0x5d4] sm:$0xf] }
 0x26e   :  { %2822 = vmatpush.bf16.msra.mxu1 %v5278_v32  ;;  %v5378_v19 = vor.u32 %v6505_v20, %v5377_v18  ;;  %v6577_v32 = vld [vmem:[#allocation13 + $0x76c] sm:$0xf0]  ;;  %v5475_v16 = vld [vmem:[#allocation13 + $0x5f0] sm:$0xf0] }
 0x26f   :  { %2856 = vmatpush.bf16.msrb.mxu0 %v5186_v50  ;;  %v5025_v50 = vld [vmem:[#allocation13 + $0x250] sm:$0xf]  ;;  %v5666_v36 = vor.u32 %v6577_v32, %v5665_v27  ;;  %v6437_v18 = vld [vmem:[#allocation13 + $0x314] sm:$0xf] }
 0x270   :  { %2834 = vmatpush.bf16.msra.mxu2 %v5566_v38  ;;  %v5026_v33 = vor.u32 %v6417_v23, %v5025_v50  ;;  %v6497_v49 = vld [vmem:[#allocation13 + $0x4ec] sm:$0xf0]  ;;  %v5219_v38 = vld [vmem:[#allocation13 + $0x3f0] sm:$0xf0] }
 0x271   :  { %2845 = vmatpush.bf16.msra.mxu3 %v4866_v34  ;;  %v5345_v34 = vld [vmem:[#allocation13 + $0x4d0] sm:$0xf]  ;;  %v5222_v47 = vor.u32 %v6461_v37, %v5219_v38  ;;  %v5123_v20 = vld [vmem:[#allocation13 + $0x330] sm:$0xf0] }
 0x272   :  { %2823 = vmatpush.bf16.msra.mxu1 %v5246_v62  ;;  %v6409_v15 = vld [vmem:[#allocation13 + $0x22c] sm:$0xf0]  ;;  %v5346_v39 = vor.u32 %v6497_v49, %v5345_v34  ;;  %v4803_v27 = vld [vmem:[#allocation13 + $0xb0] sm:$0xf0] }
 0x273   :  { %2857 = vmatpush.bf16.msrb.mxu0 %v5154_v35  ;;  %v4993_v35 = vld [vmem:[#allocation13 + $0x210] sm:$0xf]  ;;  %v6517_v32 = vld [vmem:[#allocation13 + $0x594] sm:$0xf] }
 0x274   :  { %2835 = vmatpush.bf16.msra.mxu2 %v5534_v57  ;;  %v5633_v40 = vld [vmem:[#allocation13 + $0x710] sm:$0xf]  ;;  %v4994_v42 = vor.u32 %v6409_v15, %v4993_v35  ;;  %v5187_v57 = vld [vmem:[#allocation13 + $0x3b0] sm:$0xf0] }
 0x275   :  { %2846 = vmatpush.bf16.msra.mxu3 %v4834_v43  ;;  %2824 = vmatmul.bf16.vlgmr.msra.gmra.mxu1 %v7297_v55  ;;  %v6569_v62 = vld [vmem:[#allocation13 + $0x72c] sm:$0xf0]  ;;  %v5190_v3 = vor.u32 %v6453_v56, %v5187_v57  ;;  %v6429_v34 = vld [vmem:[#allocation13 + $0x2d4] sm:$0xf] }
 0x276   :  { %2868 = vmatpush.bf16.msrb.mxu1 %v5474_v46  ;;  %v5313_v43 = vld [vmem:[#allocation13 + $0x490] sm:$0xf]  ;;  %v5634_v54 = vor.u32 %v6569_v62, %v5633_v40  ;;  %v5091_v49 = vld [vmem:[#allocation13 + $0x2f0] sm:$0xf0] }
 0x277   :  { %2858 = vmatpush.bf16.msrb.mxu0 %v5122_v48  ;;  %v6489_v46 = vld [vmem:[#allocation13 + $0x4ac] sm:$0xf0]  ;;  %v6381_v48 = vld [vmem:[#allocation13 + $0x154] sm:$0xf] }
 0x278   :  { %2836 = vmatpush.bf16.msra.mxu2 %v5502_v9  ;;  %v5314_v58 = vor.u32 %v6489_v46, %v5313_v43  ;;  %v5601_v59 = vld [vmem:[#allocation13 + $0x6d0] sm:$0xf]  ;;  %v4902_v63 = vor.u32 %v6381_v48, %v4899_v52  ;;  %v5731_v37 = vld [vmem:[#allocation13 + $0x7f0] sm:$0xf0] }
 0x279   :  { %2847 = vmatpush.bf16.msra.mxu3 %v4802_v1  ;;  %v6561_v60 = vld [vmem:[#allocation13 + $0x6ec] sm:$0xf0]  ;;  %v6349_v38 = vld [vmem:[#allocation13 + $0x54] sm:$0xf] }
 0x27a   :  { %2869 = vmatpush.bf16.msrb.mxu1 %v5442_v2  ;;  %v5281_v1 = vld [vmem:[#allocation13 + $0x450] sm:$0xf]  ;;  %v4771_v40 = vld [vmem:[#allocation13 + $0x70] sm:$0xf0] }
 0x27b   :  { %2859 = vmatpush.bf16.msrb.mxu0 %v5090_v5  ;;  %2837 = vmatmul.bf16.vlgmr.msra.gmra.mxu2 %v7301_v25  ;;  %v6481_v2 = vld [vmem:[#allocation13 + $0x46c] sm:$0xf0]  ;;  %v5602_v5 = vor.u32 %v6561_v60, %v5601_v59  ;;  %v6509_v62 = vld [vmem:[#allocation13 + $0x554] sm:$0xf]  ;;  %v4774_v52 = vor.u32 %v6349_v38, %v4771_v40  ;;  %v6378_v38 = vld [vmem:[#allocation13 + $0x134] sm:$0xf0] }
 0x27c   :  { %2881 = vmatpush.bf16.msrb.mxu2 %v5730_v11  ;;  %v5282_v8 = vor.u32 %v6481_v2, %v5281_v1  ;;  %v5569_v9 = vld [vmem:[#allocation13 + $0x690] sm:$0xf]  ;;  %v6421_v43 = vld [vmem:[#allocation13 + $0x294] sm:$0xf]  ;;  %v4969_v1 = vld [vmem:[#allocation13 + $0x1d8] sm:$0xf] }
 0x27d   :  { %2848 = vmatpush.bf16.msra.mxu3 %v4770_v31  ;;  %v6553_v53 = vld [vmem:[#allocation13 + $0x6ac] sm:$0xf0]  ;;  %v6365_v31 = vld [vmem:[#allocation13 + $0xd4] sm:$0xf]  ;;  %v6402_v2 = vld [vmem:[#allocation13 + $0x1f4] sm:$0xf0] }
 0x27e   :  { %2870 = vmatpush.bf16.msrb.mxu1 %v5410_v12  ;;  %v5249_v11 = vld [vmem:[#allocation13 + $0x410] sm:$0xf]  ;;  %v5158_v12 = vor.u32 %v6445_v6, %v5155_v7  ;;  %v4838_v23 = vor.u32 %v6365_v31, %v4835_v13  ;;  %v5059_v46 = vld [vmem:[#allocation13 + $0x2b0] sm:$0xf0]  ;;  %v6394_v31 = vld [vmem:[#allocation13 + $0x1b4] sm:$0xf0] }
 0x27f   :  { %2860 = vmatpush.bf16.msrb.mxu0 %v5058_v17  ;;  %v6473_v10 = vld [vmem:[#allocation13 + $0x42c] sm:$0xf0]  ;;  %v5570_v17 = vor.u32 %v6553_v53, %v5569_v9  ;;  %v6581_v48 = vld [vmem:[#allocation13 + $0x794] sm:$0xf]  ;;  %v5062_v59 = vor.u32 %v6421_v43, %v5059_v46  ;;  %v4970_v9 = vor.u32 %v6402_v2, %v4969_v1  ;;  %v5161_v40 = vld [vmem:[#allocation13 + $0x358] sm:$0xf] }
 0x280   :  { %2882 = vmatpush.bf16.msrb.mxu2 %v5698_v24  ;;  %v5250_v21 = vor.u32 %v6473_v10, %v5249_v11  ;;  %v5537_v44 = vld [vmem:[#allocation13 + $0x650] sm:$0xf]  ;;  %v5478_v24 = vor.u32 %v6525_v14, %v5475_v16  ;;  %v5699_v56 = vld [vmem:[#allocation13 + $0x7b0] sm:$0xf0]  ;;  %v4937_v10 = vld [vmem:[#allocation13 + $0x198] sm:$0xf] }
 0x281   :  { %2849 = vmatpush.bf16.msra.mxu3 %v4738_v26  ;;  %v6545_v50 = vld [vmem:[#allocation13 + $0x66c] sm:$0xf0]  ;;  %v6357_v26 = vld [vmem:[#allocation13 + $0x94] sm:$0xf]  ;;  %v5702_v28 = vor.u32 %v6581_v48, %v5699_v56  ;;  %v5225_v16 = vld [vmem:[#allocation13 + $0x3d8] sm:$0xf] }
 0x282   :  { %2871 = vmatpush.bf16.msrb.mxu1 %v5378_v19  ;;  %v5126_v19 = vor.u32 %v6437_v18, %v5123_v20  ;;  %v5505_v51 = vld [vmem:[#allocation13 + $0x610] sm:$0xf]  ;;  %v4806_v35 = vor.u32 %v6357_v26, %v4803_v27  ;;  %v6341_v57 = vld [vmem:[#allocation13 + $0x14] sm:$0xf]  ;;  %v6386_v27 = vld [vmem:[#allocation13 + $0x174] sm:$0xf0] }
 0x283   :  { %2861 = vmatpush.bf16.msrb.mxu0 %v5026_v33  ;;  %v5538_v33 = vor.u32 %v6545_v50, %v5537_v44  ;;  %v6537_v30 = vld [vmem:[#allocation13 + $0x62c] sm:$0xf0]  ;;  %v6501_v60 = vld [vmem:[#allocation13 + $0x514] sm:$0xf]  ;;  %v4938_v44 = vor.u32 %v6394_v31, %v4937_v10  ;;  %v6370_v56 = vld [vmem:[#allocation13 + $0xf4] sm:$0xf0] }
 0x284   :  { %2883 = vmatpush.bf16.msrb.mxu2 %v5666_v36  ;;  %2850 = vmatmul.bf16.vlgmr.msra.gmra.mxu3 %v7280_v29  ;;  %v6589_v36 = vld [vmem:[#allocation13 + $0x7d4] sm:$0xf]  ;;  %v5097_v10 = vld [vmem:[#allocation13 + $0x2d8] sm:$0xf] }
 0x285   :  { %2894 = vmatpush.bf16.msrb.mxu3 %v4966_v22  ;;  %v5443_v22 = vld [vmem:[#allocation13 + $0x5b0] sm:$0xf0]  ;;  %v6434_v31 = vld [vmem:[#allocation13 + $0x2f4] sm:$0xf0] }
 0x286   :  { %2872 = vmatpush.bf16.msrb.mxu1 %v5346_v39  ;;  %v5446_v15 = vor.u32 %v6517_v32, %v5443_v22  ;;  %v5094_v39 = vor.u32 %v6429_v34, %v5091_v49  ;;  %v5027_v4 = vld [vmem:[#allocation13 + $0x270] sm:$0xf0]  ;;  %v5193_v22 = vld [vmem:[#allocation13 + $0x398] sm:$0xf] }
 0x287   :  { %2862 = vmatpush.bf16.msrb.mxu0 %v4994_v42  ;;  %v5506_v42 = vor.u32 %v6537_v30, %v5505_v51  ;;  %v6573_v7 = vld [vmem:[#allocation13 + $0x754] sm:$0xf] }
 0x288   :  { %2884 = vmatpush.bf16.msrb.mxu2 %v5634_v54  ;;  %v5347_v11 = vld [vmem:[#allocation13 + $0x4f0] sm:$0xf0] }
 0x289   :  { %2895 = vmatpush.bf16.msrb.mxu3 %v4934_v41  ;;  %v5411_v41 = vld [vmem:[#allocation13 + $0x570] sm:$0xf0] }
 0x28a   :  { %2873 = vmatpush.bf16.msrb.mxu1 %v5314_v58  ;;  %2863 = vmatmul.bf16.vlgmr.msrb.gmra.mxu0 %v7286_v0  ;;  %v5414_v54 = vor.u32 %v6509_v62, %v5411_v41  ;;  %v4739_v58 = vld [vmem:[#allocation13 + $0x30] sm:$0xf0]  ;;  %v6450_v62 = vld [vmem:[#allocation13 + $0x374] sm:$0xf0] }
 0x28b   :  { %2907 = vmatpush.bf16.msra.mxu0 %v5222_v47  ;;  %v5734_v47 = vor.u32 %v6589_v36, %v5731_v37  ;;  %v4995_v13 = vld [vmem:[#allocation13 + $0x230] sm:$0xf0]  ;;  %v4873_v37 = vld [vmem:[#allocation13 + $0x118] sm:$0xf] }
 0x28c   :  { %2885 = vmatpush.bf16.msrb.mxu2 %v5602_v5  ;;  %v4742_v5 = vor.u32 %v6341_v57, %v4739_v58  ;;  %v6565_v20 = vld [vmem:[#allocation13 + $0x714] sm:$0xf]  ;;  %v4874_v46 = vor.u32 %v6378_v38, %v4873_v37  ;;  %v5481_v57 = vld [vmem:[#allocation13 + $0x5d8] sm:$0xf]  ;;  %v6398_v38 = vld [vmem:[#allocation13 + $0x1dc] sm:$0xf] }
 0x28d   :  { %2896 = vmatpush.bf16.msrb.mxu3 %v4902_v63  ;;  %v5379_v63 = vld [vmem:[#allocation13 + $0x530] sm:$0xf0]  ;;  %v6530_v58 = vld [vmem:[#allocation13 + $0x5f4] sm:$0xf0] }
 0x28e   :  { %2874 = vmatpush.bf16.msrb.mxu1 %v5282_v8  ;;  %v5382_v6 = vor.u32 %v6501_v60, %v5379_v63  ;;  %v5667_v8 = vld [vmem:[#allocation13 + $0x770] sm:$0xf0]  ;;  %v5129_v60 = vld [vmem:[#allocation13 + $0x318] sm:$0xf] }
 0x28f   :  { %2908 = vmatpush.bf16.msra.mxu0 %v5190_v3  ;;  %v6413_v3 = vld [vmem:[#allocation13 + $0x254] sm:$0xf]  ;;  %v5670_v14 = vor.u32 %v6573_v7, %v5667_v8  ;;  %v6442_v63 = vld [vmem:[#allocation13 + $0x334] sm:$0xf0] }
 0x290   :  { %2886 = vmatpush.bf16.msrb.mxu2 %v5570_v17  ;;  %v5030_v53 = vor.u32 %v6413_v3, %v5027_v4  ;;  %v6466_v17 = vld [vmem:[#allocation13 + $0x3f4] sm:$0xf0]  ;;  %v6557_v49 = vld [vmem:[#allocation13 + $0x6d4] sm:$0xf]  ;;  %v5130_v8 = vor.u32 %v6442_v63, %v5129_v60 }
 0x291   :  { %2897 = vmatpush.bf16.msrb.mxu3 %v4870_v45  ;;  %v6493_v45 = vld [vmem:[#allocation13 + $0x4d4] sm:$0xf]  ;;  %v5226_v26 = vor.u32 %v6466_v17, %v5225_v16  ;;  %v5737_v17 = vld [vmem:[#allocation13 + $0x7d8] sm:$0xf] }
 0x292   :  { %2875 = vmatpush.bf16.msrb.mxu1 %v5250_v21  ;;  %v5350_v18 = vor.u32 %v6493_v45, %v5347_v11  ;;  %v5635_v21 = vld [vmem:[#allocation13 + $0x730] sm:$0xf0]  ;;  %v6522_v45 = vld [vmem:[#allocation13 + $0x5b4] sm:$0xf0] }
 0x293   :  { %2909 = vmatpush.bf16.msra.mxu0 %v5158_v12  ;;  %v6405_v12 = vld [vmem:[#allocation13 + $0x214] sm:$0xf]  ;;  %v5638_v32 = vor.u32 %v6565_v20, %v5635_v21  ;;  %v4777_v20 = vld [vmem:[#allocation13 + $0x58] sm:$0xf]  ;;  %v5098_v21 = vor.u32 %v6434_v31, %v5097_v10 }
 0x294   :  { %2887 = vmatpush.bf16.msrb.mxu2 %v5538_v33  ;;  %v4998_v50 = vor.u32 %v6405_v12, %v4995_v13  ;;  %v6458_v33 = vld [vmem:[#allocation13 + $0x3b4] sm:$0xf0]  ;;  %v5603_v51 = vld [vmem:[#allocation13 + $0x6f0] sm:$0xf0] }
 0x295   :  { %2898 = vmatpush.bf16.msrb.mxu3 %v4838_v23  ;;  %2876 = vmatmul.bf16.vlgmr.msrb.gmra.mxu1 %v7297_v55  ;;  %v6485_v23 = vld [vmem:[#allocation13 + $0x494] sm:$0xf]  ;;  %v5194_v36 = vor.u32 %v6458_v33, %v5193_v22  ;;  %v6506_v37 = vld [vmem:[#allocation13 + $0x534] sm:$0xf0] }
 0x296   :  { %2920 = vmatpush.bf16.msra.mxu1 %v5478_v24  ;;  %v5315_v24 = vld [vmem:[#allocation13 + $0x4b0] sm:$0xf0]  ;;  %v5001_v60 = vld [vmem:[#allocation13 + $0x218] sm:$0xf] }
 0x297   :  { %2910 = vmatpush.bf16.msra.mxu0 %v5126_v19  ;;  %v4905_v19 = vld [vmem:[#allocation13 + $0x158] sm:$0xf]  ;;  %v5318_v34 = vor.u32 %v6485_v23, %v5315_v24  ;;  %v5571_v43 = vld [vmem:[#allocation13 + $0x6b0] sm:$0xf0] }
 0x298   :  { %2888 = vmatpush.bf16.msrb.mxu2 %v5506_v42  ;;  %v4906_v30 = vor.u32 %v6386_v27, %v4905_v19  ;;  %v6549_v42 = vld [vmem:[#allocation13 + $0x694] sm:$0xf]  ;;  %v6514_v23 = vld [vmem:[#allocation13 + $0x574] sm:$0xf0] }
 0x299   :  { %2899 = vmatpush.bf16.msrb.mxu3 %v4806_v35  ;;  %v6477_v35 = vld [vmem:[#allocation13 + $0x454] sm:$0xf]  ;;  %v6426_v19 = vld [vmem:[#allocation13 + $0x2b4] sm:$0xf0] }
 0x29a   :  { %2921 = vmatpush.bf16.msra.mxu1 %v5446_v15  ;;  %v5283_v15 = vld [vmem:[#allocation13 + $0x470] sm:$0xf0]  ;;  %v6410_v63 = vld [vmem:[#allocation13 + $0x234] sm:$0xf0] }
 0x29b   :  { %2911 = vmatpush.bf16.msra.mxu0 %v5094_v39  ;;  %2889 = vmatmul.bf16.vlgmr.msrb.gmra.mxu2 %v7301_v25  ;;  %v5606_v39 = vor.u32 %v6557_v49, %v5603_v51  ;;  %v5286_v41 = vor.u32 %v6477_v35, %v5283_v15  ;;  %v5251_v48 = vld [vmem:[#allocation13 + $0x430] sm:$0xf0]  ;;  %v6586_v49 = vld [vmem:[#allocation13 + $0x7b4] sm:$0xf0] }
 0x29c   :  { %2933 = vmatpush.bf16.msra.mxu2 %v5734_v47  ;;  %v6469_v47 = vld [vmem:[#allocation13 + $0x414] sm:$0xf]  ;;  %v4745_v51 = vld [vmem:[#allocation13 + $0x18] sm:$0xf] }
 0x29d   :  { %2900 = vmatpush.bf16.msrb.mxu3 %v4774_v52  ;;  %v4841_v52 = vld [vmem:[#allocation13 + $0xd8] sm:$0xf]  ;;  %v5254_v1 = vor.u32 %v6469_v47, %v5251_v48  ;;  %v6541_v2 = vld [vmem:[#allocation13 + $0x654] sm:$0xf] }
 0x29e   :  { %2922 = vmatpush.bf16.msra.mxu1 %v5414_v54  ;;  %v5162_v54 = vor.u32 %v6450_v62, %v5161_v40  ;;  %v5539_v3 = vld [vmem:[#allocation13 + $0x670] sm:$0xf0]  ;;  %v5033_v40 = vld [vmem:[#allocation13 + $0x258] sm:$0xf] }
 0x29f   :  { %2912 = vmatpush.bf16.msra.mxu0 %v5062_v59  ;;  %v5574_v59 = vor.u32 %v6549_v42, %v5571_v43  ;;  %v5542_v11 = vor.u32 %v6541_v2, %v5539_v3  ;;  %v6533_v12 = vld [vmem:[#allocation13 + $0x614] sm:$0xf]  ;;  %v6418_v62 = vld [vmem:[#allocation13 + $0x274] sm:$0xf0]  ;;  %v6462_v2 = vld [vmem:[#allocation13 + $0x3dc] sm:$0xf] }
 0x2a0   :  { %2934 = vmatpush.bf16.msra.mxu2 %v5702_v28  ;;  %v4842_v28 = vor.u32 %v6370_v56, %v4841_v52  ;;  %v5507_v13 = vld [vmem:[#allocation13 + $0x630] sm:$0xf0]  ;;  %v5673_v47 = vld [vmem:[#allocation13 + $0x758] sm:$0xf]  ;;  %v5227_v3 = vld [vmem:[#allocation13 + $0x3f8] sm:$0xf0] }
 0x2a1   :  { %2901 = vmatpush.bf16.msrb.mxu3 %v4742_v5  ;;  %v5482_v5 = vor.u32 %v6530_v58, %v5481_v57  ;;  %v5510_v24 = vor.u32 %v6533_v12, %v5507_v13  ;;  %v6578_v48 = vld [vmem:[#allocation13 + $0x774] sm:$0xf0]  ;;  %v6390_v58 = vld [vmem:[#allocation13 + $0x19c] sm:$0xf]  ;;  %v5230_v31 = vor.u32 %v6462_v2, %v5227_v3 }
 0x2a2   :  { %2923 = vmatpush.bf16.msra.mxu1 %v5382_v6  ;;  %v4809_v6 = vld [vmem:[#allocation13 + $0x98] sm:$0xf]  ;;  %v6382_v12 = vld [vmem:[#allocation13 + $0x15c] sm:$0xf] }
 0x2a3   :  { %2913 = vmatpush.bf16.msra.mxu0 %v5030_v53  ;;  %v5449_v53 = vld [vmem:[#allocation13 + $0x598] sm:$0xf]  ;;  %v4907_v13 = vld [vmem:[#allocation13 + $0x178] sm:$0xf0] }
 0x2a4   :  { %2935 = vmatpush.bf16.msra.mxu2 %v5670_v14  ;;  %2902 = vmatmul.bf16.vlgmr.msrb.gmra.mxu3 %v7280_v29  ;;  %v5450_v16 = vor.u32 %v6522_v45, %v5449_v53  ;;  %v5353_v56 = vld [vmem:[#allocation13 + $0x4d8] sm:$0xf]  ;;  %v5002_v45 = vor.u32 %v6410_v63, %v5001_v60  ;;  %v4811_v2 = vld [vmem:[#allocation13 + $0xb8] sm:$0xf0] }
 0x2a5   :  { %2946 = vmatpush.bf16.msra.mxu3 %v4970_v9  ;;  %v6362_v9 = vld [vmem:[#allocation13 + $0xb4] sm:$0xf0] }
 0x2a6   :  { %2924 = vmatpush.bf16.msra.mxu1 %v5350_v18  ;;  %v4810_v14 = vor.u32 %v6362_v9, %v4809_v6  ;;  %v6594_v18 = vld [vmem:[#allocation13 + $0x7f4] sm:$0xf0] }
 0x2a7   :  { %2914 = vmatpush.bf16.msra.mxu0 %v4998_v50  ;;  %v7321_v4 = vpop.f32.mrf.mxu3  ;;  %v7323_v7 = vpop.f32.mrf.mxu0  ;;  %v5417_v50 = vld [vmem:[#allocation13 + $0x558] sm:$0xf]  ;;  %v5738_v27 = vor.u32 %v6594_v18, %v5737_v17  ;;  %v5195_v17 = vld [vmem:[#allocation13 + $0x3b8] sm:$0xf0] }
 0x2a8   :  { %2936 = vmatpush.bf16.msra.mxu2 %v5638_v32  ;;  %v5705_v32 = vld [vmem:[#allocation13 + $0x798] sm:$0xf] }
 0x2a9   :  { %2947 = vmatpush.bf16.msra.mxu3 %v4938_v44  ;;  %v6354_v44 = vld [vmem:[#allocation13 + $0x74] sm:$0xf0] }
 0x2aa   :  { %2925 = vmatpush.bf16.msra.mxu1 %v5318_v34  ;;  %2915 = vmatmul.bf16.vlgmr.msra.gmra.mxu0 %v7286_v0  ;;  %v4778_v33 = vor.u32 %v6354_v44, %v4777_v20  ;;  %v5418_v34 = vor.u32 %v6514_v23, %v5417_v50  ;;  %v6498_v57 = vld [vmem:[#allocation13 + $0x4f4] sm:$0xf0]  ;;  %v4910_v50 = vor.u32 %v6382_v12, %v4907_v13 }
 0x2ab   :  { %2959 = vmatpush.bf16.msrb.mxu0 %v5226_v26  ;;  %v5065_v26 = vld [vmem:[#allocation13 + $0x298] sm:$0xf] }
 0x2ac   :  { %2937 = vmatpush.bf16.msra.mxu2 %v5606_v39  ;;  %v5066_v15 = vor.u32 %v6426_v19, %v5065_v26  ;;  %v4971_v39 = vld [vmem:[#allocation13 + $0x1f8] sm:$0xf0]  ;;  %v5641_v6 = vld [vmem:[#allocation13 + $0x718] sm:$0xf]  ;;  %v2657_v26 = vadd.f32 %v7323_v7, %v7321_v4 }
 0x2ad   :  { %2948 = vmatpush.bf16.msra.mxu3 %v4906_v30  ;;  %v6346_v30 = vld [vmem:[#allocation13 + $0x34] sm:$0xf0]  ;;  %v4974_v52 = vor.u32 %v6398_v38, %v4971_v39  ;;  %v6366_v39 = vld [vmem:[#allocation13 + $0xdc] sm:$0xf] }
 0x2ae   :  { %2926 = vmatpush.bf16.msra.mxu1 %v5286_v41  ;;  %v5706_v41 = vor.u32 %v6586_v49, %v5705_v32  ;;  %v4746_v43 = vor.u32 %v6346_v30, %v4745_v51  ;;  %v6490_v10 = vld [vmem:[#allocation13 + $0x4b4] sm:$0xf0]  ;;  %v4875_v32 = vld [vmem:[#allocation13 + $0x138] sm:$0xf0] }
 0x2af   :  { %2960 = vmatpush.bf16.msrb.mxu0 %v5194_v36  ;;  %v2645_v22 = vpop.f32.mrf.mxu3  ;;  %v2658_v35 = vpop.f32.mrf.mxu0  ;;  %v5385_v36 = vld [vmem:[#allocation13 + $0x518] sm:$0xf] }
 0x2b0   :  { %2938 = vmatpush.bf16.msra.mxu2 %v5574_v59  ;;  %v4939_v59 = vld [vmem:[#allocation13 + $0x1b8] sm:$0xf0]  ;;  %v6562_v44 = vld [vmem:[#allocation13 + $0x6f4] sm:$0xf0] }
 0x2b1   :  { %2949 = vmatpush.bf16.msra.mxu3 %v4874_v46  ;;  %v5386_v46 = vor.u32 %v6506_v37, %v5385_v36  ;;  %v4942_v53 = vor.u32 %v6390_v58, %v4939_v59  ;;  %v5289_v23 = vld [vmem:[#allocation13 + $0x458] sm:$0xf] }
 0x2b2   :  { %2927 = vmatpush.bf16.msra.mxu1 %v5254_v1  ;;  %v2669_v42 = vpop.f32.mrf.mxu1  ;;  %v5674_v1 = vor.u32 %v6578_v48, %v5673_v47  ;;  %v5577_v35 = vld [vmem:[#allocation13 + $0x698] sm:$0xf]  ;;  %v6438_v47 = vld [vmem:[#allocation13 + $0x31c] sm:$0xf] }
 0x2b3   :  { %2961 = vmatpush.bf16.msrb.mxu0 %v5162_v54  ;;  %v5034_v54 = vor.u32 %v6418_v62, %v5033_v40  ;;  %v2670_v49 = vadd.f32 %v2669_v42, %v2657_v26  ;;  %v5257_v7 = vld [vmem:[#allocation13 + $0x418] sm:$0xf]  ;;  %v6526_v42 = vld [vmem:[#allocation13 + $0x5dc] sm:$0xf] }
 0x2b4   :  { %2939 = vmatpush.bf16.msra.mxu2 %v5542_v11  ;;  %v5321_v11 = vld [vmem:[#allocation13 + $0x498] sm:$0xf]  ;;  %v5131_v48 = vld [vmem:[#allocation13 + $0x338] sm:$0xf0] }
 0x2b5   :  { %2950 = vmatpush.bf16.msra.mxu3 %v4842_v28  ;;  %2928 = vmatmul.bf16.vlgmr.msra.gmra.mxu1 %v7297_v55  ;;  %v5322_v20 = vor.u32 %v6490_v10, %v5321_v11  ;;  %v6474_v38 = vld [vmem:[#allocation13 + $0x434] sm:$0xf0]  ;;  %v6430_v10 = vld [vmem:[#allocation13 + $0x2dc] sm:$0xf] }
 0x2b6   :  { %2972 = vmatpush.bf16.msrb.mxu1 %v5482_v5  ;;  %v5354_v5 = vor.u32 %v6498_v57, %v5353_v56  ;;  %v5258_v57 = vor.u32 %v6474_v38, %v5257_v7  ;;  %v5545_v58 = vld [vmem:[#allocation13 + $0x658] sm:$0xf]  ;;  %v5707_v7 = vld [vmem:[#allocation13 + $0x7b8] sm:$0xf0] }
 0x2b7   :  { %2962 = vmatpush.bf16.msrb.mxu0 %v5130_v8  ;;  %v7327_v28 = vpop.f32.mrf.mxu3  ;;  %v6570_v8 = vld [vmem:[#allocation13 + $0x734] sm:$0xf0]  ;;  %v7329_v9 = vpop.f32.mrf.mxu0  ;;  %v6342_v38 = vld [vmem:[#allocation13 + $0x1c] sm:$0xf] }
 0x2b8   :  { %2940 = vmatpush.bf16.msra.mxu2 %v5510_v24  ;;  %v6482_v24 = vld [vmem:[#allocation13 + $0x474] sm:$0xf0] }
 0x2b9   :  { %2951 = vmatpush.bf16.msra.mxu3 %v4810_v14  ;;  %v5642_v14 = vor.u32 %v6570_v8, %v5641_v6  ;;  %v5290_v30 = vor.u32 %v6482_v24, %v5289_v23  ;;  %v6546_v59 = vld [vmem:[#allocation13 + $0x674] sm:$0xf0]  ;;  %v5134_v6 = vor.u32 %v6438_v47, %v5131_v48  ;;  %v6518_v8 = vld [vmem:[#allocation13 + $0x59c] sm:$0xf]  ;;  %v5801_v48 = vld [vmem:[#allocation16 + $0x70] sm:$0xf] }
 0x2ba   :  { %2973 = vmatpush.bf16.msrb.mxu1 %v5450_v16  ;;  %v6454_v16 = vld [vmem:[#allocation13 + $0x39c] sm:$0xf]  ;;  %v2671_v18 = vpop.f32.mrf.mxu1  ;;  %v5513_v11 = vld [vmem:[#allocation13 + $0x618] sm:$0xf] }
 0x2bb   :  { %2963 = vmatpush.bf16.msrb.mxu0 %v5098_v21  ;;  %2941 = vmatmul.bf16.vlgmr.msra.gmra.mxu2 %v7301_v25  ;;  %v5609_v21 = vld [vmem:[#allocation13 + $0x6d8] sm:$0xf]  ;;  %v5198_v19 = vor.u32 %v6454_v16, %v5195_v17  ;;  %v6590_v17 = vld [vmem:[#allocation13 + $0x7dc] sm:$0xf] }
 0x2bc   :  { %2985 = vmatpush.bf16.msrb.mxu2 %v5738_v27  ;;  %v6374_v27 = vld [vmem:[#allocation13 + $0x11c] sm:$0xf]  ;;  %v5610_v22 = vor.u32 %v6562_v44, %v5609_v21  ;;  %v6538_v16 = vld [vmem:[#allocation13 + $0x634] sm:$0xf0] }
 0x2bd   :  { %2952 = vmatpush.bf16.msra.mxu3 %v4778_v33  ;;  %v6446_v33 = vld [vmem:[#allocation13 + $0x35c] sm:$0xf]  ;;  %v4878_v4 = vor.u32 %v6374_v27, %v4875_v32 }
 0x2be   :  { %2974 = vmatpush.bf16.msrb.mxu1 %v5418_v34  ;;  %v5163_v34 = vld [vmem:[#allocation13 + $0x378] sm:$0xf0]  ;;  %v2682_v36 = vpop.f32.mrf.mxu2 }
 0x2bf   :  { %2964 = vmatpush.bf16.msrb.mxu0 %v5066_v15  ;;  %v2697_v51 = vpop.f32.mrf.mxu3  ;;  %v6554_v15 = vld [vmem:[#allocation13 + $0x6b4] sm:$0xf0]  ;;  %v2710_v37 = vpop.f32.mrf.mxu0  ;;  %v7335_v40 = vadd.f32 %v2682_v36, %v2670_v49  ;;  %v5166_v62 = vor.u32 %v6446_v33, %v5163_v34  ;;  %v5739_v44 = vld [vmem:[#allocation13 + $0x7f8] sm:$0xf0]  ;;  %v5514_v33 = vor.u32 %v6538_v16, %v5513_v11 }
 0x2c0   :  { %2986 = vmatpush.bf16.msrb.mxu2 %v5706_v41  ;;  %v4843_v41 = vld [vmem:[#allocation13 + $0xf8] sm:$0xf0] }
 0x2c1   :  { %2953 = vmatpush.bf16.msra.mxu3 %v4746_v43  ;;  %v5483_v43 = vld [vmem:[#allocation13 + $0x5f8] sm:$0xf0]  ;;  %v4846_v60 = vor.u32 %v6366_v39, %v4843_v41 }
 0x2c2   :  { %2975 = vmatpush.bf16.msrb.mxu1 %v5386_v46  ;;  %v5578_v46 = vor.u32 %v6554_v15, %v5577_v35  ;;  %v7340_v56 = vpop.f32.mrf.mxu1  ;;  %v5486_v63 = vor.u32 %v6526_v42, %v5483_v43  ;;  %v4779_v23 = vld [vmem:[#allocation13 + $0x78] sm:$0xf0]  ;;  %v5742_v35 = vor.u32 %v6590_v17, %v5739_v44 }
 0x2c3   :  { %2965 = vmatpush.bf16.msrb.mxu0 %v5034_v54  ;;  %v3106_v54 = vmul.f32 %v7335_v40, %v7335_v40  ;;  %v6510_v32 = vld [vmem:[#allocation13 + $0x55c] sm:$0xf] }
 0x2c4   :  { %2987 = vmatpush.bf16.msrb.mxu2 %v5674_v1  ;;  %2954 = vmatmul.bf16.vlgmr.msra.gmra.mxu3 %v7280_v29  ;;  %v6358_v1 = vld [vmem:[#allocation13 + $0x9c] sm:$0xf] }
 0x2c5   :  { %2998 = vmatpush.bf16.msrb.mxu3 %v4974_v52  ;;  %v3050_v52 = vrot.slane %v7335_v40, 4  ;;  %v6422_v34 = vld [vmem:[#allocation13 + $0x29c] sm:$0xf] }
 0x2c6   :  { %2976 = vmatpush.bf16.msrb.mxu1 %v5354_v5  ;;  %v3114_v5 = vrot.slane %v3106_v54, 4  ;;  %v2684_v18 = vpop.f32.mrf.mxu2  ;;  %v5067_v15 = vld [vmem:[#allocation13 + $0x2b8] sm:$0xf0] }
 0x2c7   :  { %2966 = vmatpush.bf16.msrb.mxu0 %v5002_v45  ;;  %v3051_v3 = vadd.f32 %v3050_v52, %v7335_v40  ;;  %v5546_v45 = vor.u32 %v6546_v59, %v5545_v58  ;;  %v6582_v36 = vld [vmem:[#allocation13 + $0x79c] sm:$0xf]  ;;  %v5070_v47 = vor.u32 %v6422_v34, %v5067_v15  ;;  %v6610_v52 = vld [vmem:[#allocation16 + $0x74] sm:$0xf0] }
 0x2c8   :  { %2988 = vmatpush.bf16.msrb.mxu2 %v5642_v14  ;;  %v3115_v13 = vadd.f32 %v3114_v5, %v3106_v54  ;;  %v7343_v14 = vpop.f32.mrf.mxu3  ;;  %v4747_v39 = vld [vmem:[#allocation13 + $0x38] sm:$0xf0] }
 0x2c9   :  { %2999 = vmatpush.bf16.msrb.mxu3 %v4942_v53  ;;  %v5451_v53 = vld [vmem:[#allocation13 + $0x5b8] sm:$0xf0]  ;;  %v3052_v12 = vrot.slane %v3051_v3, 2 }
 0x2ca   :  { %2977 = vmatpush.bf16.msrb.mxu1 %v5322_v20  ;;  %2967 = vmatmul.bf16.vlgmr.msrb.gmra.mxu0 %v7286_v0  ;;  %v4814_v20 = vor.u32 %v6358_v1, %v4811_v2  ;;  %v5454_v21 = vor.u32 %v6518_v8, %v5451_v53  ;;  %v3116_v26 = vrot.slane %v3115_v13, 2  ;;  %v6502_v43 = vld [vmem:[#allocation13 + $0x51c] sm:$0xf]  ;;  %v4750_v1 = vor.u32 %v6342_v38, %v4747_v39 }
 0x2cb   :  { %3011 = vmatpush.bf16.msra.mxu0 %v5230_v31  ;;  %v5099_v31 = vld [vmem:[#allocation13 + $0x2f8] sm:$0xf0]  ;;  %v3053_v24 = vadd.f32 %v3052_v12, %v3051_v3 }
 0x2cc   :  { %2989 = vmatpush.bf16.msrb.mxu2 %v5610_v22  ;;  %v5102_v27 = vor.u32 %v6430_v10, %v5099_v31  ;;  %v5419_v22 = vld [vmem:[#allocation13 + $0x578] sm:$0xf0]  ;;  %v3117_v51 = vadd.f32 %v3116_v26, %v3115_v13  ;;  %v5793_v31 = vld [vmem:[#allocation16 + $0x60] sm:$0xf]  ;;  %v6608_v13 = vld [vmem:[#allocation16 + $0x64] sm:$0xf0] }
 0x2cd   :  { %3000 = vmatpush.bf16.msrb.mxu3 %v4910_v50  ;;  %v6350_v50 = vld [vmem:[#allocation13 + $0x5c] sm:$0xf]  ;;  %v3054_v49 = vrot.slane %v3053_v24, 1 }
 0x2ce   :  { %2978 = vmatpush.bf16.msrb.mxu1 %v5290_v30  ;;  %v2723_v30 = vpop.f32.mrf.mxu1  ;;  %v4782_v37 = vor.u32 %v6350_v50, %v4779_v23  ;;  %v3118_v42 = vrot.slane %v3117_v51, 1  ;;  %v6574_v3 = vld [vmem:[#allocation13 + $0x75c] sm:$0xf] }
 0x2cf   :  { %3012 = vmatpush.bf16.msra.mxu0 %v5198_v19  ;;  %v7345_v19 = vpop.f32.mrf.mxu0  ;;  %v3055_v41 = vadd.f32 %v3054_v49, %v3053_v24  ;;  %v5675_v5 = vld [vmem:[#allocation13 + $0x778] sm:$0xf0] }
 0x2d0   :  { %2990 = vmatpush.bf16.msrb.mxu2 %v5578_v46  ;;  %v5387_v46 = vld [vmem:[#allocation13 + $0x538] sm:$0xf0]  ;;  %v2749_v59 = vpop.f32.mrf.mxu3  ;;  %v5678_v50 = vor.u32 %v6574_v3, %v5675_v5  ;;  %v5849_v5 = vld [vmem:[#allocation16 + $0xd0] sm:$0xf] }
 0x2d1   :  { %3001 = vmatpush.bf16.msrb.mxu3 %v4878_v4  ;;  %v5422_v4 = vor.u32 %v6510_v32, %v5419_v22  ;;  %v7351_v54 = vmul.f32 %v3055_v41, %v7159_v61  ;;  %v5390_v2 = vor.u32 %v6502_v43, %v5387_v46  ;;  %v6494_v11 = vld [vmem:[#allocation13 + $0x4dc] sm:$0xf]  ;;  %v5865_v32 = vld [vmem:[#allocation16 + $0xf0] sm:$0xf]  ;;  %v6626_v22 = vld [vmem:[#allocation16 + $0xf4] sm:$0xf0] }
 0x2d2   :  { %2979 = vmatpush.bf16.msrb.mxu1 %v5258_v57  ;;  %v3119_v57 = vadd.f32 %v3118_v42, %v3117_v51  ;;  %v5355_v10 = vld [vmem:[#allocation13 + $0x4f8] sm:$0xf0]  ;;  %v5794_v51 = vor.u32 %v6608_v13, %v5793_v31  ;;  %v5857_v46 = vld [vmem:[#allocation16 + $0xe0] sm:$0xf] }
 0x2d3   :  { %3013 = vmatpush.bf16.msra.mxu0 %v5166_v62  ;;  %v2709_v62 = vadd.f32 %v7329_v9, %v7327_v28  ;;  %v5035_v28 = vld [vmem:[#allocation13 + $0x278] sm:$0xf0]  ;;  %v2734_v9 = vpop.f32.mrf.mxu2  ;;  %v3170_v8 = vmul.f32 %v7351_v54, %v7351_v54  ;;  %v5358_v26 = vor.u32 %v6494_v11, %v5355_v10  ;;  %v5777_v59 = vld [vmem:[#allocation16 + $0x40] sm:$0xf]  ;;  %v2761_v10 = vadd.f32 %v7345_v19, %v7343_v14 }
 0x2d4   :  { %2991 = vmatpush.bf16.msrb.mxu2 %v5546_v45  ;;  %v5802_v45 = vor.u32 %v6610_v52, %v5801_v48  ;;  %v6406_v16 = vld [vmem:[#allocation13 + $0x21c] sm:$0xf] }
 0x2d5   :  { %3002 = vmatpush.bf16.msrb.mxu3 %v4846_v60  ;;  %2980 = vmatmul.bf16.vlgmr.msrb.gmra.mxu1 %v7297_v55  ;;  %v2722_v58 = vadd.f32 %v7340_v56, %v2709_v62  ;;  %v5710_v60 = vor.u32 %v6582_v36, %v5707_v7  ;;  %v5003_v17 = vld [vmem:[#allocation13 + $0x238] sm:$0xf0]  ;;  %v5785_v36 = vld [vmem:[#allocation16 + $0x50] sm:$0xf]  ;;  %v5866_v62 = vor.u32 %v6626_v22, %v5865_v32 }
 0x2d6   :  { %3024 = vmatpush.bf16.msra.mxu1 %v5486_v63  ;;  %v6414_v63 = vld [vmem:[#allocation13 + $0x25c] sm:$0xf]  ;;  %v7363_v44 = vpop.f32.mrf.mxu1 }
 0x2d7   :  { %3014 = vmatpush.bf16.msra.mxu0 %v5134_v6  ;;  %v3162_v6 = vmul.f32 %v3119_v57, %v7159_v61  ;;  %v7357_v53 = vadd.f32 %v2734_v9, %v2722_v58  ;;  %v2762_v56 = vpop.f32.mrf.mxu0  ;;  %v5038_v12 = vor.u32 %v6414_v63, %v5035_v28  ;;  %v6566_v23 = vld [vmem:[#allocation13 + $0x71c] sm:$0xf]  ;;  %v2774_v14 = vadd.f32 %v7363_v44, %v2761_v10  ;;  %v6638_v10 = vld [vmem:[#allocation16 + $0x154] sm:$0xf0] }
 0x2d8   :  { %2992 = vmatpush.bf16.msrb.mxu2 %v5514_v33  ;;  %v5643_v24 = vld [vmem:[#allocation13 + $0x738] sm:$0xf0] }
 0x2d9   :  { %3003 = vmatpush.bf16.msrb.mxu3 %v4814_v20  ;;  %v3178_v18 = vsub.f32 %v3162_v6, %v3170_v8  ;;  %v3056_v20 = vrot.slane %v7357_v53, 4  ;;  %v5323_v30 = vld [vmem:[#allocation13 + $0x4b8] sm:$0xf0]  ;;  %v5646_v15 = vor.u32 %v6566_v23, %v5643_v24  ;;  %v6622_v6 = vld [vmem:[#allocation16 + $0xd4] sm:$0xf0] }
 0x2da   :  { %3025 = vmatpush.bf16.msra.mxu1 %v5454_v21  ;;  %v3107_v21 = vmul.f32 %v7357_v53, %v7357_v53  ;;  %v6558_v38 = vld [vmem:[#allocation13 + $0x6dc] sm:$0xf]  ;;  %v6642_v23 = vld [vmem:[#allocation16 + $0x174] sm:$0xf0] }
 0x2db   :  { %3015 = vmatpush.bf16.msra.mxu0 %v5102_v27  ;;  %2993 = vmatmul.bf16.vlgmr.msrb.gmra.mxu2 %v7301_v25  ;;  %v6486_v27 = vld [vmem:[#allocation13 + $0x49c] sm:$0xf]  ;;  %v7365_v33 = vadd.f32 0.8, %v3178_v18  ;;  %v3057_v34 = vadd.f32 %v3056_v20, %v7357_v53  ;;  %v2736_v41 = vpop.f32.mrf.mxu2 }
 0x2dc   :  { %3037 = vmatpush.bf16.msra.mxu2 %v5742_v35  ;;  %v3120_v49 = vrot.slane %v3107_v21, 4  ;;  %v5006_v35 = vor.u32 %v6406_v16, %v5003_v17  ;;  %v5611_v39 = vld [vmem:[#allocation13 + $0x6f8] sm:$0xf0]  ;;  %v5326_v42 = vor.u32 %v6486_v27, %v5323_v30  ;;  %v5769_v16 = vld [vmem:[#allocation16 + $0x30] sm:$0xf] }
 0x2dd   :  { %3004 = vmatpush.bf16.msrb.mxu3 %v4782_v37  ;;  %v6606_v37 = vld [vmem:[#allocation16 + $0x54] sm:$0xf0]  ;;  %6757 = vrsqrt.f32 %v7365_v33  ;;  %v6478_v43 = vld [vmem:[#allocation13 + $0x45c] sm:$0xf]  ;;  %v6640_v41 = vld [vmem:[#allocation16 + $0x164] sm:$0xf0]  ;;  %vm3208_vm12 = vweird.f32 %v7365_v33 }
 0x2de   :  { %3026 = vmatpush.bf16.msra.mxu1 %v5422_v4  ;;  %v3058_v4 = vrot.slane %v3057_v34, 2  ;;  %v3121_v7 = vadd.f32 %v3120_v49, %v3107_v21  ;;  %v5786_v57 = vor.u32 %v6606_v37, %v5785_v36  ;;  %v5291_v58 = vld [vmem:[#allocation13 + $0x478] sm:$0xf0]  ;;  %v6602_v17 = vld [vmem:[#allocation16 + $0x34] sm:$0xf0]  ;;  %v5850_v21 = vor.u32 %v6622_v6, %v5849_v5 }
 0x2df   :  { %3016 = vmatpush.bf16.msra.mxu0 %v5070_v47  ;;  %v6624_v47 = vld [vmem:[#allocation16 + $0xe4] sm:$0xf0]  ;;  %v6550_v63 = vld [vmem:[#allocation13 + $0x69c] sm:$0xf]  ;;  %v5294_v8 = vor.u32 %v6478_v43, %v5291_v58  ;;  %v5770_v22 = vor.u32 %v6602_v17, %v5769_v16  ;;  %v5761_v49 = vld [vmem:[#allocation16 + $0x20] sm:$0xf] }
 0x2e0   :  { %3038 = vmatpush.bf16.msra.mxu2 %v5710_v60  ;;  %v3059_v48 = vadd.f32 %v3058_v4, %v3057_v34  ;;  %v3122_v52 = vrot.slane %v3121_v7, 2  ;;  %v6604_v60 = vld [vmem:[#allocation16 + $0x44] sm:$0xf0]  ;;  %v5579_v28 = vld [vmem:[#allocation13 + $0x6b8] sm:$0xf0]  ;;  %v5858_v3 = vor.u32 %v6624_v47, %v5857_v46 }
 0x2e1   :  { %3005 = vmatpush.bf16.msrb.mxu3 %v4750_v1  ;;  %v2775_v1 = vpop.f32.mrf.mxu1  ;;  %v6470_v56 = vld [vmem:[#allocation13 + $0x41c] sm:$0xf]  ;;  %v5778_v13 = vor.u32 %v6604_v60, %v5777_v59  ;;  %v5582_v20 = vor.u32 %v6550_v63, %v5579_v28  ;;  %v7382_v30 = vld [vmem:[#allocation14] ss:$2 sm:$0xff]  ;;  %v5841_v4 = vld [vmem:[#allocation16 + $0xc0] sm:$0xf] }
 0x2e2   :  { %3027 = vmatpush.bf16.msra.mxu1 %v5390_v2  ;;  %v3123_v9 = vadd.f32 %v3122_v52, %v3121_v7  ;;  %v5614_v2 = vor.u32 %v6558_v38, %v5611_v39  ;;  %v6542_v19 = vld [vmem:[#allocation13 + $0x65c] sm:$0xf]  ;;  %v6620_v7 = vld [vmem:[#allocation16 + $0xc4] sm:$0xf0]  ;;  %v6598_v52 = vld [vmem:[#allocation16 + $0x14] sm:$0xf0] }
 0x2e3   :  { %3017 = vmatpush.bf16.msra.mxu0 %v5038_v12  ;;  %v7370_v11 = vpop.eup %6757  ;;  %v2786_v27 = vpop.f32.mrf.mxu2  ;;  %v5547_v34 = vld [vmem:[#allocation13 + $0x678] sm:$0xf0]  ;;  %v5842_v59 = vor.u32 %v6620_v7, %v5841_v4  ;;  %v7397_v60 = vld [vmem:[#allocation14 + $0x1] ss:$2 sm:$0xff] }
 0x2e4   :  { %3039 = vmatpush.bf16.msra.mxu2 %v5678_v50  ;;  %3006 = vmatmul.bf16.vlgmr.msrb.gmra.mxu3 %v7280_v29  ;;  %v3060_v29 = vrot.slane %v3059_v48, 1  ;;  %v3124_v12 = vrot.slane %v3123_v9, 1  ;;  %v3203_v18 = vmul.f32 %v7370_v11, %v7365_v33  ;;  %v5929_v50 = vld [vmem:[#allocation16 + $0x170] sm:$0xf]  ;;  %v7387_v44 = vadd.f32 %v2786_v27, %v2774_v14  ;;  %v7389_v36 = vld [vmem:[#allocation13 + $0x61c] sm:$0xf] }
 0x2e5   :  { %4149 = vmatpush.bf16.msra.mxu3 %v5802_v45  ;;  %v5259_v45 = vld [vmem:[#allocation13 + $0x438] sm:$0xf0]  ;;  %v5930_v38 = vor.u32 %v6642_v23, %v5929_v50  ;;  %v5550_v47 = vor.u32 %v6542_v19, %v5547_v34  ;;  %vm3209_vm11 = vweird.f32 %v7370_v11  ;;  %v5833_v63 = vld [vmem:[#allocation16 + $0xb0] sm:$0xf]  ;;  %v5825_v50 = vld [vmem:[#allocation16 + $0xa0] sm:$0xf] }
 0x2e6   :  { %3028 = vmatpush.bf16.msra.mxu1 %v5358_v26  ;;  %v3061_v31 = vadd.f32 %v3060_v29, %v3059_v48  ;;  %v3125_v26 = vadd.f32 %v3124_v12, %v3123_v9  ;;  %v5262_v32 = vor.u32 %v6470_v56, %v5259_v45  ;;  %v7391_v37 = vld [vmem:[#allocation13 + $0x638] sm:$0xf0]  ;;  %v3062_v43 = vrot.slane %v7387_v44, 4  ;;  %v5753_v48 = vld [vmem:[#allocation16 + $0x10] sm:$0xf]  ;;  %vm3210_vm13 = vmor %vm3208_vm12, %vm3209_vm11 }
 0x2e7   :  { %3018 = vmatpush.bf16.msra.mxu0 %v5006_v35  ;;  %v3108_v46 = vmul.f32 %v7387_v44, %v7387_v44  ;;  %v7402_v1 = vpop.f32.mrf.mxu3  ;;  %v5518_v56 = vor.u32 %v7389_v36, %v7391_v37  ;;  %v5913_v45 = vld [vmem:[#allocation16 + $0x150] sm:$0xf]  ;;  %v5754_v17 = vor.u32 %v6598_v52, %v5753_v48  ;;  %v6616_v23 = vld [vmem:[#allocation16 + $0xa4] sm:$0xf0]  ;;  %v5745_v14 = vld [vmem:[#allocation16] sm:$0xf] }
 0x2e8   :  { %3040 = vmatpush.bf16.msra.mxu2 %v5646_v15  ;;  %v7378_v24 = vmul.f32 %v3061_v31, %v7159_v61  ;;  %v3163_v35 = vmul.f32 %v3125_v26, %v7159_v61  ;;  %v3063_v29 = vadd.f32 %v3062_v43, %v7387_v44  ;;  %v3186_v31 = vsub.f32 %v7335_v40, %v7351_v54  ;;  %v6596_v19 = vld [vmem:[#allocation16 + $0x4] sm:$0xf0]  ;;  %v5817_v4 = vld [vmem:[#allocation16 + $0x90] sm:$0xf]  ;;  %v6614_v7 = vld [vmem:[#allocation16 + $0x94] sm:$0xf0] }
 0x2e9   :  { %4150 = vmatpush.bf16.msra.mxu3 %v5794_v51  ;;  %v6600_v51 = vld [vmem:[#allocation16 + $0x24] sm:$0xf0]  ;;  %v3126_v9 = vrot.slane %v3108_v46, 4  ;;  %v5914_v26 = vor.u32 %v6638_v10, %v5913_v45  ;;  %v5746_v36 = vor.u32 %v6596_v19, %v5745_v14  ;;  %v5818_v52 = vor.u32 %v6614_v7, %v5817_v4  ;;  %v6674_v45 = vld [vmem:[#allocation16 + $0x274] sm:$0xf0] }
 0x2ea   :  { %3029 = vmatpush.bf16.msra.mxu1 %v5326_v42  ;;  %3019 = vmatmul.bf16.vlgmr.msra.gmra.mxu0 %v7286_v0  ;;  %v3204_v0 = vmul.f32 %v7370_v11, %v3203_v18  ;;  %v3171_v15 = vmul.f32 %v7378_v24, %v7378_v24  ;;  %v5762_v58 = vor.u32 %v6600_v51, %v5761_v49  ;;  %v3064_v12 = vrot.slane %v3063_v29, 2  ;;  %v6672_v14 = vld [vmem:[#allocation16 + $0x264] sm:$0xf0] }
 0x2eb   :  { %4162 = vmatpush.bf16.msrb.mxu0 %v5866_v62  ;;  %v5921_v62 = vld [vmem:[#allocation16 + $0x160] sm:$0xf]  ;;  %v2788_v16 = vpop.f32.mrf.mxu2  ;;  %v3319_v18 = vperm.slane %v7397_v60, 0  ;;  %v3187_v19 = vsub.f32 %v7357_v53, %v7378_v24  ;;  %v6628_v4 = vld [vmem:[#allocation16 + $0x104] sm:$0xf0] }
 0x2ec   :  { %3041 = vmatpush.bf16.msra.mxu2 %v5614_v2  ;;  %v3205_v39 = vmul.f32 0.5, %v3204_v0  ;;  %v3179_v42 = vsub.f32 %v3163_v35, %v3171_v15  ;;  %v7404_v2 = vpop.f32.mrf.mxu0  ;;  %v5922_v5 = vor.u32 %v6640_v41, %v5921_v62  ;;  %v3065_v40 = vadd.f32 %v3064_v12, %v3063_v29  ;;  %v5897_v62 = vld [vmem:[#allocation16 + $0x130] sm:$0xf]  ;;  %v6612_v29 = vld [vmem:[#allocation16 + $0x84] sm:$0xf0] }
 0x2ed   :  { %4151 = vmatpush.bf16.msra.mxu3 %v5786_v57  ;;  %v6632_v12 = vld [vmem:[#allocation16 + $0x124] sm:$0xf0]  ;;  %v2813_v53 = vadd.f32 %v7404_v2, %v7402_v1 }
 0x2ee   :  { %3030 = vmatpush.bf16.msra.mxu1 %v5294_v8  ;;  %v3206_v57 = vsub.f32 1.5, %v3205_v39  ;;  %v7399_v28 = vadd.f32 0.8, %v3179_v42  ;;  %v3292_v8 = vperm.slane %v7382_v30, 0  ;;  %v6656_v16 = vld [vmem:[#allocation16 + $0x1e4] sm:$0xf0] }
 0x2ef   :  { %4163 = vmatpush.bf16.msrb.mxu0 %v5858_v3  ;;  %v6618_v3 = vld [vmem:[#allocation16 + $0xb4] sm:$0xf0]  ;;  %v2801_v35 = vpop.f32.mrf.mxu3 }
 0x2f0   :  { %3042 = vmatpush.bf16.msra.mxu2 %v5582_v20  ;;  %v3207_v6 = vmul.f32 %v7370_v11, %v3206_v57  ;;  %6759 = vrsqrt.f32 %v7399_v28  ;;  %v5834_v20 = vor.u32 %v6618_v3, %v5833_v63  ;;  %v5993_v57 = vld [vmem:[#allocation16 + $0x1f0] sm:$0xf]  ;;  %v5809_v63 = vld [vmem:[#allocation16 + $0x80] sm:$0xf]  ;;  %vm3218_vm0 = vweird.f32 %v7399_v28 }
 0x2f1   :  { %4152 = vmatpush.bf16.msra.mxu3 %v5778_v13  ;;  %v3127_v13 = vadd.f32 %v3126_v9, %v3108_v46  ;;  %v6634_v46 = vld [vmem:[#allocation16 + $0x134] sm:$0xf0]  ;;  %v5889_v9 = vld [vmem:[#allocation16 + $0x120] sm:$0xf] }
 0x2f2   :  { %3031 = vmatpush.bf16.msra.mxu1 %v5262_v32  ;;  %v3211_v33 = vsel %vm3210_vm13, %v7370_v11, %v3207_v6  ;;  %v5905_v11 = vld [vmem:[#allocation16 + $0x140] sm:$0xf]  ;;  %v6636_v32 = vld [vmem:[#allocation16 + $0x144] sm:$0xf0]  ;;  %v7428_v48 = vpop.f32.mrf.mxu1  ;;  %v5898_v6 = vor.u32 %v6634_v46, %v5897_v62 }
 0x2f3   :  { %4164 = vmatpush.bf16.msrb.mxu0 %v5850_v21  ;;  %v3282_v21 = vmul.f32 %v3211_v33, %v3186_v31  ;;  %v3128_v54 = vrot.slane %v3127_v13, 2  ;;  %v5906_v39 = vor.u32 %v6636_v32, %v5905_v11  ;;  %v5985_v33 = vld [vmem:[#allocation16 + $0x1e0] sm:$0xf]  ;;  %v6654_v11 = vld [vmem:[#allocation16 + $0x1d4] sm:$0xf0] }
 0x2f4   :  { %3043 = vmatpush.bf16.msra.mxu2 %v5550_v47  ;;  %v2814_v15 = vpop.f32.mrf.mxu0  ;;  %v5873_v35 = vld [vmem:[#allocation16 + $0x100] sm:$0xf] }
 0x2f5   :  { %4153 = vmatpush.bf16.msra.mxu3 %v5770_v22  ;;  %3032 = vmatmul.bf16.vlgmr.msra.gmra.mxu1 %v7297_v55  ;;  %v3308_v0 = vmul.f32 %v3292_v8, %v3282_v21  ;;  %v3066_v55 = vrot.slane %v3065_v40, 1  ;;  %v3129_v27 = vadd.f32 %v3128_v54, %v3127_v13  ;;  %v5826_v22 = vor.u32 %v6616_v23, %v5825_v50  ;;  %v6630_v23 = vld [vmem:[#allocation16 + $0x114] sm:$0xf0]  ;;  %v6041_v15 = vld [vmem:[#allocation16 + $0x250] sm:$0xf] }
 0x2f6   :  { %4175 = vmatpush.bf16.msrb.mxu1 %v5930_v38  ;;  %v7419_v34 = vpop.eup %6759  ;;  %v5890_v50 = vor.u32 %v6632_v12, %v5889_v9  ;;  %v6650_v9 = vld [vmem:[#allocation16 + $0x1b4] sm:$0xf0]  ;;  %v6025_v12 = vld [vmem:[#allocation16 + $0x230] sm:$0xf] }
 0x2f7   :  { %4165 = vmatpush.bf16.msrb.mxu0 %v5842_v59  ;;  %v3067_v49 = vadd.f32 %v3066_v55, %v3065_v40  ;;  %v3130_v51 = vrot.slane %v3129_v27, 1  ;;  %v3335_v37 = vadd.f32 %v3319_v18, %v3308_v0  ;;  %v3213_v38 = vmul.f32 %v7419_v34, %v7399_v28  ;;  %v5881_v40 = vld [vmem:[#allocation16 + $0x110] sm:$0xf] }
 0x2f8   :  { %3044 = vmatpush.bf16.msra.mxu2 %v5518_v56  ;;  %v6057_v56 = vld [vmem:[#allocation16 + $0x270] sm:$0xf]  ;;  %vm3219_vm15 = vweird.f32 %v7419_v34  ;;  %v5810_v18 = vor.u32 %v6612_v29, %v5809_v63  ;;  %v3293_v0 = vperm.slane %v7382_v30, 1  ;;  %v5882_v24 = vor.u32 %v6630_v23, %v5881_v40 }
 0x2f9   :  { %4154 = vmatpush.bf16.msra.mxu3 %v5762_v58  ;;  %v7425_v41 = vmul.f32 %v3067_v49, %v7159_v61  ;;  %v3131_v42 = vadd.f32 %v3130_v51, %v3129_v27  ;;  %vm3343_vm14 = vcmp.gt.f32.partialorder %v3335_v37, 0.0  ;;  %v3351_v43 = vmul.f32 0.2, %v3335_v37  ;;  %v6658_v58 = vld [vmem:[#allocation16 + $0x1f4] sm:$0xf0]  ;;  %vm3220_vm1 = vmor %vm3218_vm0, %vm3219_vm15 }
 0x2fa   :  { %4176 = vmatpush.bf16.msrb.mxu1 %v5922_v5  ;;  %v3214_v47 = vmul.f32 %v7419_v34, %v3213_v38  ;;  %v5994_v8 = vor.u32 %v6658_v58, %v5993_v57  ;;  %v6058_v13 = vor.u32 %v6674_v45, %v6057_v56  ;;  %v5977_v27 = vld [vmem:[#allocation16 + $0x1d0] sm:$0xf]  ;;  %v2827_v32 = vpop.f32.mrf.mxu1  ;;  %v3320_v51 = vperm.slane %v7397_v60, 1  ;;  %v6652_v38 = vld [vmem:[#allocation16 + $0x1c4] sm:$0xf0] }
 0x2fb   :  { %4166 = vmatpush.bf16.msrb.mxu0 %v5834_v20  ;;  %3045 = vmatmul.bf16.vlgmr.msra.gmra.mxu2 %v7301_v25  ;;  %v3164_v59 = vmul.f32 %v3131_v42, %v7159_v61  ;;  %v3172_v25 = vmul.f32 %v7425_v41, %v7425_v41  ;;  %v3359_v5 = vsel %vm3343_vm14, %v3335_v37, %v3351_v43  ;;  %v6668_v57 = vld [vmem:[#allocation16 + $0x244] sm:$0xf0]  ;;  %v5945_v32 = vld [vmem:[#allocation16 + $0x190] sm:$0xf] }
 0x2fc   :  { %v3215_v3 = vmul.f32 0.5, %v3214_v47  ;;  %v7434_v31 = vpack.c.bf16 %v3359_v5, %v3359_v5  ;;  %4188 = vmatpush.bf16.msrb.mxu2 %v5994_v8  ;;  %v5986_v20 = vor.u32 %v6656_v16, %v5985_v33  ;;  %v5874_v47 = vor.u32 %v6628_v4, %v5873_v35 }
 0x2fd   :  { %4155 = vmatpush.bf16.msra.mxu3 %v5754_v17  ;;  %v3180_v10 = vsub.f32 %v3164_v59, %v3172_v25  ;;  %v5961_v25 = vld [vmem:[#allocation16 + $0x1b0] sm:$0xf]  ;;  %v3321_v35 = vperm.slane %v7397_v60, 2 }
 0x2fe   :  { %4177 = vmatpush.bf16.msrb.mxu1 %v5914_v26  ;;  %v3216_v17 = vsub.f32 1.5, %v3215_v3  ;;  %v6049_v26 = vld [vmem:[#allocation16 + $0x260] sm:$0xf]  ;;  %v2838_v43 = vpop.f32.mrf.mxu2  ;;  %v5962_v5 = vor.u32 %v6650_v9, %v5961_v25  ;;  %v6609_v9 = vld [vmem:[#allocation16 + $0x74] sm:$0xf] }
 0x2ff   :  { %4167 = vmatpush.bf16.msrb.mxu0 %v5826_v22  ;;  %v7437_v21 = vadd.f32 0.8, %v3180_v10  ;;  %v6050_v55 = vor.u32 %v6672_v14, %v6049_v26  ;;  %v5978_v22 = vor.u32 %v6654_v11, %v5977_v27  ;;  %v3188_v27 = vsub.f32 %v7387_v44, %v7425_v41  ;;  %v6009_v44 = vld [vmem:[#allocation16 + $0x210] sm:$0xf]  ;;  %v6662_v41 = vld [vmem:[#allocation16 + $0x214] sm:$0xf0] }
 0x300   :  { %v3217_v54 = vmul.f32 %v7419_v34, %v3216_v17  ;;  %4189 = vmatpush.bf16.msrb.mxu2 %v5986_v20  ;;  %v5953_v17 = vld [vmem:[#allocation16 + $0x1a0] sm:$0xf]  ;;  %v3294_v11 = vperm.slane %v7382_v30, 2 }
 0x301   :  { %4156 = vmatpush.bf16.msra.mxu3 %v5746_v36  ;;  %6761 = vrsqrt.f32 %v7437_v21  ;;  %v6670_v36 = vld [vmem:[#allocation16 + $0x254] sm:$0xf0]  ;;  %vm3228_vm4 = vweird.f32 %v7437_v21 }
 0x302   :  { %4178 = vmatpush.bf16.msrb.mxu1 %v5906_v39  ;;  %v3221_v28 = vsel %vm3220_vm1, %v7419_v34, %v3217_v54  ;;  %v6042_v7 = vor.u32 %v6670_v36, %v6041_v15  ;;  %v5969_v34 = vld [vmem:[#allocation16 + $0x1c0] sm:$0xf]  ;;  %v2826_v39 = vadd.f32 %v7428_v48, %v2813_v53 }
 0x303   :  { %4168 = vmatpush.bf16.msrb.mxu0 %v5818_v52  ;;  %v3283_v49 = vmul.f32 %v3221_v28, %v3187_v19  ;;  %v5970_v62 = vor.u32 %v6652_v38, %v5969_v34  ;;  %v6033_v52 = vld [vmem:[#allocation16 + $0x240] sm:$0xf]  ;;  %v6010_v34 = vor.u32 %v6662_v41, %v6009_v44 }
 0x304   :  { %4157 = vmatmul.bf16.vlgmr.msra.gmra.mxu3 %v7434_v31  ;;  %4190 = vmatpush.bf16.msrb.mxu2 %v5978_v22  ;;  %v7454_v2 = vadd.f32 %v2838_v43, %v2826_v39  ;;  %v6034_v59 = vor.u32 %v6668_v57, %v6033_v52  ;;  %v6646_v22 = vld [vmem:[#allocation16 + $0x194] sm:$0xf0]  ;;  %v5937_v38 = vld [vmem:[#allocation16 + $0x180] sm:$0xf]  ;;  %v6644_v39 = vld [vmem:[#allocation16 + $0x184] sm:$0xf0] }
 0x305   :  { %4201 = vmatpush.bf16.msrb.mxu3 %v6058_v13  ;;  %v3309_v37 = vmul.f32 %v3293_v0, %v3283_v49  ;;  %v6666_v13 = vld [vmem:[#allocation16 + $0x234] sm:$0xf0]  ;;  %v6017_v0 = vld [vmem:[#allocation16 + $0x220] sm:$0xf]  ;;  %v5938_v43 = vor.u32 %v6644_v39, %v5937_v38  ;;  %v6601_v39 = vld [vmem:[#allocation16 + $0x34] sm:$0xf] }
 0x306   :  { %4179 = vmatpush.bf16.msrb.mxu1 %v5898_v6  ;;  %v3068_v48 = vrot.slane %v7454_v2, 4  ;;  %v3109_v29 = vmul.f32 %v7454_v2, %v7454_v2  ;;  %v6026_v16 = vor.u32 %v6666_v13, %v6025_v12  ;;  %v6001_v57 = vld [vmem:[#allocation16 + $0x200] sm:$0xf] }
 0x307   :  { %4169 = vmatpush.bf16.msrb.mxu0 %v5810_v18  ;;  %v6762_v42 = vpop.eup %6761  ;;  %v3336_v46 = vadd.f32 %v3320_v51, %v3309_v37  ;;  %v7460_v45 = vpop.f32.mrf.mxu0  ;;  %v6648_v18 = vld [vmem:[#allocation16 + $0x1a4] sm:$0xf0]  ;;  %v6113_v13 = vld [vmem:[#allocation16 + $0x2e0] sm:$0xf] }
 0x308   :  { %v3223_v1 = vmul.f32 %v6762_v42, %v7437_v21  ;;  %4191 = vmatpush.bf16.msrb.mxu2 %v5970_v62  ;;  %v3069_v8 = vadd.f32 %v3068_v48, %v7454_v2  ;;  %v3132_v56 = vrot.slane %v3109_v29, 4  ;;  %v7464_v33 = vpop.f32.mrf.mxu3  ;;  %vm3229_vm3 = vweird.f32 %v6762_v42 }
 0x309   :  { %4202 = vmatpush.bf16.msrb.mxu3 %v6050_v55  ;;  %vm3344_vm2 = vcmp.gt.f32.partialorder %v3336_v46, 0.0  ;;  %v3352_v58 = vmul.f32 0.2, %v3336_v46  ;;  %v5954_v23 = vor.u32 %v6648_v18, %v5953_v17  ;;  %v6664_v55 = vld [vmem:[#allocation16 + $0x224] sm:$0xf0]  ;;  %vm3230_vm5 = vmor %vm3228_vm4, %vm3229_vm3  ;;  %v5946_v21 = vor.u32 %v6646_v22, %v5945_v32 }
 0x30a   :  { %4180 = vmatpush.bf16.msrb.mxu1 %v5890_v50  ;;  %v3224_v63 = vmul.f32 %v6762_v42, %v3223_v1  ;;  %v3070_v40 = vrot.slane %v3069_v8, 2  ;;  %v3133_v54 = vadd.f32 %v3132_v56, %v3109_v29  ;;  %v2840_v50 = vpop.f32.mrf.mxu2  ;;  %v6018_v28 = vor.u32 %v6664_v55, %v6017_v0  ;;  %v6690_v29 = vld [vmem:[#allocation16 + $0x2f4] sm:$0xf0]  ;;  %v6607_v17 = vld [vmem:[#allocation16 + $0x64] sm:$0xf] }
 0x30b   :  { %v3360_v3 = vsel %vm3344_vm2, %v3336_v46, %v3352_v58  ;;  %v6660_v58 = vld [vmem:[#allocation16 + $0x204] sm:$0xf0]  ;;  %v2865_v50 = vadd.f32 %v7460_v45, %v7464_v33  ;;  %v5787_v0 = vld [vmem:[#allocation16 + $0x58] sm:$0xf0]  ;;  %v6603_v45 = vld [vmem:[#allocation16 + $0x44] sm:$0xf] }
 0x30c   :  { %v3225_v6 = vmul.f32 0.5, %v3224_v63  ;;  %v7462_v10 = vpack.c.bf16 %v3360_v3, %v3360_v3  ;;  %4192 = vmatpush.bf16.msrb.mxu2 %v5962_v5  ;;  %v3071_v14 = vadd.f32 %v3070_v40, %v3069_v8  ;;  %v3134_v19 = vrot.slane %v3133_v54, 2  ;;  %v6121_v63 = vld [vmem:[#allocation16 + $0x2f0] sm:$0xf]  ;;  %v5803_v3 = vld [vmem:[#allocation16 + $0x78] sm:$0xf0] }
 0x30d   :  { %4203 = vmatpush.bf16.msrb.mxu3 %v6042_v7  ;;  %v6002_v25 = vor.u32 %v6660_v58, %v6001_v57  ;;  %v5806_v8 = vor.u32 %v6609_v9, %v5803_v3  ;;  %v6599_v3 = vld [vmem:[#allocation16 + $0x24] sm:$0xf] }
 0x30e   :  { %4181 = vmatpush.bf16.msrb.mxu1 %v5882_v24  ;;  %v3226_v20 = vsub.f32 1.5, %v3225_v6  ;;  %4170 = vmatmul.bf16.vlgmr.msrb.gmra.mxu0 %v7462_v10  ;;  %v3072_v51 = vrot.slane %v3071_v14, 1  ;;  %v3135_v53 = vadd.f32 %v3134_v19, %v3133_v54  ;;  %v6122_v6 = vor.u32 %v6690_v29, %v6121_v63  ;;  %v6680_v63 = vld [vmem:[#allocation16 + $0x2a4] sm:$0xf0] }
 0x30f   :  { %v2866_v37 = vpop.f32.mrf.mxu0  ;;  %v3295_v29 = vperm.slane %v7382_v30, 3 }
 0x310   :  { %v3227_v26 = vmul.f32 %v6762_v42, %v3226_v20  ;;  %4193 = vmatpush.bf16.msrb.mxu2 %v5954_v23  ;;  %v3073_v15 = vadd.f32 %v3072_v51, %v3071_v14  ;;  %v3136_v36 = vrot.slane %v3135_v53, 1  ;;  %v2853_v7 = vpop.f32.mrf.mxu3  ;;  %4214 = vmatpush.bf16.msra.mxu0 %v6122_v6  ;;  %v5795_v20 = vld [vmem:[#allocation16 + $0x68] sm:$0xf0]  ;;  %v6105_v23 = vld [vmem:[#allocation16 + $0x2d0] sm:$0xf] }
 0x311   :  { %4204 = vmatpush.bf16.msrb.mxu3 %v6034_v59  ;;  %v5798_v54 = vor.u32 %v6607_v17, %v5795_v20  ;;  %v6605_v14 = vld [vmem:[#allocation16 + $0x54] sm:$0xf]  ;;  %v6684_v51 = vld [vmem:[#allocation16 + $0x2c4] sm:$0xf0]  ;;  %v6682_v7 = vld [vmem:[#allocation16 + $0x2b4] sm:$0xf0] }
 0x312   :  { %4182 = vmatpush.bf16.msrb.mxu1 %v5874_v47  ;;  %v3231_v49 = vsel %vm3230_vm5, %v6762_v42, %v3227_v26  ;;  %v7474_v62 = vmul.f32 %v3073_v15, %v7159_v61  ;;  %v3137_v42 = vadd.f32 %v3136_v36, %v3135_v53  ;;  %v2877_v46 = vpop.f32.mrf.mxu1  ;;  %v6686_v26 = vld [vmem:[#allocation16 + $0x2d4] sm:$0xf0]  ;;  %v5779_v53 = vld [vmem:[#allocation16 + $0x48] sm:$0xf0]  ;;  %v3322_v17 = vperm.slane %v7397_v60, 3 }
 0x313   :  { %v3284_v24 = vmul.f32 %v3231_v49, %v3188_v27  ;;  %v6106_v19 = vor.u32 %v6686_v26, %v6105_v23  ;;  %v2878_v55 = vadd.f32 %v2877_v46, %v2865_v50  ;;  %v5790_v27 = vor.u32 %v6605_v14, %v5787_v0  ;;  %v6097_v49 = vld [vmem:[#allocation16 + $0x2c0] sm:$0xf]  ;;  %v6597_v26 = vld [vmem:[#allocation16 + $0x14] sm:$0xf]  ;;  %v5755_v14 = vld [vmem:[#allocation16 + $0x18] sm:$0xf0] }
 0x314   :  { %4194 = vmatpush.bf16.msrb.mxu2 %v5946_v21  ;;  %v3165_v47 = vmul.f32 %v3137_v42, %v7159_v61  ;;  %v3173_v52 = vmul.f32 %v7474_v62, %v7474_v62  ;;  %v6098_v33 = vor.u32 %v6684_v51, %v6097_v49  ;;  %v5782_v15 = vor.u32 %v6603_v45, %v5779_v53  ;;  %v5771_v42 = vld [vmem:[#allocation16 + $0x38] sm:$0xf0]  ;;  %v6065_v49 = vld [vmem:[#allocation16 + $0x280] sm:$0xf]  ;;  %v6676_v51 = vld [vmem:[#allocation16 + $0x284] sm:$0xf0] }
 0x315   :  { %4205 = vmatpush.bf16.msrb.mxu3 %v6026_v16  ;;  %v3310_v4 = vmul.f32 %v3294_v11, %v3284_v24  ;;  %v6688_v16 = vld [vmem:[#allocation16 + $0x2e4] sm:$0xf0]  ;;  %v6595_v45 = vld [vmem:[#allocation16 + $0x4] sm:$0xf]  ;;  %v6066_v53 = vor.u32 %v6676_v51, %v6065_v49 }
 0x316   :  { %v3181_v48 = vsub.f32 %v3165_v47, %v3173_v52  ;;  %v6114_v18 = vor.u32 %v6688_v16, %v6113_v13  ;;  %v5774_v52 = vor.u32 %v6601_v39, %v5771_v42 }
 0x317   :  { %v3337_v1 = vadd.f32 %v3321_v35, %v3310_v4  ;;  %v6089_v4 = vld [vmem:[#allocation16 + $0x2b0] sm:$0xf] }
 0x318   :  { %4195 = vmatpush.bf16.msrb.mxu2 %v5938_v43  ;;  %v7479_v56 = vadd.f32 0.8, %v3181_v48  ;;  %4215 = vmatpush.bf16.msra.mxu0 %v6114_v18  ;;  %v6090_v38 = vor.u32 %v6682_v7, %v6089_v4  ;;  %v3189_v48 = vsub.f32 %v7454_v2, %v7474_v62  ;;  %v6678_v2 = vld [vmem:[#allocation16 + $0x294] sm:$0xf0]  ;;  %v5867_v7 = vld [vmem:[#allocation16 + $0xf8] sm:$0xf0] }
 0x319   :  { %4206 = vmatpush.bf16.msrb.mxu3 %v6018_v28  ;;  %vm3345_vm6 = vcmp.gt.f32.partialorder %v3337_v1, 0.0  ;;  %v3353_v59 = vmul.f32 0.2, %v3337_v1 }
 0x31a   :  { %6763 = vrsqrt.f32 %v7479_v56  ;;  %v2879_v40 = vpop.f32.mrf.mxu1  ;;  %vm3238_vm8 = vweird.f32 %v7479_v56 }
 0x31b   :  { %v3361_v5 = vsel %vm3345_vm6, %v3337_v1, %v3353_v59 }
 0x31c   :  { %v7481_v12 = vpack.c.bf16 %v3361_v5, %v3361_v5  ;;  %4216 = vmatpush.bf16.msra.mxu0 %v6106_v19  ;;  %v5763_v5 = vld [vmem:[#allocation16 + $0x28] sm:$0xf0] }
 0x31d   :  { %4207 = vmatpush.bf16.msrb.mxu3 %v6010_v34  ;;  %v5766_v16 = vor.u32 %v6599_v3, %v5763_v5 }
 0x31e   :  { %4183 = vmatmul.bf16.vlgmr.msrb.gmra.mxu1 %v7481_v12  ;;  %v2890_v28 = vpop.f32.mrf.mxu2 }
 0x31f   :  { %v7488_v22 = vadd.f32 %v2890_v28, %v2878_v55  ;;  %v5758_v55 = vor.u32 %v6597_v26, %v5755_v14  ;;  %v6153_v14 = vld [vmem:[#allocation16 + $0x330] sm:$0xf] }
 0x320   :  { %v6764_v11 = vpop.eup %6763  ;;  %4217 = vmatpush.bf16.msra.mxu0 %v6098_v33 }
 0x321   :  { %4208 = vmatpush.bf16.msrb.mxu3 %v6002_v25  ;;  %v3233_v32 = vmul.f32 %v6764_v11, %v7479_v56  ;;  %v3074_v24 = vrot.slane %v7488_v22, 4  ;;  %v3110_v35 = vmul.f32 %v7488_v22, %v7488_v22  ;;  %vm3239_vm7 = vweird.f32 %v6764_v11  ;;  %v6081_v25 = vld [vmem:[#allocation16 + $0x2a0] sm:$0xf] }
 0x322   :  { %vm3240_vm9 = vmor %vm3238_vm8, %vm3239_vm7  ;;  %v6082_v9 = vor.u32 %v6680_v63, %v6081_v25  ;;  %v6169_v25 = vld [vmem:[#allocation16 + $0x350] sm:$0xf]  ;;  %v6702_v63 = vld [vmem:[#allocation16 + $0x354] sm:$0xf0] }
 0x323   :  { %v3234_v21 = vmul.f32 %v6764_v11, %v3233_v32  ;;  %v3075_v37 = vadd.f32 %v3074_v24, %v7488_v22  ;;  %v3138_v44 = vrot.slane %v3110_v35, 4 }
 0x324   :  { %4218 = vmatpush.bf16.msra.mxu0 %v6090_v38 }
 0x325   :  { %4253 = vmatpush.bf16.msra.mxu3 %v5806_v8  ;;  %v3235_v36 = vmul.f32 0.5, %v3234_v21  ;;  %v3076_v46 = vrot.slane %v3075_v37, 2  ;;  %v3139_v1 = vadd.f32 %v3138_v44, %v3110_v35  ;;  %v5747_v21 = vld [vmem:[#allocation16 + $0x8] sm:$0xf0] }
 0x326   :  { %v2892_v47 = vpop.f32.mrf.mxu2  ;;  %v5750_v35 = vor.u32 %v6595_v45, %v5747_v21 }
 0x327   :  { %v7494_v41 = vpop.f32.mrf.mxu0  ;;  %v7496_v34 = vpop.f32.mrf.mxu3  ;;  %v3236_v43 = vsub.f32 1.5, %v3235_v36  ;;  %v3077_v58 = vadd.f32 %v3076_v46, %v3075_v37  ;;  %v3140_v59 = vrot.slane %v3139_v1, 2  ;;  %v6706_v36 = vld [vmem:[#allocation16 + $0x374] sm:$0xf0]  ;;  %v6625_v37 = vld [vmem:[#allocation16 + $0xf4] sm:$0xf] }
 0x328   :  { %4219 = vmatpush.bf16.msra.mxu0 %v6082_v9  ;;  %v5870_v42 = vor.u32 %v6625_v37, %v5867_v7  ;;  %v6704_v46 = vld [vmem:[#allocation16 + $0x364] sm:$0xf0]  ;;  %v5851_v9 = vld [vmem:[#allocation16 + $0xd8] sm:$0xf0]  ;;  %v3296_v37 = vperm.slane %v7382_v30, 4 }
 0x329   :  { %4254 = vmatpush.bf16.msra.mxu3 %v5798_v54  ;;  %v3237_v57 = vmul.f32 %v6764_v11, %v3236_v43  ;;  %v3078_v8 = vrot.slane %v3077_v58, 1  ;;  %v3141_v13 = vadd.f32 %v3140_v59, %v3139_v1  ;;  %v6073_v54 = vld [vmem:[#allocation16 + $0x290] sm:$0xf]  ;;  %v6177_v43 = vld [vmem:[#allocation16 + $0x360] sm:$0xf]  ;;  %v2917_v59 = vadd.f32 %v7494_v41, %v7496_v34 }
 0x32a   :  { %v6074_v23 = vor.u32 %v6678_v2, %v6073_v54  ;;  %v6623_v1 = vld [vmem:[#allocation16 + $0xe4] sm:$0xf]  ;;  %v6178_v47 = vor.u32 %v6704_v46, %v6177_v43  ;;  %v5843_v34 = vld [vmem:[#allocation16 + $0xc8] sm:$0xf0] }
 0x32b   :  { %v3241_v6 = vsel %vm3240_vm9, %v6764_v11, %v3237_v57  ;;  %v3079_v18 = vadd.f32 %v3078_v8, %v3077_v58  ;;  %v3142_v20 = vrot.slane %v3141_v13, 1  ;;  %v5827_v7 = vld [vmem:[#allocation16 + $0xa8] sm:$0xf0] }
 0x32c   :  { %v3285_v56 = vmul.f32 %v3241_v6, %v3189_v48  ;;  %4220 = vmatpush.bf16.msra.mxu0 %v6074_v23  ;;  %v6621_v48 = vld [vmem:[#allocation16 + $0xd4] sm:$0xf] }
 0x32d   :  { %4255 = vmatpush.bf16.msra.mxu3 %v5790_v27  ;;  %v7504_v19 = vmul.f32 %v3079_v18, %v7159_v61  ;;  %v3143_v0 = vadd.f32 %v3142_v20, %v3141_v13  ;;  %v5854_v5 = vor.u32 %v6621_v48, %v5851_v9  ;;  %v6619_v18 = vld [vmem:[#allocation16 + $0xc4] sm:$0xf]  ;;  %v5819_v48 = vld [vmem:[#allocation16 + $0x98] sm:$0xf0] }
 0x32e   :  { %v3311_v62 = vmul.f32 %v3295_v29, %v3285_v56  ;;  %v6170_v29 = vor.u32 %v6702_v63, %v6169_v25  ;;  %v6161_v56 = vld [vmem:[#allocation16 + $0x340] sm:$0xf]  ;;  %v5846_v2 = vor.u32 %v6619_v18, %v5843_v34  ;;  %v6613_v63 = vld [vmem:[#allocation16 + $0x94] sm:$0xf]  ;;  %v6692_v18 = vld [vmem:[#allocation16 + $0x304] sm:$0xf0] }
 0x32f   :  { %v2918_v40 = vpop.f32.mrf.mxu0  ;;  %v2905_v50 = vpop.f32.mrf.mxu3  ;;  %v3166_v28 = vmul.f32 %v3143_v0, %v7159_v61  ;;  %v3174_v32 = vmul.f32 %v7504_v19, %v7504_v19  ;;  %v6698_v0 = vld [vmem:[#allocation16 + $0x334] sm:$0xf0] }
 0x330   :  { %v3338_v11 = vadd.f32 %v3322_v17, %v3311_v62  ;;  %4221 = vmatpush.bf16.msra.mxu0 %v6066_v53  ;;  %v6700_v17 = vld [vmem:[#allocation16 + $0x344] sm:$0xf0] }
 0x331   :  { %4256 = vmatpush.bf16.msra.mxu3 %v5782_v15  ;;  %v3182_v24 = vsub.f32 %v3166_v28, %v3174_v32  ;;  %v6185_v15 = vld [vmem:[#allocation16 + $0x370] sm:$0xf]  ;;  %v6162_v41 = vor.u32 %v6700_v17, %v6161_v56  ;;  %v5835_v28 = vld [vmem:[#allocation16 + $0xb8] sm:$0xf0]  ;;  %v6129_v17 = vld [vmem:[#allocation16 + $0x300] sm:$0xf] }
 0x332   :  { %v2929_v27 = vpop.f32.mrf.mxu1  ;;  %vm3346_vm10 = vcmp.gt.f32.partialorder %v3338_v11, 0.0  ;;  %v3354_v33 = vmul.f32 0.2, %v3338_v11  ;;  %v6186_v4 = vor.u32 %v6706_v36, %v6185_v15  ;;  %v6696_v15 = vld [vmem:[#allocation16 + $0x324] sm:$0xf0]  ;;  %v3190_v36 = vsub.f32 %v7488_v22, %v7504_v19 }
 0x333   :  { %v7509_v38 = vadd.f32 0.8, %v3182_v24  ;;  %v2930_v3 = vadd.f32 %v2929_v27, %v2917_v59  ;;  %v6154_v27 = vor.u32 %v6698_v0, %v6153_v14  ;;  %v6137_v59 = vld [vmem:[#allocation16 + $0x310] sm:$0xf]  ;;  %v6694_v22 = vld [vmem:[#allocation16 + $0x314] sm:$0xf0] }
 0x334   :  { %v3362_v44 = vsel %vm3346_vm10, %v3338_v11, %v3354_v33  ;;  %4227 = vmatpush.bf16.msra.mxu1 %v6186_v4  ;;  %4266 = vmatpush.bf16.msrb.mxu0 %v5870_v42  ;;  %v6617_v11 = vld [vmem:[#allocation16 + $0xb4] sm:$0xf]  ;;  %v6615_v4 = vld [vmem:[#allocation16 + $0xa4] sm:$0xf]  ;;  %v6138_v30 = vor.u32 %v6694_v22, %v6137_v59  ;;  %v6722_v14 = vld [vmem:[#allocation16 + $0x3f4] sm:$0xf0] }
 0x335   :  { %4257 = vmatpush.bf16.msra.mxu3 %v5774_v52  ;;  %v7511_v39 = vpack.c.bf16 %v3362_v44, %v3362_v44  ;;  %6765 = vrsqrt.f32 %v7509_v38  ;;  %v5859_v52 = vld [vmem:[#allocation16 + $0xe8] sm:$0xf0]  ;;  %v5838_v33 = vor.u32 %v6617_v11, %v5835_v28  ;;  %vm3248_vm12 = vweird.f32 %v7509_v38  ;;  %v6641_v0 = vld [vmem:[#allocation16 + $0x174] sm:$0xf]  ;;  %v6667_v22 = vld [vmem:[#allocation16 + $0x244] sm:$0xf] }
 0x336   :  { %v5862_v58 = vor.u32 %v6623_v1, %v5859_v52 }
 0x337   :  { %4196 = vmatmul.bf16.vlgmr.msrb.gmra.mxu2 %v7511_v39 }
 0x338   :  { %4228 = vmatpush.bf16.msra.mxu1 %v6178_v47  ;;  %4267 = vmatpush.bf16.msrb.mxu0 %v5862_v58  ;;  %v5830_v47 = vor.u32 %v6615_v4, %v5827_v7  ;;  %v6043_v4 = vld [vmem:[#allocation16 + $0x258] sm:$0xf0] }
 0x339   :  { %4258 = vmatpush.bf16.msra.mxu3 %v5766_v16 }
 0x33a   :  { %v2931_v57 = vpop.f32.mrf.mxu1 }
 0x33b   :  { %v6766_v6 = vpop.eup %6765 }
 0x33c   :  { %v3243_v13 = vmul.f32 %v6766_v6, %v7509_v38  ;;  %4229 = vmatpush.bf16.msra.mxu1 %v6170_v29  ;;  %4268 = vmatpush.bf16.msrb.mxu0 %v5854_v5  ;;  %vm3249_vm11 = vweird.f32 %v6766_v6  ;;  %v3323_v38 = vperm.slane %v7397_v60, 4 }
 0x33d   :  { %4259 = vmatpush.bf16.msra.mxu3 %v5758_v55  ;;  %vm3250_vm13 = vmor %vm3248_vm12, %vm3249_vm11 }
 0x33e   :  { %v2942_v8 = vpop.f32.mrf.mxu2  ;;  %v3244_v20 = vmul.f32 %v6766_v6, %v3243_v13 }
 0x33f   :  { %v7518_v16 = vadd.f32 %v2942_v8, %v2930_v3  ;;  %v5822_v3 = vor.u32 %v6613_v63, %v5819_v48  ;;  %v6059_v8 = vld [vmem:[#allocation16 + $0x278] sm:$0xf0]  ;;  %v6635_v63 = vld [vmem:[#allocation16 + $0x144] sm:$0xf] }
 0x340   :  { %v3245_v62 = vmul.f32 0.5, %v3244_v20  ;;  %4230 = vmatpush.bf16.msra.mxu1 %v6162_v41  ;;  %4269 = vmatpush.bf16.msrb.mxu0 %v5846_v2  ;;  %v6611_v41 = vld [vmem:[#allocation16 + $0x84] sm:$0xf]  ;;  %v6130_v20 = vor.u32 %v6692_v18, %v6129_v17 }
 0x341   :  { %4260 = vmatpush.bf16.msra.mxu3 %v5750_v35  ;;  %v3080_v40 = vrot.slane %v7518_v16, 4  ;;  %v3111_v54 = vmul.f32 %v7518_v16, %v7518_v16  ;;  %v6145_v35 = vld [vmem:[#allocation16 + $0x320] sm:$0xf] }
 0x342   :  { %v3246_v32 = vsub.f32 1.5, %v3245_v62  ;;  %v6146_v44 = vor.u32 %v6696_v15, %v6145_v35  ;;  %v6249_v62 = vld [vmem:[#allocation16 + $0x3f0] sm:$0xf]  ;;  %v5923_v35 = vld [vmem:[#allocation16 + $0x168] sm:$0xf0] }
 0x343   :  { %v3081_v50 = vadd.f32 %v3080_v40, %v7518_v16  ;;  %v3144_v23 = vrot.slane %v3111_v54, 4  ;;  %v5811_v40 = vld [vmem:[#allocation16 + $0x88] sm:$0xf0] }
 0x344   :  { %v3247_v53 = vmul.f32 %v6766_v6, %v3246_v32  ;;  %4231 = vmatpush.bf16.msra.mxu1 %v6154_v27  ;;  %4270 = vmatpush.bf16.msrb.mxu0 %v5838_v33  ;;  %v5814_v2 = vor.u32 %v6611_v41, %v5811_v40  ;;  %v5931_v27 = vld [vmem:[#allocation16 + $0x178] sm:$0xf0]  ;;  %v6671_v32 = vld [vmem:[#allocation16 + $0x264] sm:$0xf]  ;;  %v6241_v33 = vld [vmem:[#allocation16 + $0x3e0] sm:$0xf] }
 0x345   :  { %v3082_v49 = vrot.slane %v3081_v50, 2  ;;  %v3145_v51 = vadd.f32 %v3144_v23, %v3111_v54 }
 0x346   :  { %v2944_v45 = vpop.f32.mrf.mxu2  ;;  %v3251_v42 = vsel %vm3250_vm13, %v6766_v6, %v3247_v53  ;;  %v6673_v6 = vld [vmem:[#allocation16 + $0x274] sm:$0xf]  ;;  %v6720_v53 = vld [vmem:[#allocation16 + $0x3e4] sm:$0xf0] }
 0x347   :  { %v7524_v26 = vpop.f32.mrf.mxu0  ;;  %v7526_v55 = vpop.f32.mrf.mxu3  ;;  %v3083_v21 = vadd.f32 %v3082_v49, %v3081_v50  ;;  %v3146_v24 = vrot.slane %v3145_v51, 2  ;;  %v3286_v1 = vmul.f32 %v3251_v42, %v3190_v36  ;;  %v6062_v23 = vor.u32 %v6673_v6, %v6059_v8  ;;  %v6051_v49 = vld [vmem:[#allocation16 + $0x268] sm:$0xf0]  ;;  %v6233_v42 = vld [vmem:[#allocation16 + $0x3d0] sm:$0xf] }
 0x348   :  { %4232 = vmatpush.bf16.msra.mxu1 %v6146_v44  ;;  %4271 = vmatpush.bf16.msrb.mxu0 %v5830_v47  ;;  %v5934_v45 = vor.u32 %v6641_v0, %v5931_v27  ;;  %v6054_v36 = vor.u32 %v6671_v32, %v6051_v49  ;;  %v6669_v44 = vld [vmem:[#allocation16 + $0x254] sm:$0xf]  ;;  %v2969_v7 = vadd.f32 %v7524_v26, %v7526_v55  ;;  %v6225_v55 = vld [vmem:[#allocation16 + $0x3c0] sm:$0xf]  ;;  %v6663_v49 = vld [vmem:[#allocation16 + $0x224] sm:$0xf] }
 0x349   :  { %v3084_v43 = vrot.slane %v3083_v21, 1  ;;  %v3147_v46 = vadd.f32 %v3146_v24, %v3145_v51  ;;  %v3312_v19 = vmul.f32 %v3296_v37, %v3286_v1  ;;  %v6250_v51 = vor.u32 %v6722_v14, %v6249_v62  ;;  %v6665_v8 = vld [vmem:[#allocation16 + $0x234] sm:$0xf] }
 0x34a   :  { %v6242_v24 = vor.u32 %v6720_v53, %v6241_v33 }
 0x34b   :  { %v3085_v52 = vadd.f32 %v3084_v43, %v3083_v21  ;;  %v3148_v57 = vrot.slane %v3147_v46, 1  ;;  %v3339_v60 = vadd.f32 %v3323_v38, %v3312_v19  ;;  %v6639_v21 = vld [vmem:[#allocation16 + $0x164] sm:$0xf]  ;;  %4240 = vmatpush.bf16.msra.mxu2 %v6250_v51  ;;  %v6718_v43 = vld [vmem:[#allocation16 + $0x3d4] sm:$0xf0] }
 0x34c   :  { %4233 = vmatpush.bf16.msra.mxu1 %v6138_v30  ;;  %4272 = vmatpush.bf16.msrb.mxu0 %v5822_v3  ;;  %v5926_v37 = vor.u32 %v6639_v21, %v5923_v35  ;;  %v6234_v1 = vor.u32 %v6718_v43, %v6233_v42  ;;  %v5915_v38 = vld [vmem:[#allocation16 + $0x158] sm:$0xf0]  ;;  %v6035_v19 = vld [vmem:[#allocation16 + $0x248] sm:$0xf0]  ;;  %v6716_v30 = vld [vmem:[#allocation16 + $0x3c4] sm:$0xf0] }
 0x34d   :  { %v7534_v29 = vmul.f32 %v3085_v52, %v7159_v61  ;;  %v3149_v9 = vadd.f32 %v3148_v57, %v3147_v46  ;;  %vm3347_vm14 = vcmp.gt.f32.partialorder %v3339_v60, 0.0  ;;  %v3355_v34 = vmul.f32 0.2, %v3339_v60  ;;  %v6637_v46 = vld [vmem:[#allocation16 + $0x154] sm:$0xf] }
 0x34e   :  { %v6046_v52 = vor.u32 %v6669_v44, %v6043_v4  ;;  %v5918_v57 = vor.u32 %v6637_v46, %v5915_v38  ;;  %v6226_v48 = vor.u32 %v6716_v30, %v6225_v55  ;;  %v6038_v6 = vor.u32 %v6667_v22, %v6035_v19  ;;  %v6019_v51 = vld [vmem:[#allocation16 + $0x228] sm:$0xf0]  ;;  %v6712_v35 = vld [vmem:[#allocation16 + $0x3a4] sm:$0xf0]  ;;  %v6631_v4 = vld [vmem:[#allocation16 + $0x124] sm:$0xf] }
 0x34f   :  { %v2970_v58 = vpop.f32.mrf.mxu0  ;;  %v2957_v25 = vpop.f32.mrf.mxu3  ;;  %v3167_v13 = vmul.f32 %v3149_v9, %v7159_v61  ;;  %v3175_v56 = vmul.f32 %v7534_v29, %v7534_v29  ;;  %v3363_v50 = vsel %vm3347_vm14, %v3339_v60, %v3355_v34  ;;  %4241 = vmatpush.bf16.msra.mxu2 %v6242_v24  ;;  %v5907_v9 = vld [vmem:[#allocation16 + $0x148] sm:$0xf0]  ;;  %v6217_v34 = vld [vmem:[#allocation16 + $0x3b0] sm:$0xf]  ;;  %v6209_v24 = vld [vmem:[#allocation16 + $0x3a0] sm:$0xf]  ;;  %v6022_v43 = vor.u32 %v6663_v49, %v6019_v51 }
 0x350   :  { %v7541_v28 = vpack.c.bf16 %v3363_v50, %v3363_v50  ;;  %4234 = vmatpush.bf16.msra.mxu1 %v6130_v20  ;;  %4273 = vmatpush.bf16.msrb.mxu0 %v5814_v2  ;;  %v6714_v20 = vld [vmem:[#allocation16 + $0x3b4] sm:$0xf0]  ;;  %v6633_v50 = vld [vmem:[#allocation16 + $0x134] sm:$0xf]  ;;  %v6201_v22 = vld [vmem:[#allocation16 + $0x390] sm:$0xf] }
 0x351   :  { %v3183_v54 = vsub.f32 %v3167_v13, %v3175_v56  ;;  %v6027_v13 = vld [vmem:[#allocation16 + $0x238] sm:$0xf0]  ;;  %v5910_v56 = vor.u32 %v6635_v63, %v5907_v9  ;;  %v6218_v62 = vor.u32 %v6714_v20, %v6217_v34  ;;  %v6661_v46 = vld [vmem:[#allocation16 + $0x214] sm:$0xf]  ;;  %v6710_v19 = vld [vmem:[#allocation16 + $0x394] sm:$0xf0] }
 0x352   :  { %v2981_v5 = vpop.f32.mrf.mxu1  ;;  %4209 = vmatmul.bf16.vlgmr.msrb.gmra.mxu3 %v7541_v28  ;;  %v6030_v2 = vor.u32 %v6665_v8, %v6027_v13  ;;  %v6202_v63 = vor.u32 %v6710_v19, %v6201_v22  ;;  %v5883_v9 = vld [vmem:[#allocation16 + $0x118] sm:$0xf0]  ;;  %v6193_v20 = vld [vmem:[#allocation16 + $0x380] sm:$0xf] }
 0x353   :  { %v7539_v11 = vadd.f32 0.8, %v3183_v54  ;;  %4305 = vmatpush.bf16.msrb.mxu3 %v6062_v23  ;;  %v2982_v47 = vadd.f32 %v2981_v5, %v2969_v7  ;;  %4242 = vmatpush.bf16.msra.mxu2 %v6234_v1  ;;  %v5899_v23 = vld [vmem:[#allocation16 + $0x138] sm:$0xf0]  ;;  %v5891_v7 = vld [vmem:[#allocation16 + $0x128] sm:$0xf0] }
 0x354   :  { %4279 = vmatpush.bf16.msrb.mxu1 %v5934_v45  ;;  %v5902_v45 = vor.u32 %v6633_v50, %v5899_v23  ;;  %v6011_v1 = vld [vmem:[#allocation16 + $0x218] sm:$0xf0] }
 0x355   :  { %6767 = vrsqrt.f32 %v7539_v11  ;;  %vm3258_vm0 = vweird.f32 %v7539_v11  ;;  %v6014_v30 = vor.u32 %v6661_v46, %v6011_v1  ;;  %v5979_v46 = vld [vmem:[#allocation16 + $0x1d8] sm:$0xf0] }
 0x357   :  { %4306 = vmatpush.bf16.msrb.mxu3 %v6054_v36  ;;  %4243 = vmatpush.bf16.msra.mxu2 %v6226_v48  ;;  %v6629_v48 = vld [vmem:[#allocation16 + $0x114] sm:$0xf]  ;;  %v6655_v36 = vld [vmem:[#allocation16 + $0x1e4] sm:$0xf] }
 0x358   :  { %4280 = vmatpush.bf16.msrb.mxu1 %v5926_v37  ;;  %v7573_v37 = vld [vmem:[#allocation14] ss:$2 sm:$0xff] }
 0x359   :  { %v3297_v44 = vperm.slane %v7573_v37, 5 }
 0x35a   :  { %v2983_v15 = vpop.f32.mrf.mxu1 }
 0x35b   :  { %v7547_v58 = vpop.eup %6767  ;;  %4307 = vmatpush.bf16.msrb.mxu3 %v6046_v52  ;;  %v3191_v15 = vsub.f32 %v7518_v16, %v7534_v29  ;;  %4244 = vmatpush.bf16.msra.mxu2 %v6218_v62  ;;  %v5894_v52 = vor.u32 %v6631_v4, %v5891_v7  ;;  %v6627_v62 = vld [vmem:[#allocation16 + $0x104] sm:$0xf]  ;;  %v6685_v7 = vld [vmem:[#allocation16 + $0x2d4] sm:$0xf] }
 0x35c   :  { %v3253_v25 = vmul.f32 %v7547_v58, %v7539_v11  ;;  %4281 = vmatpush.bf16.msrb.mxu1 %v5918_v57  ;;  %vm3259_vm15 = vweird.f32 %v7547_v58  ;;  %v6210_v11 = vor.u32 %v6712_v35, %v6209_v24  ;;  %v6687_v24 = vld [vmem:[#allocation16 + $0x2e4] sm:$0xf]  ;;  %v6115_v35 = vld [vmem:[#allocation16 + $0x2e8] sm:$0xf0] }
 0x35d   :  { %vm7569_vm1 = vmor %vm3258_vm0, %vm3259_vm15  ;;  %v6118_v4 = vor.u32 %v6687_v24, %v6115_v35 }
 0x35e   :  { %v2994_v59 = vpop.f32.mrf.mxu2  ;;  %v3254_v3 = vmul.f32 %v7547_v58, %v3253_v25 }
 0x35f   :  { %v7551_v26 = vadd.f32 %v2994_v59, %v2982_v47  ;;  %4308 = vmatpush.bf16.msrb.mxu3 %v6038_v6  ;;  %v7580_v47 = vld [vmem:[#allocation14 + $0x1] ss:$2 sm:$0xff]  ;;  %4245 = vmatpush.bf16.msra.mxu2 %v6210_v11  ;;  %v5886_v6 = vor.u32 %v6629_v48, %v5883_v9 }
 0x360   :  { %v3255_v17 = vmul.f32 0.5, %v3254_v3  ;;  %4282 = vmatpush.bf16.msrb.mxu1 %v5910_v56  ;;  %v6003_v56 = vld [vmem:[#allocation16 + $0x208] sm:$0xf0]  ;;  %v6091_v48 = vld [vmem:[#allocation16 + $0x2b8] sm:$0xf0] }
 0x361   :  { %v3086_v5 = vrot.slane %v7551_v26, 4  ;;  %v3112_v60 = vmul.f32 %v7551_v26, %v7551_v26 }
 0x362   :  { %v3256_v14 = vsub.f32 1.5, %v3255_v17  ;;  %4261 = vmatmul.bf16.vlgmr.msra.gmra.mxu3 %v7434_v31  ;;  %v3324_v31 = vperm.slane %v7580_v47, 5  ;;  %v6689_v17 = vld [vmem:[#allocation16 + $0x2f4] sm:$0xf] }
 0x363   :  { %v3087_v18 = vadd.f32 %v3086_v5, %v7551_v26  ;;  %v3150_v41 = vrot.slane %v3112_v60, 4  ;;  %4309 = vmatpush.bf16.msrb.mxu3 %v6030_v2  ;;  %v6708_v2 = vld [vmem:[#allocation16 + $0x384] sm:$0xf0]  ;;  %4246 = vmatpush.bf16.msra.mxu2 %v6202_v63  ;;  %v6681_v63 = vld [vmem:[#allocation16 + $0x2b4] sm:$0xf] }
 0x364   :  { %v3257_v33 = vmul.f32 %v7547_v58, %v3256_v14  ;;  %4283 = vmatpush.bf16.msrb.mxu1 %v5902_v45  ;;  %v6194_v23 = vor.u32 %v6708_v2, %v6193_v20  ;;  %v5875_v14 = vld [vmem:[#allocation16 + $0x108] sm:$0xf0] }
 0x365   :  { %v3088_v0 = vrot.slane %v3087_v18, 2  ;;  %v3151_v27 = vadd.f32 %v3150_v41, %v3112_v60  ;;  %v6659_v60 = vld [vmem:[#allocation16 + $0x204] sm:$0xf]  ;;  %v5878_v45 = vor.u32 %v6627_v62, %v5875_v14 }
 0x366   :  { %v2996_v32 = vpop.f32.mrf.mxu2  ;;  %v3261_v16 = vsel %vm7569_vm1, %v7547_v58, %v3257_v33  ;;  %v5995_v33 = vld [vmem:[#allocation16 + $0x1f8] sm:$0xf0]  ;;  %v6679_v62 = vld [vmem:[#allocation16 + $0x2a4] sm:$0xf] }
 0x367   :  { %v7558_v40 = vpop.f32.mrf.mxu3  ;;  %v7560_v54 = vpop.f32.mrf.mxu0  ;;  %v3089_v53 = vadd.f32 %v3088_v0, %v3087_v18  ;;  %v3152_v21 = vrot.slane %v3151_v27, 2  ;;  %v3287_v38 = vmul.f32 %v3261_v16, %v3191_v15  ;;  %4310 = vmatpush.bf16.msrb.mxu3 %v6022_v43  ;;  %v6123_v18 = vld [vmem:[#allocation16 + $0x2f8] sm:$0xf0]  ;;  %v6657_v32 = vld [vmem:[#allocation16 + $0x1f4] sm:$0xf]  ;;  %4247 = vmatpush.bf16.msra.mxu2 %v6194_v23 }
 0x368   :  { %4284 = vmatpush.bf16.msrb.mxu1 %v5894_v52  ;;  %v6126_v51 = vor.u32 %v6689_v17, %v6123_v18  ;;  %v5998_v15 = vor.u32 %v6657_v32, %v5995_v33  ;;  %v6107_v16 = vld [vmem:[#allocation16 + $0x2d8] sm:$0xf0]  ;;  %v6653_v43 = vld [vmem:[#allocation16 + $0x1d4] sm:$0xf]  ;;  %v6647_v32 = vld [vmem:[#allocation16 + $0x1a4] sm:$0xf] }
 0x369   :  { %v3090_v29 = vrot.slane %v3089_v53, 1  ;;  %v3153_v42 = vadd.f32 %v3152_v21, %v3151_v27  ;;  %v3313_v25 = vmul.f32 %v3297_v44, %v3287_v38  ;;  %v6006_v27 = vor.u32 %v6659_v60, %v6003_v56  ;;  %v5987_v44 = vld [vmem:[#allocation16 + $0x1e8] sm:$0xf0] }
 0x36a   :  { %v6110_v38 = vor.u32 %v6685_v7, %v6107_v16  ;;  %v5982_v22 = vor.u32 %v6653_v43, %v5979_v46  ;;  %v6094_v56 = vor.u32 %v6681_v63, %v6091_v48  ;;  %v6645_v16 = vld [vmem:[#allocation16 + $0x194] sm:$0xf] }
 0x36b   :  { %v3091_v57 = vadd.f32 %v3090_v29, %v3089_v53  ;;  %v3154_v59 = vrot.slane %v3153_v42, 1  ;;  %v3340_v8 = vadd.f32 %v3324_v31, %v3313_v25  ;;  %4311 = vmatpush.bf16.msrb.mxu3 %v6014_v30  ;;  %4292 = vmatpush.bf16.msrb.mxu2 %v5998_v15  ;;  %v5990_v29 = vor.u32 %v6655_v36, %v5987_v44 }
 0x36c   :  { %4285 = vmatpush.bf16.msrb.mxu1 %v5886_v6  ;;  %v3325_v44 = vperm.slane %v7580_v47, 6 }
 0x36d   :  { %v7584_v3 = vmul.f32 %v3091_v57, %v7159_v61  ;;  %v3155_v5 = vadd.f32 %v3154_v59, %v3153_v42  ;;  %vm3348_vm2 = vcmp.gt.f32.partialorder %v3340_v8, 0.0  ;;  %v3356_v50 = vmul.f32 0.2, %v3340_v8  ;;  %v6683_v57 = vld [vmem:[#allocation16 + $0x2c4] sm:$0xf] }
 0x36e   :  { %v3021_v42 = vadd.f32 %v7560_v54, %v7558_v40  ;;  %v6099_v59 = vld [vmem:[#allocation16 + $0x2c8] sm:$0xf0] }
 0x36f   :  { %v3009_v55 = vpop.f32.mrf.mxu3  ;;  %v3022_v58 = vpop.f32.mrf.mxu0  ;;  %v3168_v41 = vmul.f32 %v3155_v5, %v7159_v61  ;;  %v3176_v34 = vmul.f32 %v7584_v3, %v7584_v3  ;;  %v3364_v49 = vsel %vm3348_vm2, %v3340_v8, %v3356_v50  ;;  %4312 = vmatpush.bf16.msrb.mxu3 %v6006_v27  ;;  %4293 = vmatpush.bf16.msrb.mxu2 %v5990_v29  ;;  %v6649_v8 = vld [vmem:[#allocation16 + $0x1b4] sm:$0xf]  ;;  %v6083_v50 = vld [vmem:[#allocation16 + $0x2a8] sm:$0xf0]  ;;  %v5947_v29 = vld [vmem:[#allocation16 + $0x198] sm:$0xf0] }
 0x370   :  { %v7591_v21 = vpack.c.bf16 %v3364_v49, %v3364_v49  ;;  %4286 = vmatpush.bf16.msrb.mxu1 %v5878_v45  ;;  %v6651_v55 = vld [vmem:[#allocation16 + $0x1c4] sm:$0xf]  ;;  %v5971_v58 = vld [vmem:[#allocation16 + $0x1c8] sm:$0xf0]  ;;  %v6102_v30 = vor.u32 %v6683_v57, %v6099_v59  ;;  %v3298_v45 = vperm.slane %v7573_v37, 6 }
 0x371   :  { %v3184_v0 = vsub.f32 %v3168_v41, %v3176_v34  ;;  %v5974_v9 = vor.u32 %v6651_v55, %v5971_v58  ;;  %v7608_v34 = vld [vmem:[%s7649_s10] sm:$0x3]  ;;  %v5955_v49 = vld [vmem:[#allocation16 + $0x1a8] sm:$0xf0]  ;;  %v6675_v57 = vld [vmem:[#allocation16 + $0x284] sm:$0xf] }
 0x372   :  { %v3033_v13 = vpop.f32.mrf.mxu1  ;;  %4222 = vmatmul.bf16.vlgmr.msra.gmra.mxu0 %v7591_v21  ;;  %4313 = vmatmul.bf16.vlgmr.msrb.gmra.mxu3 %v7541_v28  ;;  %v3505_v33 = vperm.slane %v7608_v34, 0  ;;  %v6067_v59 = vld [vmem:[#allocation16 + $0x288] sm:$0xf0]  ;;  %s7049_s10 = smov [#allocation17]  }
 0x373   :  { %v7589_v53 = vadd.f32 0.8, %v3184_v0  ;;  %4318 = vmatpush.bf16.msra.mxu0 %v6126_v51  ;;  %v3034_v1 = vadd.f32 %v3033_v13, %v3021_v42  ;;  %4294 = vmatpush.bf16.msrb.mxu2 %v5982_v22  ;;  %v5963_v13 = vld [vmem:[#allocation16 + $0x1b8] sm:$0xf0]  ;;  %v3192_v51 = vsub.f32 %v7551_v26, %v7584_v3  ;;  %v5958_v26 = vor.u32 %v6647_v32, %v5955_v49  ;;  %v6705_v22 = vld [vmem:[#allocation16 + $0x374] sm:$0xf] }
 0x374   :  { %v5966_v23 = vor.u32 %v6649_v8, %v5963_v13  ;;  %s4366_s23 = sshll.u32 %s7049_s10, 4  ;;  %s4367_s23 = int_to_ptr.vmem [resolvable:$true] %s4366_s23 }
 0x375   :  { %6769 = vrsqrt.f32 %v7589_v53  ;;  %vm3268_vm4 = vweird.f32 %v7589_v53 }
 0x377   :  { %4319 = vmatpush.bf16.msra.mxu0 %v6118_v4  ;;  %4295 = vmatpush.bf16.msrb.mxu2 %v5974_v9  ;;  %v6075_v4 = vld [vmem:[#allocation16 + $0x298] sm:$0xf0]  ;;  %v6070_v9 = vor.u32 %v6675_v57, %v6067_v59  ;;  %v6719_v59 = vld [vmem:[#allocation16 + $0x3e4] sm:$0xf] }
 0x37a   :  { %v3035_v11 = vpop.f32.mrf.mxu1 }
 0x37b   :  { %v6770_v31 = vpop.eup %6769  ;;  %4320 = vmatpush.bf16.msra.mxu0 %v6110_v38  ;;  %v6677_v11 = vld [vmem:[#allocation16 + $0x294] sm:$0xf]  ;;  %4296 = vmatpush.bf16.msrb.mxu2 %v5966_v23  ;;  %v6163_v23 = vld [vmem:[#allocation16 + $0x348] sm:$0xf0] }
 0x37c   :  { %v3263_v19 = vmul.f32 %v6770_v31, %v7589_v53  ;;  %vm3269_vm3 = vweird.f32 %v6770_v31  ;;  %v6086_v53 = vor.u32 %v6679_v62, %v6083_v50  ;;  %v6078_v38 = vor.u32 %v6677_v11, %v6075_v4  ;;  %v6699_v50 = vld [vmem:[#allocation16 + $0x344] sm:$0xf] }
 0x37d   :  { %vm3270_vm5 = vmor %vm3268_vm4, %vm3269_vm3  ;;  %v6166_v32 = vor.u32 %v6699_v50, %v6163_v23 }
 0x37e   :  { %v3046_v52 = vpop.f32.mrf.mxu2  ;;  %v3264_v40 = vmul.f32 %v6770_v31, %v3263_v19  ;;  %v5950_v19 = vor.u32 %v6645_v16, %v5947_v29  ;;  %v6693_v16 = vld [vmem:[#allocation16 + $0x314] sm:$0xf]  ;;  %v6139_v29 = vld [vmem:[#allocation16 + $0x318] sm:$0xf0] }
 0x37f   :  { %v7599_v25 = vadd.f32 %v3046_v52, %v3034_v1  ;;  %4321 = vmatpush.bf16.msra.mxu0 %v6102_v30  ;;  %4297 = vmatpush.bf16.msrb.mxu2 %v5958_v26  ;;  %v5939_v30 = vld [vmem:[#allocation16 + $0x188] sm:$0xf0] }
 0x380   :  { %v3265_v5 = vmul.f32 0.5, %v3264_v40 }
 0x381   :  { %v3092_v28 = vrot.slane %v7599_v25, 4  ;;  %v3113_v54 = vmul.f32 %v7599_v25, %v7599_v25 }
 0x382   :  { %v3266_v17 = vsub.f32 1.5, %v3265_v5  ;;  %4274 = vmatmul.bf16.vlgmr.msrb.gmra.mxu0 %v7462_v10 }
 0x383   :  { %v3093_v60 = vadd.f32 %v3092_v28, %v7599_v25  ;;  %v3156_v6 = vrot.slane %v3113_v54, 4  ;;  %4322 = vmatpush.bf16.msra.mxu0 %v6094_v56  ;;  %v6187_v28 = vld [vmem:[#allocation16 + $0x378] sm:$0xf0]  ;;  %4298 = vmatpush.bf16.msrb.mxu2 %v5950_v19  ;;  %v6179_v56 = vld [vmem:[#allocation16 + $0x368] sm:$0xf0] }
 0x384   :  { %v3267_v14 = vmul.f32 %v6770_v31, %v3266_v17  ;;  %v6717_v19 = vld [vmem:[#allocation16 + $0x3d4] sm:$0xf] }
 0x385   :  { %v3094_v18 = vrot.slane %v3093_v60, 2  ;;  %v3157_v41 = vadd.f32 %v3156_v6, %v3113_v54  ;;  %v6643_v54 = vld [vmem:[#allocation16 + $0x184] sm:$0xf] }
 0x386   :  { %v3048_v2 = vpop.f32.mrf.mxu2  ;;  %v3271_v24 = vsel %vm3270_vm5, %v6770_v31, %v3267_v14  ;;  %v5942_v6 = vor.u32 %v6643_v54, %v5939_v30  ;;  %v6713_v30 = vld [vmem:[#allocation16 + $0x3b4] sm:$0xf] }
 0x387   :  { %v4158_v20 = vpop.f32.mrf.mxu3  ;;  %v3095_v0 = vadd.f32 %v3094_v18, %v3093_v60  ;;  %v3158_v27 = vrot.slane %v3157_v41, 2  ;;  %v3288_v36 = vmul.f32 %v3271_v24, %v3192_v51  ;;  %4323 = vmatpush.bf16.msra.mxu0 %v6086_v53  ;;  %v6190_v60 = vor.u32 %v6705_v22, %v6187_v28  ;;  %v6697_v51 = vld [vmem:[#allocation16 + $0x334] sm:$0xf]  ;;  %v6243_v22 = vld [vmem:[#allocation16 + $0x3e8] sm:$0xf0] }
 0x388   :  { %v4159_v46 = vadd.f32 %v4158_v20, %v3505_v33  ;;  %4299 = vmatpush.bf16.msrb.mxu2 %v5942_v6  ;;  %v6171_v20 = vld [vmem:[#allocation16 + $0x358] sm:$0xf0]  ;;  %v6227_v28 = vld [vmem:[#allocation16 + $0x3c8] sm:$0xf0] }
 0x389   :  { %v3096_v35 = vrot.slane %v3095_v0, 1  ;;  %v3159_v15 = vadd.f32 %v3158_v27, %v3157_v41  ;;  %v3314_v42 = vmul.f32 %v3298_v45, %v3288_v36  ;;  %v6701_v41 = vld [vmem:[#allocation16 + $0x354] sm:$0xf]  ;;  %v6155_v45 = vld [vmem:[#allocation16 + $0x338] sm:$0xf0] }
 0x38a   :  { %v6174_v2 = vor.u32 %v6701_v41, %v6171_v20 }
 0x38b   :  { %v3097_v3 = vadd.f32 %v3096_v35, %v3095_v0  ;;  %v3160_v7 = vrot.slane %v3159_v15, 1  ;;  %v3341_v31 = vadd.f32 %v3325_v44, %v3314_v42  ;;  %v4171_v52 = vpop.f32.mrf.mxu0  ;;  %4324 = vmatpush.bf16.msra.mxu0 %v6078_v38  ;;  %v6158_v35 = vor.u32 %v6697_v51, %v6155_v45  ;;  %v6251_v38 = vld [vmem:[#allocation16 + $0x3f8] sm:$0xf0] }
 0x38c   :  { %v4172_v40 = vadd.f32 %v4171_v52, %v4159_v46  ;;  %v3299_v44 = vperm.slane %v7573_v37, 7 }
 0x38d   :  { %v7619_v43 = vmul.f32 %v3097_v3, %v7159_v61  ;;  %v3161_v10 = vadd.f32 %v3160_v7, %v3159_v15  ;;  %vm3349_vm6 = vcmp.gt.f32.partialorder %v3341_v31, 0.0  ;;  %v3357_v63 = vmul.f32 0.2, %v3341_v31  ;;  %v6695_v15 = vld [vmem:[#allocation16 + $0x324] sm:$0xf] }
 0x38e   :  { %v3326_v7 = vperm.slane %v7580_v47, 7  ;;  %v6246_v47 = vor.u32 %v6719_v59, %v6243_v22 }
 0x38f   :  { %v4160_v1 = vpop.f32.mrf.mxu3  ;;  %v3169_v55 = vmul.f32 %v3161_v10, %v7159_v61  ;;  %v3177_v58 = vmul.f32 %v7619_v43, %v7619_v43  ;;  %v3365_v5 = vsel %vm3349_vm6, %v3341_v31, %v3357_v63  ;;  %v6703_v61 = vld [vmem:[#allocation16 + $0x364] sm:$0xf]  ;;  %4325 = vmatpush.bf16.msra.mxu0 %v6070_v9  ;;  %v3193_v36 = vsub.f32 %v7599_v25, %v7619_v43  ;;  %v6131_v25 = vld [vmem:[#allocation16 + $0x308] sm:$0xf0]  ;;  %v6721_v43 = vld [vmem:[#allocation16 + $0x3f4] sm:$0xf] }
 0x390   :  { %v7624_v13 = vpack.c.bf16 %v3365_v5, %v3365_v5  ;;  %v6182_v18 = vor.u32 %v6703_v61, %v6179_v56  ;;  %v6142_v10 = vor.u32 %v6693_v16, %v6139_v29  ;;  %v6691_v1 = vld [vmem:[#allocation16 + $0x304] sm:$0xf]  ;;  %v6254_v52 = vor.u32 %v6721_v43, %v6251_v38  ;;  %v6219_v63 = vld [vmem:[#allocation16 + $0x3b8] sm:$0xf0]  ;;  %v6211_v5 = vld [vmem:[#allocation16 + $0x3a8] sm:$0xf0] }
 0x391   :  { %v3185_v48 = vsub.f32 %v3169_v55, %v3177_v58  ;;  %v6235_v55 = vld [vmem:[#allocation16 + $0x3d8] sm:$0xf0]  ;;  %v6711_v9 = vld [vmem:[#allocation16 + $0x3a4] sm:$0xf]  ;;  %v6709_v61 = vld [vmem:[#allocation16 + $0x394] sm:$0xf] }
 0x392   :  { %4235 = vmatmul.bf16.vlgmr.msra.gmra.mxu1 %v7624_v13  ;;  %4326 = vmatmul.bf16.vlgmr.msra.gmra.mxu0 %v7591_v21  ;;  %v6147_v21 = vld [vmem:[#allocation16 + $0x328] sm:$0xf0]  ;;  %v6238_v58 = vor.u32 %v6717_v19, %v6235_v55 }
 0x393   :  { %v3201_v8 = vadd.f32 0.8, %v3185_v48  ;;  %4331 = vmatpush.bf16.msra.mxu1 %v6190_v60  ;;  %v4173_v17 = vpop.f32.mrf.mxu0  ;;  %v6150_v26 = vor.u32 %v6695_v15, %v6147_v21  ;;  %v6222_v48 = vor.u32 %v6713_v30, %v6219_v63 }
 0x394   :  { %v6707_v17 = vld [vmem:[#allocation16 + $0x384] sm:$0xf] }
 0x395   :  { %6771 = vrsqrt.f32 %v3201_v8  ;;  %vm3278_vm8 = vweird.f32 %v3201_v8 }
 0x397   :  { %4332 = vmatpush.bf16.msra.mxu1 %v6182_v18  ;;  %v6195_v18 = vld [vmem:[#allocation16 + $0x388] sm:$0xf0] }
 0x398   :  { %v6198_v20 = vor.u32 %v6707_v17, %v6195_v18 }
 0x39b   :  { %v6772_v62 = vpop.eup %6771  ;;  %4333 = vmatpush.bf16.msra.mxu1 %v6174_v2  ;;  %v4184_v27 = vpop.f32.mrf.mxu1 }
 0x39c   :  { %v3273_v14 = vmul.f32 %v6772_v62, %v3201_v8  ;;  %v4185_v49 = vadd.f32 %v4184_v27, %v4172_v40  ;;  %vm3279_vm7 = vweird.f32 %v6772_v62  ;;  %v6715_v40 = vld [vmem:[#allocation16 + $0x3c4] sm:$0xf]  ;;  %v6214_v8 = vor.u32 %v6711_v9, %v6211_v5 }
 0x39d   :  { %vm3280_vm9 = vmor %vm3278_vm8, %vm3279_vm7  ;;  %v6230_v54 = vor.u32 %v6715_v40, %v6227_v28 }
 0x39e   :  { %v3274_v0 = vmul.f32 %v6772_v62, %v3273_v14 }
 0x39f   :  { %4334 = vmatpush.bf16.msra.mxu1 %v6166_v32  ;;  %v3506_v32 = vperm.slane %v7608_v34, 1 }
 0x3a0   :  { %v3275_v33 = vmul.f32 0.5, %v3274_v0 }
 0x3a2   :  { %v3276_v24 = vsub.f32 1.5, %v3275_v33  ;;  %4287 = vmatmul.bf16.vlgmr.msrb.gmra.mxu1 %v7481_v12  ;;  %v6134_v12 = vor.u32 %v6691_v1, %v6131_v25 }
 0x3a3   :  { %4335 = vmatpush.bf16.msra.mxu1 %v6158_v35  ;;  %v4186_v4 = vpop.f32.mrf.mxu1 }
 0x3a4   :  { %v3277_v53 = vmul.f32 %v6772_v62, %v3276_v24 }
 0x3a6   :  { %v3281_v11 = vsel %vm3280_vm9, %v6772_v62, %v3277_v53 }
 0x3a7   :  { %v3289_v3 = vmul.f32 %v3281_v11, %v3193_v36  ;;  %4336 = vmatpush.bf16.msra.mxu1 %v6150_v26 }
 0x3a9   :  { %v3315_v42 = vmul.f32 %v3299_v44, %v3289_v3 }
 0x3ab   :  { %v3342_v46 = vadd.f32 %v3326_v7, %v3315_v42  ;;  %4337 = vmatpush.bf16.msra.mxu1 %v6142_v10 }
 0x3ad   :  { %vm3350_vm10 = vcmp.gt.f32.partialorder %v3342_v46, 0.0  ;;  %v3358_v37 = vmul.f32 0.2, %v3342_v46 }
 0x3af   :  { %v3366_v31 = vsel %vm3350_vm10, %v3342_v46, %v3358_v37  ;;  %4338 = vmatpush.bf16.msra.mxu1 %v6134_v12 }
 0x3b0   :  { %v3374_v57 = vpack.c.bf16 %v3366_v31, %v3366_v31 }
 0x3b2   :  { %4248 = vmatmul.bf16.vlgmr.msra.gmra.mxu2 %v3374_v57  ;;  %4339 = vmatmul.bf16.vlgmr.msra.gmra.mxu1 %v7624_v13  ;;  %v6203_v13 = vld [vmem:[#allocation16 + $0x398] sm:$0xf0] }
 0x3b3   :  { %4344 = vmatpush.bf16.msra.mxu2 %v6254_v52  ;;  %v6206_v56 = vor.u32 %v6709_v61, %v6203_v13 }
 0x3b7   :  { %4345 = vmatpush.bf16.msra.mxu2 %v6246_v47 }
 0x3ba   :  { %v4197_v60 = vpop.f32.mrf.mxu2 }
 0x3bb   :  { %4346 = vmatpush.bf16.msra.mxu2 %v6238_v58  ;;  %v4198_v6 = vadd.f32 %v4197_v60, %v4185_v49 }
 0x3bf   :  { %4347 = vmatpush.bf16.msra.mxu2 %v6230_v54 }
 0x3c2   :  { %4300 = vmatmul.bf16.vlgmr.msrb.gmra.mxu2 %v7511_v39  ;;  %v4199_v41 = vpop.f32.mrf.mxu2 }
 0x3c3   :  { %4348 = vmatpush.bf16.msra.mxu2 %v6222_v48 }
 0x3c7   :  { %4349 = vmatpush.bf16.msra.mxu2 %v6214_v8 }
 0x3cb   :  { %4350 = vmatpush.bf16.msra.mxu2 %v6206_v56 }
 0x3cf   :  { %4351 = vmatpush.bf16.msra.mxu2 %v6198_v20 }
 0x3d2   :  { %4352 = vmatmul.bf16.vlgmr.msra.gmra.mxu2 %v3374_v57 }
 0x3d5   :  { %v4210_v2 = vpop.f32.mrf.mxu3 }
 0x3d6   :  { %v4211_v62 = vadd.f32 %v4210_v2, %v4198_v6 }
 0x3dd   :  { %v4212_v50 = vpop.f32.mrf.mxu3 }
 0x3e5   :  { %v4262_v23 = vpop.f32.mrf.mxu3 }
 0x3e6   :  { %v4263_v49 = vadd.f32 %v4262_v23, %v3506_v32 }
 0x3ed   :  { %v4264_v0 = vpop.f32.mrf.mxu3 }
 0x3ef   :  { %v4223_v14 = vpop.f32.mrf.mxu0 }
 0x3f0   :  { %v4224_v11 = vadd.f32 %v4223_v14, %v4211_v62 }
 0x3f5   :  { %v4314_v27 = vpop.f32.mrf.mxu3 }
 0x3f7   :  { %v4225_v39 = vpop.f32.mrf.mxu0 }
 0x3fd   :  { %v4316_v33 = vpop.f32.mrf.mxu3 }
 0x3ff   :  { %v4275_v51 = vpop.f32.mrf.mxu0 }
 0x400   :  { %v4276_v45 = vadd.f32 %v4275_v51, %v4263_v49 }
 0x407   :  { %v4277_v24 = vpop.f32.mrf.mxu0 }
 0x40f   :  { %v4236_v35 = vpop.f32.mrf.mxu1  ;;  %v4327_v15 = vpop.f32.mrf.mxu0 }
 0x410   :  { %v4237_v26 = vadd.f32 %v4236_v35, %v4224_v11 }
 0x417   :  { %v4238_v21 = vpop.f32.mrf.mxu1  ;;  %v4329_v53 = vpop.f32.mrf.mxu0 }
 0x41f   :  { %v4288_v36 = vpop.f32.mrf.mxu1 }
 0x420   :  { %v4289_v10 = vadd.f32 %v4288_v36, %v4276_v45 }
 0x427   :  { %v4290_v44 = vpop.f32.mrf.mxu1 }
 0x42f   :  { %v4340_v4 = vpop.f32.mrf.mxu1 }
 0x435   :  { %v4249_v3 = vpop.f32.mrf.mxu2 }
 0x436   :  { %v4250_v7 = vadd.f32 %v4249_v3, %v4237_v26 }
 0x437   :  { %v4342_v16 = vpop.f32.mrf.mxu1 }
 0x438   :  { %6773 = vtanh.f32 %v4250_v7 }
 0x43d   :  { %v4251_v29 = vpop.f32.mrf.mxu2 }
 0x43e   :  { %v6774_v34 = vpop.eup %6773 }
 0x43f   :  { %4359 = vst [vmem:[#allocation17] sm:$0xff] %v6774_v34 }
 0x445   :  { %v4301_v42 = vpop.f32.mrf.mxu2 }
 0x446   :  { %v4302_v46 = vadd.f32 %v4301_v42, %v4289_v10 }
 0x448   :  { %v4315_v1 = vadd.f32 %v4314_v27, %v4302_v46 }
 0x44a   :  { %v4328_v43 = vadd.f32 %v4327_v15, %v4315_v1 }
 0x44c   :  { %v4341_v38 = vadd.f32 %v4340_v4, %v4328_v43 }
 0x44d   :  { %v4303_v25 = vpop.f32.mrf.mxu2 }
 0x455   :  { %v4353_v37 = vpop.f32.mrf.mxu2 }
 0x456   :  { %v4354_v12 = vadd.f32 %v4353_v37, %v4341_v38 }
 0x458   :  { %6775 = vtanh.f32 %v4354_v12 }
 0x45d   :  { %v4355_v31 = vpop.f32.mrf.mxu2 }
 0x45e   :  { %v6776_v52 = vpop.eup %6775 }
 0x45f   :  { %4360 = vst [vmem:[#allocation17 + $0x8] sm:$0xff] %v6776_v52 }
 0x460   :  { %4371 = dma.vmem_to_hbm [thread:$0]  %s4367_s23, 256, %s4369_s25, [#allocation4]  }
 0x461   :  { %7029 = dma.done.wait [#allocation4], 256  }
 0x462   :  { %7030 = vsyncadd [#allocation4], 4294967040 }
 0x463   :  { %4376 = vsyncpa [#allocation3], 1 }
 0x464   :  { %4377 = vsyncpa [#allocation6], 1 }
 0x465   :  { %4378 = vsyncpa [#allocation9], 1 }
 0x466   :  { %4379 = vsyncpa [#allocation12], 1 }
 0x467   :  { %4380 = vsyncpa [#allocation15], 1 }
 0x468   :  { %4381 = vsyncpa [#allocation4], 1 }

</bundles_post_ra>
